<compile_context>
chip_gen: v7x
topology: tpu7x:2x2x1
jax: 0.10.0
libtpu: 0.0.40
codegen_flags: <defaults>
</compile_context>

<pallas_src>
from functools import partial

import jax
import jax.numpy as jnp
from jax import lax
from jax.experimental import pallas as pl
from jax.experimental.pallas import tpu as pltpu

# ------------------------------ configuration -------------------------------
B = 2              # per-view batch size
C = 4              # input channels
H = W = 16         # spatial size
HW = H * W
CP = C * 9         # im2col patch width (3x3 taps)
CPP = 128          # patch width zero-padded to a full lane (lane-dense loads)
DIM = 32           # backbone feature dim (stand-in for resnet fc.in_features)
DIM_OUT = 128      # MoCo projection dim (lane-dense: multiple of 128)
NUM_K_VIEWS = 5    # number of key "views" in im_k -> 5*B rows (divisible by 5)
K_QUEUE = 20       # queue size (small)
MOMENTUM = 0.999


# ------------------------------- Pallas kernels ------------------------------
def encoder_kernel(patches_ref, pool_ref, cw_ref, cb_ref,
                   w1_ref, b1_ref, w2_ref, b2_ref, out_ref):
    """Fused whole-batch encoder: conv-as-matmul -> ReLU -> GAP -> MLP -> L2 norm.

    Single grid step; all intermediates stay in VMEM / vregs.
    """
    x = patches_ref[...]                                          # (R*HW, CPP)
    y = jnp.dot(x, cw_ref[...], preferred_element_type=jnp.float32)
    y = jnp.maximum(y + cb_ref[...], 0.0)                         # (R*HW, DIM)
    # Global average pool as an MXU matmul with a block-diagonal 1/HW matrix.
    feat = jnp.dot(pool_ref[...], y, preferred_element_type=jnp.float32)  # (R, DIM)
    h = jnp.maximum(
        jnp.dot(feat, w1_ref[...], preferred_element_type=jnp.float32)
        + b1_ref[...], 0.0)                                        # (R, DIM)
    o = (jnp.dot(h, w2_ref[...], preferred_element_type=jnp.float32)
         + b2_ref[...])                                            # (R, DIM_OUT)
    ss = jnp.sum(o * o, axis=1, keepdims=True)
    # == o / max(||o||, 1e-12); rsqrt goes to the EUP slot (cheap epilogue).
    out_ref[...] = o * lax.rsqrt(jnp.maximum(ss, 1e-24))


def make_ema_kernel(m):
    def ema_kernel(pq_ref, pk_ref, out_ref):
        out_ref[...] = pk_ref[...] * m + pq_ref[...] * (1.0 - m)
    return ema_kernel


# --------------------------------- wrappers ----------------------------------
def _im2col(x_nchw):
    # NCHW -> NHWC, 3x3 / stride 1 / pad 1 patches -> (R, H*W, CPP) with the
    # patch axis zero-padded to a full 128-lane width.
    # TODO(synk): at real (non-toy) backbone sizes, fold im2col into the kernel
    # as 9 shifted-tap matmuls over a VMEM-resident NHWC tile to avoid the 9x
    # HBM duplication.
    x = jnp.transpose(x_nchw, (0, 2, 3, 1))
    b, h, w, c = x.shape
    xp = jnp.pad(x, ((0, 0), (1, 1), (1, 1), (0, 0)))
    taps = [xp[:, dy:dy + h, dx:dx + w, :] for dy in range(3) for dx in range(3)]
    p = jnp.concatenate(taps, axis=-1).reshape(b, h * w, c * 9)
    return jnp.pad(p, ((0, 0), (0, 0), (0, CPP - CP)))


def encoder_forward(params, x_nchw):
    """Fused encoder over a batch of images; returns L2-normalized embeddings."""
    patches = _im2col(x_nchw).astype(jnp.float32)                  # (R, HW, CPP)
    r = patches.shape[0]
    flat = patches.reshape(r * HW, CPP)                            # (R*HW, CPP)
    # Block-diagonal mean-pooling matrix: row i averages rows [i*HW, (i+1)*HW).
    pool = jnp.repeat(jnp.eye(r, dtype=jnp.float32), HW, axis=1) / HW  # (R, R*HW)
    # Zero-pad the conv weight rows to the padded patch width (no-op math).
    cw = jnp.pad(params["conv_w"], ((0, CPP - CP), (0, 0)))        # (CPP, DIM)

    out = pl.pallas_call(
        encoder_kernel,
        out_shape=jax.ShapeDtypeStruct((r, DIM_OUT), jnp.float32),
        grid=(1,),
        in_specs=[
            pl.BlockSpec((r * HW, CPP), lambda i: (0, 0)),
            pl.BlockSpec((r, r * HW), lambda i: (0, 0)),
            pl.BlockSpec((CPP, DIM), lambda i: (0, 0)),
            pl.BlockSpec((1, DIM), lambda i: (0, 0)),
            pl.BlockSpec((DIM, DIM), lambda i: (0, 0)),
            pl.BlockSpec((1, DIM), lambda i: (0, 0)),
            pl.BlockSpec((DIM, DIM_OUT), lambda i: (0, 0)),
            pl.BlockSpec((1, DIM_OUT), lambda i: (0, 0)),
        ],
        out_specs=pl.BlockSpec((r, DIM_OUT), lambda i: (0, 0)),
        compiler_params=pltpu.CompilerParams(
            dimension_semantics=("arbitrary",)),
    )(flat, pool, cw, params["conv_b"],
      params["w1"], params["b1"], params["w2"], params["b2"])
    return out


def momentum_update(params_q, params_k, m):
    """One fused Pallas EMA over ALL parameters (flattened, lane-padded)."""
    names = sorted(params_q.keys())
    flat_q = jnp.concatenate([params_q[n].ravel() for n in names])
    flat_k = jnp.concatenate([params_k[n].ravel() for n in names])
    total = flat_q.shape[0]
    padded = pl.cdiv(total, 8 * 128) * 8 * 128
    fq = jnp.pad(flat_q, (0, padded - total)).reshape(-1, 128)
    fk = jnp.pad(flat_k, (0, padded - total)).reshape(-1, 128)
    new_flat = pl.pallas_call(
        make_ema_kernel(m),
        out_shape=jax.ShapeDtypeStruct(fk.shape, fk.dtype),
        grid=(1,),
        in_specs=[pl.BlockSpec(fq.shape, lambda i: (0, 0)),
                  pl.BlockSpec(fk.shape, lambda i: (0, 0))],
        out_specs=pl.BlockSpec(fk.shape, lambda i: (0, 0)),
    )(fq, fk).ravel()[:total]
    new_k, off = {}, 0
    for n in names:
        sz = params_k[n].size
        new_k[n] = new_flat[off:off + sz].reshape(params_k[n].shape)
        off += sz
    return new_k


def concat_all_gather(x):
    # TODO(synk): torch.distributed.all_gather — single device (world_size==1),
    # so the gather is the identity.
    return x


def batch_shuffle(x, key):
    # world_size == 1: the DDP gather is the identity; a jax.random permutation
    # stands in for the broadcast randperm.
    idx_shuffle = jax.random.permutation(key, x.shape[0])
    idx_unshuffle = jnp.argsort(idx_shuffle)
    return x[idx_shuffle], idx_unshuffle


def batch_unshuffle(x, idx_unshuffle):
    return x[idx_unshuffle]


def select_random_rows(matrix, key):
    n = matrix.shape[0]
    assert n % 5 == 0, "The number of rows must be divisible by 5"
    groups = n // 5
    offs = jax.random.randint(key, (groups,), 0, 5)   # randint(0, 4) per group
    return matrix[jnp.arange(groups) * 5 + offs]


def init_params(key):
    ks = jax.random.split(key, 6)
    s = 0.05
    return {
        "conv_w": s * jax.random.normal(ks[0], (CP, DIM), jnp.float32),
        "conv_b": s * jax.random.normal(ks[1], (1, DIM), jnp.float32),
        "w1":     s * jax.random.normal(ks[2], (DIM, DIM), jnp.float32),
        "b1":     s * jax.random.normal(ks[3], (1, DIM), jnp.float32),
        "w2":     s * jax.random.normal(ks[4], (DIM, DIM_OUT), jnp.float32),
        "b2":     s * jax.random.normal(ks[5], (1, DIM_OUT), jnp.float32),
    }


@partial(jax.jit, static_argnames=("training",))
def moco_forward(params_q, params_k, queue, queue_ptr, im_q, im_k,
                 shuffle_keys, select_key, training=True):
    # ---- query path (encoder_q): one fused Pallas call ----
    q = encoder_forward(params_q, im_q)               # (B, DIM_OUT), L2-normalized

    # ---- momentum update of the key encoder: one fused Pallas EMA call ----
    params_k = momentum_update(params_q, params_k, MOMENTUM)

    # ---- key path: shuffle each view, batch ALL views into ONE encoder call ----
    shuffled, unshuffle_idx = [], []
    for v in range(NUM_K_VIEWS):
        xs, idx_un = batch_shuffle(im_k[v], shuffle_keys[v])
        shuffled.append(xs)
        unshuffle_idx.append(idx_un)
    k_all = encoder_forward(params_k, jnp.concatenate(shuffled, axis=0))
    k_views = k_all.reshape(NUM_K_VIEWS, B, DIM_OUT)
    embeddings_k = jnp.concatenate(
        [batch_unshuffle(k_views[v], unshuffle_idx[v]) for v in range(NUM_K_VIEWS)],
        axis=0)                                       # (5*B, DIM_OUT)

    keys = select_random_rows(embeddings_k, select_key)

    if training:
        keys = concat_all_gather(keys)
        bs = keys.shape[0]
        # Traced modular enqueue (handles wraparound); no host sync on queue_ptr.
        rows = (queue_ptr + jnp.arange(bs, dtype=jnp.int32)) % K_QUEUE
        queue = queue.at[rows, :].set(keys)
        queue_ptr = (queue_ptr + bs) % K_QUEUE

    return (q, embeddings_k), params_k, queue, queue_ptr


if __name__ == "__main__":
    root = jax.random.PRNGKey(0)
    k_params, k_q, k_k, k_queue, k_shuf, k_sel = jax.random.split(root, 6)

    params_q = init_params(k_params)
    params_k = {n: v.copy() for n, v in params_q.items()}   # param_k.copy_(param_q)

    # Queue buffer; mirrors the reference module literally:
    # torch.randn(K, dim_out) followed by normalize(..., dim=0).
    queue = jax.random.normal(k_queue, (K_QUEUE, DIM_OUT), jnp.float32)
    queue = queue / jnp.maximum(
        jnp.sqrt(jnp.sum(queue * queue, axis=0, keepdims=True)), 1e-12)
    queue_ptr = jnp.int32(0)

    im_q = jax.random.normal(k_q, (B, C, H, W), jnp.float32)
    im_k = jax.random.normal(k_k, (NUM_K_VIEWS, B, C, H, W), jnp.float32)
    shuffle_keys = jax.random.split(k_shuf, NUM_K_VIEWS)

    (q, embeddings_k), params_k, queue, queue_ptr = moco_forward(
        params_q, params_k, queue, queue_ptr, im_q, im_k,
        shuffle_keys, k_sel, training=True)

    jax.block_until_ready((q, embeddings_k, queue, queue_ptr))
    assert q.shape == (B, DIM_OUT)
    assert embeddings_k.shape == (NUM_K_VIEWS * B, DIM_OUT)
    assert bool(jnp.all(jnp.isfinite(q)))
    assert bool(jnp.all(jnp.isfinite(embeddings_k)))
    # L2-normalized rows.
    assert bool(jnp.allclose(jnp.sum(q * q, axis=1), 1.0, atol=1e-4))
    print("KERNEL_OK")
</pallas_src>

<mosaic_0001>
module attributes {stable_mosaic.version = 11 : i64} {
  func.func @ema_kernel(%arg0: i32, %arg1: memref<56x128xf32, #tpu.memory_space<vmem>>, %arg2: memref<56x128xf32, #tpu.memory_space<vmem>>, %arg3: memref<56x128xf32, #tpu.memory_space<vmem>>) attributes {dimension_semantics = [#tpu.dimension_semantics<arbitrary>], iteration_bounds = array<i64: 1>, scalar_prefetch = 0 : i64, scratch_operands = 0 : i64, tpu.core_type = #tpu.core_type<tc>, window_params = [{pipeline_mode = #tpu.pipeline_mode<synchronous>, transform_indices = @transform_0, window_bounds = array<i64: 56, 128>}, {pipeline_mode = #tpu.pipeline_mode<synchronous>, transform_indices = @transform_1, window_bounds = array<i64: 56, 128>}, {pipeline_mode = #tpu.pipeline_mode<synchronous>, transform_indices = @transform_2, window_bounds = array<i64: 56, 128>}]} {
    %c0 = arith.constant 0 : index
    %c0_0 = arith.constant 0 : index
    %0 = vector.load %arg2[%c0, %c0_0] : memref<56x128xf32, #tpu.memory_space<vmem>>, vector<56x128xf32>
    %cst = arith.constant 9.990000e-01 : f32
    %1 = vector.broadcast %cst : f32 to vector<56x128xf32>
    %2 = arith.mulf %0, %1 : vector<56x128xf32>
    %c0_1 = arith.constant 0 : index
    %c0_2 = arith.constant 0 : index
    %3 = vector.load %arg1[%c0_1, %c0_2] : memref<56x128xf32, #tpu.memory_space<vmem>>, vector<56x128xf32>
    %cst_3 = arith.constant 1.000000e-03 : f32
    %4 = vector.broadcast %cst_3 : f32 to vector<56x128xf32>
    %5 = arith.mulf %3, %4 : vector<56x128xf32>
    %6 = arith.addf %2, %5 : vector<56x128xf32>
    %c0_4 = arith.constant 0 : index
    %c0_5 = arith.constant 0 : index
    %7 = vector.load %arg3[%c0_4, %c0_5] : memref<56x128xf32, #tpu.memory_space<vmem>>, vector<56x128xf32>
    tpu.vector_store %arg3[%c0_4, %c0_5], %6 {strides = array<i32>} : memref<56x128xf32, #tpu.memory_space<vmem>>, vector<56x128xf32>,
    return
  }
  func.func @transform_0(%arg0: i32) -> (i32, i32) {
    %c0_i32 = arith.constant 0 : i32
    %c0_i32_0 = arith.constant 0 : i32
    %c0_i32_1 = arith.constant 0 : i32
    return %c0_i32, %c0_i32_0 : i32, i32
  }
  func.func @transform_1(%arg0: i32) -> (i32, i32) {
    %c0_i32 = arith.constant 0 : i32
    %c0_i32_0 = arith.constant 0 : i32
    %c0_i32_1 = arith.constant 0 : i32
    return %c0_i32, %c0_i32_0 : i32, i32
  }
  func.func @transform_2(%arg0: i32) -> (i32, i32) {
    %c0_i32 = arith.constant 0 : i32
    %c0_i32_0 = arith.constant 0 : i32
    %c0_i32_1 = arith.constant 0 : i32
    return %c0_i32, %c0_i32_0 : i32, i32
  }
}

module attributes {stable_mosaic.version = 11 : i64} {
  func.func @encoder_kernel(%arg0: i32, %arg1: memref<2560x128xf32, #tpu.memory_space<vmem>>, %arg2: memref<10x2560xf32, #tpu.memory_space<vmem>>, %arg3: memref<128x32xf32, #tpu.memory_space<vmem>>, %arg4: memref<1x32xf32, #tpu.memory_space<vmem>>, %arg5: memref<32x32xf32, #tpu.memory_space<vmem>>, %arg6: memref<1x32xf32, #tpu.memory_space<vmem>>, %arg7: memref<32x128xf32, #tpu.memory_space<vmem>>, %arg8: memref<1x128xf32, #tpu.memory_space<vmem>>, %arg9: memref<10x128xf32, #tpu.memory_space<vmem>>) attributes {dimension_semantics = [#tpu.dimension_semantics<arbitrary>], iteration_bounds = array<i64: 1>, scalar_prefetch = 0 : i64, scratch_operands = 0 : i64, tpu.core_type = #tpu.core_type<tc>, window_params = [{pipeline_mode = #tpu.pipeline_mode<synchronous>, transform_indices = @transform_0, window_bounds = array<i64: 2560, 128>}, {pipeline_mode = #tpu.pipeline_mode<synchronous>, transform_indices = @transform_1, window_bounds = array<i64: 10, 2560>}, {pipeline_mode = #tpu.pipeline_mode<synchronous>, transform_indices = @transform_2, window_bounds = array<i64: 128, 32>}, {pipeline_mode = #tpu.pipeline_mode<synchronous>, transform_indices = @transform_3, window_bounds = array<i64: 1, 32>}, {pipeline_mode = #tpu.pipeline_mode<synchronous>, transform_indices = @transform_4, window_bounds = array<i64: 32, 32>}, {pipeline_mode = #tpu.pipeline_mode<synchronous>, transform_indices = @transform_5, window_bounds = array<i64: 1, 32>}, {pipeline_mode = #tpu.pipeline_mode<synchronous>, transform_indices = @transform_6, window_bounds = array<i64: 32, 128>}, {pipeline_mode = #tpu.pipeline_mode<synchronous>, transform_indices = @transform_7, window_bounds = array<i64: 1, 128>}, {pipeline_mode = #tpu.pipeline_mode<synchronous>, transform_indices = @transform_8, window_bounds = array<i64: 10, 128>}]} {
    %c0 = arith.constant 0 : index
    %c0_0 = arith.constant 0 : index
    %0 = vector.load %arg1[%c0, %c0_0] : memref<2560x128xf32, #tpu.memory_space<vmem>>, vector<2560x128xf32>
    %c0_1 = arith.constant 0 : index
    %c0_2 = arith.constant 0 : index
    %1 = vector.load %arg3[%c0_1, %c0_2] : memref<128x32xf32, #tpu.memory_space<vmem>>, vector<128x32xf32>
    %cst = arith.constant dense<0.000000e+00> : vector<2560x32xf32>
    %2 = tpu.matmul %0, %1, %cst {dimension_numbers = #tpu.dot_dimension_numbers<[1], [0], [0], [1], [0, 0, 1, 1], [], []>} : vector<2560x128xf32>, vector<128x32xf32>, vector<2560x32xf32> -> vector<2560x32xf32>
    %c0_3 = arith.constant 0 : index
    %c0_4 = arith.constant 0 : index
    %3 = vector.load %arg4[%c0_3, %c0_4] : memref<1x32xf32, #tpu.memory_space<vmem>>, vector<1x32xf32>
    %4 = vector.broadcast %3 : vector<1x32xf32> to vector<2560x32xf32>
    %5 = arith.addf %2, %4 : vector<2560x32xf32>
    %cst_5 = arith.constant 0.000000e+00 : f32
    %6 = vector.broadcast %cst_5 : f32 to vector<2560x32xf32>
    %7 = arith.maximumf %5, %6 : vector<2560x32xf32>
    %c0_6 = arith.constant 0 : index
    %c0_7 = arith.constant 0 : index
    %8 = vector.load %arg2[%c0_6, %c0_7] : memref<10x2560xf32, #tpu.memory_space<vmem>>, vector<10x2560xf32>
    %cst_8 = arith.constant dense<0.000000e+00> : vector<10x32xf32>
    %9 = tpu.matmul %8, %7, %cst_8 {dimension_numbers = #tpu.dot_dimension_numbers<[1], [0], [0], [1], [0, 0, 1, 1], [], []>} : vector<10x2560xf32>, vector<2560x32xf32>, vector<10x32xf32> -> vector<10x32xf32>
    %c0_9 = arith.constant 0 : index
    %c0_10 = arith.constant 0 : index
    %10 = vector.load %arg5[%c0_9, %c0_10] : memref<32x32xf32, #tpu.memory_space<vmem>>, vector<32x32xf32>
    %cst_11 = arith.constant dense<0.000000e+00> : vector<10x32xf32>
    %11 = tpu.matmul %9, %10, %cst_11 {dimension_numbers = #tpu.dot_dimension_numbers<[1], [0], [0], [1], [0, 0, 1, 1], [], []>} : vector<10x32xf32>, vector<32x32xf32>, vector<10x32xf32> -> vector<10x32xf32>
    %c0_12 = arith.constant 0 : index
    %c0_13 = arith.constant 0 : index
    %12 = vector.load %arg6[%c0_12, %c0_13] : memref<1x32xf32, #tpu.memory_space<vmem>>, vector<1x32xf32>
    %13 = vector.broadcast %12 : vector<1x32xf32> to vector<10x32xf32>
    %14 = arith.addf %11, %13 : vector<10x32xf32>
    %cst_14 = arith.constant 0.000000e+00 : f32
    %15 = vector.broadcast %cst_14 : f32 to vector<10x32xf32>
    %16 = arith.maximumf %14, %15 : vector<10x32xf32>
    %c0_15 = arith.constant 0 : index
    %c0_16 = arith.constant 0 : index
    %17 = vector.load %arg7[%c0_15, %c0_16] : memref<32x128xf32, #tpu.memory_space<vmem>>, vector<32x128xf32>
    %cst_17 = arith.constant dense<0.000000e+00> : vector<10x128xf32>
    %18 = tpu.matmul %16, %17, %cst_17 {dimension_numbers = #tpu.dot_dimension_numbers<[1], [0], [0], [1], [0, 0, 1, 1], [], []>} : vector<10x32xf32>, vector<32x128xf32>, vector<10x128xf32> -> vector<10x128xf32>
    %c0_18 = arith.constant 0 : index
    %c0_19 = arith.constant 0 : index
    %19 = vector.load %arg8[%c0_18, %c0_19] : memref<1x128xf32, #tpu.memory_space<vmem>>, vector<1x128xf32>
    %20 = vector.broadcast %19 : vector<1x128xf32> to vector<10x128xf32>
    %21 = arith.addf %18, %20 : vector<10x128xf32>
    %22 = arith.mulf %21, %21 : vector<10x128xf32>
    %cst_20 = arith.constant dense<0.000000e+00> : vector<10xf32>
    %23 = vector.multi_reduction <add>, %22, %cst_20 [1] : vector<10x128xf32> to vector<10xf32>
    %24 = vector.shape_cast %23 : vector<10xf32> to vector<10x1xf32>
    %cst_21 = arith.constant 1.000000e-24 : f32
    %25 = vector.broadcast %cst_21 : f32 to vector<10x1xf32>
    %26 = arith.maximumf %24, %25 : vector<10x1xf32>
    %27 = math.rsqrt %26 : vector<10x1xf32>
    %28 = vector.broadcast %27 : vector<10x1xf32> to vector<10x128xf32>
    %29 = arith.mulf %21, %28 : vector<10x128xf32>
    %c0_22 = arith.constant 0 : index
    %c0_23 = arith.constant 0 : index
    %30 = vector.load %arg9[%c0_22, %c0_23] : memref<10x128xf32, #tpu.memory_space<vmem>>, vector<10x128xf32>
    tpu.vector_store %arg9[%c0_22, %c0_23], %29 {strides = array<i32>} : memref<10x128xf32, #tpu.memory_space<vmem>>, vector<10x128xf32>,
    return
  }
  func.func @transform_0(%arg0: i32) -> (i32, i32) {
    %c0_i32 = arith.constant 0 : i32
    %c0_i32_0 = arith.constant 0 : i32
    %c0_i32_1 = arith.constant 0 : i32
    return %c0_i32, %c0_i32_0 : i32, i32
  }
  func.func @transform_1(%arg0: i32) -> (i32, i32) {
    %c0_i32 = arith.constant 0 : i32
    %c0_i32_0 = arith.constant 0 : i32
    %c0_i32_1 = arith.constant 0 : i32
    return %c0_i32, %c0_i32_0 : i32, i32
  }
  func.func @transform_2(%arg0: i32) -> (i32, i32) {
    %c0_i32 = arith.constant 0 : i32
    %c0_i32_0 = arith.constant 0 : i32
    %c0_i32_1 = arith.constant 0 : i32
    return %c0_i32, %c0_i32_0 : i32, i32
  }
  func.func @transform_3(%arg0: i32) -> (i32, i32) {
    %c0_i32 = arith.constant 0 : i32
    %c0_i32_0 = arith.constant 0 : i32
    %c0_i32_1 = arith.constant 0 : i32
    return %c0_i32, %c0_i32_0 : i32, i32
  }
  func.func @transform_4(%arg0: i32) -> (i32, i32) {
    %c0_i32 = arith.constant 0 : i32
    %c0_i32_0 = arith.constant 0 : i32
    %c0_i32_1 = arith.constant 0 : i32
    return %c0_i32, %c0_i32_0 : i32, i32
  }
  func.func @transform_5(%arg0: i32) -> (i32, i32) {
    %c0_i32 = arith.constant 0 : i32
    %c0_i32_0 = arith.constant 0 : i32
    %c0_i32_1 = arith.constant 0 : i32
    return %c0_i32, %c0_i32_0 : i32, i32
  }
  func.func @transform_6(%arg0: i32) -> (i32, i32) {
    %c0_i32 = arith.constant 0 : i32
    %c0_i32_0 = arith.constant 0 : i32
    %c0_i32_1 = arith.constant 0 : i32
    return %c0_i32, %c0_i32_0 : i32, i32
  }
  func.func @transform_7(%arg0: i32) -> (i32, i32) {
    %c0_i32 = arith.constant 0 : i32
    %c0_i32_0 = arith.constant 0 : i32
    %c0_i32_1 = arith.constant 0 : i32
    return %c0_i32, %c0_i32_0 : i32, i32
  }
  func.func @transform_8(%arg0: i32) -> (i32, i32) {
    %c0_i32 = arith.constant 0 : i32
    %c0_i32_0 = arith.constant 0 : i32
    %c0_i32_1 = arith.constant 0 : i32
    return %c0_i32, %c0_i32_0 : i32, i32
  }
}

module attributes {stable_mosaic.version = 11 : i64} {
  func.func @encoder_kernel(%arg0: i32, %arg1: memref<512x128xf32, #tpu.memory_space<vmem>>, %arg2: memref<2x512xf32, #tpu.memory_space<vmem>>, %arg3: memref<128x32xf32, #tpu.memory_space<vmem>>, %arg4: memref<1x32xf32, #tpu.memory_space<vmem>>, %arg5: memref<32x32xf32, #tpu.memory_space<vmem>>, %arg6: memref<1x32xf32, #tpu.memory_space<vmem>>, %arg7: memref<32x128xf32, #tpu.memory_space<vmem>>, %arg8: memref<1x128xf32, #tpu.memory_space<vmem>>, %arg9: memref<2x128xf32, #tpu.memory_space<vmem>>) attributes {dimension_semantics = [#tpu.dimension_semantics<arbitrary>], iteration_bounds = array<i64: 1>, scalar_prefetch = 0 : i64, scratch_operands = 0 : i64, tpu.core_type = #tpu.core_type<tc>, window_params = [{pipeline_mode = #tpu.pipeline_mode<synchronous>, transform_indices = @transform_0, window_bounds = array<i64: 512, 128>}, {pipeline_mode = #tpu.pipeline_mode<synchronous>, transform_indices = @transform_1, window_bounds = array<i64: 2, 512>}, {pipeline_mode = #tpu.pipeline_mode<synchronous>, transform_indices = @transform_2, window_bounds = array<i64: 128, 32>}, {pipeline_mode = #tpu.pipeline_mode<synchronous>, transform_indices = @transform_3, window_bounds = array<i64: 1, 32>}, {pipeline_mode = #tpu.pipeline_mode<synchronous>, transform_indices = @transform_4, window_bounds = array<i64: 32, 32>}, {pipeline_mode = #tpu.pipeline_mode<synchronous>, transform_indices = @transform_5, window_bounds = array<i64: 1, 32>}, {pipeline_mode = #tpu.pipeline_mode<synchronous>, transform_indices = @transform_6, window_bounds = array<i64: 32, 128>}, {pipeline_mode = #tpu.pipeline_mode<synchronous>, transform_indices = @transform_7, window_bounds = array<i64: 1, 128>}, {pipeline_mode = #tpu.pipeline_mode<synchronous>, transform_indices = @transform_8, window_bounds = array<i64: 2, 128>}]} {
    %c0 = arith.constant 0 : index
    %c0_0 = arith.constant 0 : index
    %0 = vector.load %arg1[%c0, %c0_0] : memref<512x128xf32, #tpu.memory_space<vmem>>, vector<512x128xf32>
    %c0_1 = arith.constant 0 : index
    %c0_2 = arith.constant 0 : index
    %1 = vector.load %arg3[%c0_1, %c0_2] : memref<128x32xf32, #tpu.memory_space<vmem>>, vector<128x32xf32>
    %cst = arith.constant dense<0.000000e+00> : vector<512x32xf32>
    %2 = tpu.matmul %0, %1, %cst {dimension_numbers = #tpu.dot_dimension_numbers<[1], [0], [0], [1], [0, 0, 1, 1], [], []>} : vector<512x128xf32>, vector<128x32xf32>, vector<512x32xf32> -> vector<512x32xf32>
    %c0_3 = arith.constant 0 : index
    %c0_4 = arith.constant 0 : index
    %3 = vector.load %arg4[%c0_3, %c0_4] : memref<1x32xf32, #tpu.memory_space<vmem>>, vector<1x32xf32>
    %4 = vector.broadcast %3 : vector<1x32xf32> to vector<512x32xf32>
    %5 = arith.addf %2, %4 : vector<512x32xf32>
    %cst_5 = arith.constant 0.000000e+00 : f32
    %6 = vector.broadcast %cst_5 : f32 to vector<512x32xf32>
    %7 = arith.maximumf %5, %6 : vector<512x32xf32>
    %c0_6 = arith.constant 0 : index
    %c0_7 = arith.constant 0 : index
    %8 = vector.load %arg2[%c0_6, %c0_7] : memref<2x512xf32, #tpu.memory_space<vmem>>, vector<2x512xf32>
    %cst_8 = arith.constant dense<0.000000e+00> : vector<2x32xf32>
    %9 = tpu.matmul %8, %7, %cst_8 {dimension_numbers = #tpu.dot_dimension_numbers<[1], [0], [0], [1], [0, 0, 1, 1], [], []>} : vector<2x512xf32>, vector<512x32xf32>, vector<2x32xf32> -> vector<2x32xf32>
    %c0_9 = arith.constant 0 : index
    %c0_10 = arith.constant 0 : index
    %10 = vector.load %arg5[%c0_9, %c0_10] : memref<32x32xf32, #tpu.memory_space<vmem>>, vector<32x32xf32>
    %cst_11 = arith.constant dense<0.000000e+00> : vector<2x32xf32>
    %11 = tpu.matmul %9, %10, %cst_11 {dimension_numbers = #tpu.dot_dimension_numbers<[1], [0], [0], [1], [0, 0, 1, 1], [], []>} : vector<2x32xf32>, vector<32x32xf32>, vector<2x32xf32> -> vector<2x32xf32>
    %c0_12 = arith.constant 0 : index
    %c0_13 = arith.constant 0 : index
    %12 = vector.load %arg6[%c0_12, %c0_13] : memref<1x32xf32, #tpu.memory_space<vmem>>, vector<1x32xf32>
    %13 = vector.broadcast %12 : vector<1x32xf32> to vector<2x32xf32>
    %14 = arith.addf %11, %13 : vector<2x32xf32>
    %cst_14 = arith.constant 0.000000e+00 : f32
    %15 = vector.broadcast %cst_14 : f32 to vector<2x32xf32>
    %16 = arith.maximumf %14, %15 : vector<2x32xf32>
    %c0_15 = arith.constant 0 : index
    %c0_16 = arith.constant 0 : index
    %17 = vector.load %arg7[%c0_15, %c0_16] : memref<32x128xf32, #tpu.memory_space<vmem>>, vector<32x128xf32>
    %cst_17 = arith.constant dense<0.000000e+00> : vector<2x128xf32>
    %18 = tpu.matmul %16, %17, %cst_17 {dimension_numbers = #tpu.dot_dimension_numbers<[1], [0], [0], [1], [0, 0, 1, 1], [], []>} : vector<2x32xf32>, vector<32x128xf32>, vector<2x128xf32> -> vector<2x128xf32>
    %c0_18 = arith.constant 0 : index
    %c0_19 = arith.constant 0 : index
    %19 = vector.load %arg8[%c0_18, %c0_19] : memref<1x128xf32, #tpu.memory_space<vmem>>, vector<1x128xf32>
    %20 = vector.broadcast %19 : vector<1x128xf32> to vector<2x128xf32>
    %21 = arith.addf %18, %20 : vector<2x128xf32>
    %22 = arith.mulf %21, %21 : vector<2x128xf32>
    %cst_20 = arith.constant dense<0.000000e+00> : vector<2xf32>
    %23 = vector.multi_reduction <add>, %22, %cst_20 [1] : vector<2x128xf32> to vector<2xf32>
    %24 = vector.shape_cast %23 : vector<2xf32> to vector<2x1xf32>
    %cst_21 = arith.constant 1.000000e-24 : f32
    %25 = vector.broadcast %cst_21 : f32 to vector<2x1xf32>
    %26 = arith.maximumf %24, %25 : vector<2x1xf32>
    %27 = math.rsqrt %26 : vector<2x1xf32>
    %28 = vector.broadcast %27 : vector<2x1xf32> to vector<2x128xf32>
    %29 = arith.mulf %21, %28 : vector<2x128xf32>
    %c0_22 = arith.constant 0 : index
    %c0_23 = arith.constant 0 : index
    %30 = vector.load %arg9[%c0_22, %c0_23] : memref<2x128xf32, #tpu.memory_space<vmem>>, vector<2x128xf32>
    tpu.vector_store %arg9[%c0_22, %c0_23], %29 {strides = array<i32>} : memref<2x128xf32, #tpu.memory_space<vmem>>, vector<2x128xf32>,
    return
  }
  func.func @transform_0(%arg0: i32) -> (i32, i32) {
    %c0_i32 = arith.constant 0 : i32
    %c0_i32_0 = arith.constant 0 : i32
    %c0_i32_1 = arith.constant 0 : i32
    return %c0_i32, %c0_i32_0 : i32, i32
  }
  func.func @transform_1(%arg0: i32) -> (i32, i32) {
    %c0_i32 = arith.constant 0 : i32
    %c0_i32_0 = arith.constant 0 : i32
    %c0_i32_1 = arith.constant 0 : i32
    return %c0_i32, %c0_i32_0 : i32, i32
  }
  func.func @transform_2(%arg0: i32) -> (i32, i32) {
    %c0_i32 = arith.constant 0 : i32
    %c0_i32_0 = arith.constant 0 : i32
    %c0_i32_1 = arith.constant 0 : i32
    return %c0_i32, %c0_i32_0 : i32, i32
  }
  func.func @transform_3(%arg0: i32) -> (i32, i32) {
    %c0_i32 = arith.constant 0 : i32
    %c0_i32_0 = arith.constant 0 : i32
    %c0_i32_1 = arith.constant 0 : i32
    return %c0_i32, %c0_i32_0 : i32, i32
  }
  func.func @transform_4(%arg0: i32) -> (i32, i32) {
    %c0_i32 = arith.constant 0 : i32
    %c0_i32_0 = arith.constant 0 : i32
    %c0_i32_1 = arith.constant 0 : i32
    return %c0_i32, %c0_i32_0 : i32, i32
  }
  func.func @transform_5(%arg0: i32) -> (i32, i32) {
    %c0_i32 = arith.constant 0 : i32
    %c0_i32_0 = arith.constant 0 : i32
    %c0_i32_1 = arith.constant 0 : i32
    return %c0_i32, %c0_i32_0 : i32, i32
  }
  func.func @transform_6(%arg0: i32) -> (i32, i32) {
    %c0_i32 = arith.constant 0 : i32
    %c0_i32_0 = arith.constant 0 : i32
    %c0_i32_1 = arith.constant 0 : i32
    return %c0_i32, %c0_i32_0 : i32, i32
  }
  func.func @transform_7(%arg0: i32) -> (i32, i32) {
    %c0_i32 = arith.constant 0 : i32
    %c0_i32_0 = arith.constant 0 : i32
    %c0_i32_1 = arith.constant 0 : i32
    return %c0_i32, %c0_i32_0 : i32, i32
  }
  func.func @transform_8(%arg0: i32) -> (i32, i32) {
    %c0_i32 = arith.constant 0 : i32
    %c0_i32_0 = arith.constant 0 : i32
    %c0_i32_1 = arith.constant 0 : i32
    return %c0_i32, %c0_i32_0 : i32, i32
  }
}

</mosaic_0001>

<bundles_post_ra>
// kernel: moco_forward.4
= control target key start
LH: loop header
LB: loop body
LE: loop exit
PB: predicated region body
PF: predicated region fallthrough
CT: control target
= control target key end

     0   :  { %s135_s0 = inlined_call_operand.vmem [shape: f32[56,128], index: 0, kind: input, shape index: {}]   ;;  %s136_s1 = inlined_call_operand.vmem [shape: f32[56,128], index: 1, kind: input, shape index: {}]   ;;  %s137_s2 = inlined_call_operand.vmem [shape: f32[56,128], index: 2, kind: output, shape index: {}]  }
   0x1   :  { %v11_v0 = vld [vmem:[%s136_s1] sm:$0xff]  ;;  %v12_v2 = vld [vmem:[%s136_s1 + $0x8] sm:$0xff]  ;;  %v13_v7 = vld [vmem:[%s136_s1 + $0x10] sm:$0xff] }
   0x2   :  { %v25_v1 = vld [vmem:[%s135_s0] sm:$0xff]  ;;  %v18_v3 = vmul.f32 0.999, %v11_v0  ;;  %v19_v5 = vmul.f32 0.999, %v12_v2  ;;  %v26_v6 = vld [vmem:[%s135_s0 + $0x8] sm:$0xff] }
   0x3   :  { %v32_v4 = vmul.f32 0.001, %v25_v1  ;;  %v27_v8 = vld [vmem:[%s135_s0 + $0x10] sm:$0xff]  ;;  %v33_v10 = vmul.f32 0.001, %v26_v6  ;;  %v14_v13 = vld [vmem:[%s136_s1 + $0x18] sm:$0xff] }
   0x4   :  { %v20_v11 = vmul.f32 0.999, %v13_v7  ;;  %v34_v12 = vmul.f32 0.001, %v27_v8  ;;  %v28_v14 = vld [vmem:[%s135_s0 + $0x18] sm:$0xff]  ;;  %v15_v15 = vld [vmem:[%s136_s1 + $0x20] sm:$0xff] }
   0x5   :  { %v39_v9 = vadd.f32 %v32_v4, %v18_v3  ;;  %v40_v16 = vadd.f32 %v33_v10, %v19_v5  ;;  %v21_v18 = vmul.f32 0.999, %v14_v13  ;;  %v35_v19 = vmul.f32 0.001, %v28_v14  ;;  %v29_v20 = vld [vmem:[%s135_s0 + $0x20] sm:$0xff]  ;;  %v16_v21 = vld [vmem:[%s136_s1 + $0x28] sm:$0xff] }
   0x6   :  { %v41_v17 = vadd.f32 %v34_v12, %v20_v11  ;;  %v22_v22 = vmul.f32 0.999, %v15_v15  ;;  %v36_v23 = vmul.f32 0.001, %v29_v20  ;;  %v23_v24 = vmul.f32 0.999, %v16_v21 }
   0x7   :  { %46 = vst [vmem:[%s137_s2] sm:$0xff] %v39_v9  ;;  %47 = vst [vmem:[%s137_s2 + $0x8] sm:$0xff] %v40_v16  ;;  %v42_v25 = vadd.f32 %v35_v19, %v21_v18  ;;  %v30_v26 = vld [vmem:[%s135_s0 + $0x28] sm:$0xff]  ;;  %v17_v27 = vld [vmem:[%s136_s1 + $0x30] sm:$0xff] }
   0x8   :  { %48 = vst [vmem:[%s137_s2 + $0x10] sm:$0xff] %v41_v17  ;;  %v31_v28 = vld [vmem:[%s135_s0 + $0x30] sm:$0xff]  ;;  %v43_v29 = vadd.f32 %v36_v23, %v22_v22  ;;  %v37_v30 = vmul.f32 0.001, %v30_v26  ;;  %v24_v31 = vmul.f32 0.999, %v17_v27 }
   0x9   :  { %v38_v32 = vmul.f32 0.001, %v31_v28  ;;  %49 = vst [vmem:[%s137_s2 + $0x18] sm:$0xff] %v42_v25 }
   0xa   :  { %50 = vst [vmem:[%s137_s2 + $0x20] sm:$0xff] %v43_v29  ;;  %v44_v33 = vadd.f32 %v37_v30, %v23_v24 }
   0xb   :  { %v45_v34 = vadd.f32 %v38_v32, %v24_v31 }
   0xc   :  { %51 = vst [vmem:[%s137_s2 + $0x28] sm:$0xff] %v44_v33 }
   0xd   :  { %52 = vst [vmem:[%s137_s2 + $0x30] sm:$0xff] %v45_v34 }

// kernel: moco_forward.5
= control target key start
LH: loop header
LB: loop body
LE: loop exit
PB: predicated region body
PF: predicated region fallthrough
CT: control target
= control target key end

     0   :  { %vm3158_vm0 = vcmask 261120   ;;  %vm3338_vm1 = vcmask 1041408   ;;  %s6860_s2 = inlined_call_operand.vmem [shape: f32[128,32], index: 2, kind: input, shape index: {}]   ;;  %s6861_s0 = inlined_call_operand.vmem [shape: f32[2560,128], index: 0, kind: input, shape index: {}]   ;;  %s6862_s1 = inlined_call_operand.vmem [shape: f32[10,2560], index: 1, kind: input, shape index: {}]   ;;  %s6863_s3 = inlined_call_operand.vmem [shape: f32[1,32], index: 3, kind: input, shape index: {}]   ;;  %s6864_s4 = inlined_call_operand.vmem [shape: f32[32,32], index: 4, kind: input, shape index: {}]   ;;  %s6865_s6 = inlined_call_operand.vmem [shape: f32[32,128], index: 6, kind: input, shape index: {}]   ;;  %s6866_s5 = inlined_call_operand.vmem [shape: f32[1,32], index: 5, kind: input, shape index: {}]   ;;  %s6867_s7 = inlined_call_operand.vmem [shape: f32[1,128], index: 7, kind: input, shape index: {}]   ;;  %s6868_s8 = inlined_call_operand.vmem [shape: f32[10,128], index: 8, kind: output, shape index: {}]  }
   0x1   :  { %v349_v0 = vld [vmem:[%s6860_s2] sm:$0xff]  ;;  %v350_v1 = vld [vmem:[%s6860_s2 + $0x8] sm:$0xff]  ;;  %v351_v2 = vld [vmem:[%s6860_s2 + $0x10] sm:$0xff] }
   0x2   :  { %v4623_v3 = vpack.c.bf16 %v350_v1, %v349_v0  ;;  %v352_v4 = vld [vmem:[%s6860_s2 + $0x18] sm:$0xff]  ;;  %v353_v6 = vld [vmem:[%s6860_s2 + $0x20] sm:$0xff]  ;;  %v354_v7 = vld [vmem:[%s6860_s2 + $0x28] sm:$0xff] }
   0x3   :  { %v4627_v5 = vpack.c.bf16 %v352_v4, %v351_v2  ;;  %v4631_v8 = vpack.c.bf16 %v354_v7, %v353_v6  ;;  %v29_v9 = vld [vmem:[%s6861_s0] sm:$0xff]  ;;  %v355_v10 = vld [vmem:[%s6860_s2 + $0x30] sm:$0xff]  ;;  %v356_v11 = vld [vmem:[%s6860_s2 + $0x38] sm:$0xff] }
   0x4   :  { %4624 = vmatprep.subr.bf16.mxu0 %v4623_v3  ;;  %4991 = vmatprep.subr.bf16.mxu1 %v4623_v3  ;;  %v4635_v12 = vpack.c.bf16 %v356_v11, %v355_v10  ;;  %v357_v13 = vld [vmem:[%s6860_s2 + $0x40] sm:$0xff]  ;;  %v358_v14 = vld [vmem:[%s6860_s2 + $0x48] sm:$0xff]  ;;  %v359_v16 = vld [vmem:[%s6860_s2 + $0x50] sm:$0xff] }
   0x5   :  { %4626 = vmatpush3.bf16.msra.mxu0 %v4623_v3  ;;  %4999 = vmatpush3.bf16.msra.mxu1 %v4623_v3  ;;  %v4639_v15 = vpack.c.bf16 %v358_v14, %v357_v13  ;;  %v360_v17 = vld [vmem:[%s6860_s2 + $0x58] sm:$0xff]  ;;  %v361_v19 = vld [vmem:[%s6860_s2 + $0x60] sm:$0xff]  ;;  %v362_v20 = vld [vmem:[%s6860_s2 + $0x68] sm:$0xff] }
   0x6   :  { %4628 = vmatprep.subr.bf16.mxu0 %v4627_v5  ;;  %4992 = vmatprep.subr.bf16.mxu1 %v4627_v5  ;;  %v4643_v18 = vpack.c.bf16 %v360_v17, %v359_v16  ;;  %v4647_v21 = vpack.c.bf16 %v362_v20, %v361_v19  ;;  %v363_v22 = vld [vmem:[%s6860_s2 + $0x70] sm:$0xff]  ;;  %v364_v23 = vld [vmem:[%s6860_s2 + $0x78] sm:$0xff]  ;;  %v30_v25 = vld [vmem:[%s6861_s0 + $0x8] sm:$0xff] }
   0x7   :  { %4121 = vmatprep.mubr.f32.mxu0 %v29_v9  ;;  %v4651_v24 = vpack.c.bf16 %v364_v23, %v363_v22  ;;  %v31_v26 = vld [vmem:[%s6861_s0 + $0x10] sm:$0xff]  ;;  %v32_v27 = vld [vmem:[%s6861_s0 + $0x18] sm:$0xff]  ;;  %v33_v28 = vld [vmem:[%s6861_s0 + $0x20] sm:$0xff] }
   0x8   :  { %v34_v29 = vld [vmem:[%s6861_s0 + $0x28] sm:$0xff]  ;;  %v35_v30 = vld [vmem:[%s6861_s0 + $0x30] sm:$0xff]  ;;  %v36_v31 = vld [vmem:[%s6861_s0 + $0x38] sm:$0xff] }
   0x9   :  { %4630 = vmatpush3.bf16.msra.mxu0 %v4627_v5  ;;  %5000 = vmatpush3.bf16.msra.mxu1 %v4627_v5  ;;  %v37_v32 = vld [vmem:[%s6861_s0 + $0x40] sm:$0xff]  ;;  %v38_v33 = vld [vmem:[%s6861_s0 + $0x48] sm:$0xff]  ;;  %v39_v34 = vld [vmem:[%s6861_s0 + $0x50] sm:$0xff] }
   0xa   :  { %4632 = vmatprep.subr.bf16.mxu0 %v4631_v8  ;;  %4993 = vmatprep.subr.bf16.mxu1 %v4631_v8  ;;  %v40_v35 = vld [vmem:[%s6861_s0 + $0x58] sm:$0xff]  ;;  %v41_v36 = vld [vmem:[%s6861_s0 + $0x60] sm:$0xff]  ;;  %v42_v37 = vld [vmem:[%s6861_s0 + $0x68] sm:$0xff] }
   0xb   :  { %v267_v38 = vld [vmem:[%s6861_s0 + $0x770] sm:$0xff]  ;;  %v268_v40 = vld [vmem:[%s6861_s0 + $0x778] sm:$0xff]  ;;  %v269_v42 = vld [vmem:[%s6861_s0 + $0x780] sm:$0xff] }
   0xc   :  { %v43_v39 = vld [vmem:[%s6861_s0 + $0x70] sm:$0xff]  ;;  %4478 = vmatprep.mubr.f32.mxu1 %v267_v38  ;;  %v44_v41 = vld [vmem:[%s6861_s0 + $0x78] sm:$0xff]  ;;  %v45_v43 = vld [vmem:[%s6861_s0 + $0x80] sm:$0xff] }
   0xd   :  { %4634 = vmatpush3.bf16.msra.mxu0 %v4631_v8  ;;  %5001 = vmatpush3.bf16.msra.mxu1 %v4631_v8  ;;  %v270_v44 = vld [vmem:[%s6861_s0 + $0x788] sm:$0xff]  ;;  %v271_v46 = vld [vmem:[%s6861_s0 + $0x790] sm:$0xff]  ;;  %v272_v48 = vld [vmem:[%s6861_s0 + $0x798] sm:$0xff] }
   0xe   :  { %4636 = vmatprep.subr.bf16.mxu0 %v4635_v12  ;;  %4994 = vmatprep.subr.bf16.mxu1 %v4635_v12  ;;  %v46_v45 = vld [vmem:[%s6861_s0 + $0x88] sm:$0xff]  ;;  %v47_v47 = vld [vmem:[%s6861_s0 + $0x90] sm:$0xff]  ;;  %v48_v49 = vld [vmem:[%s6861_s0 + $0x98] sm:$0xff] }
   0xf   :  { %v273_v50 = vld [vmem:[%s6861_s0 + $0x7a0] sm:$0xff]  ;;  %v274_v52 = vld [vmem:[%s6861_s0 + $0x7a8] sm:$0xff]  ;;  %v275_v54 = vld [vmem:[%s6861_s0 + $0x7b0] sm:$0xff] }
  0x10   :  { %v49_v51 = vld [vmem:[%s6861_s0 + $0xa0] sm:$0xff]  ;;  %v50_v53 = vld [vmem:[%s6861_s0 + $0xa8] sm:$0xff]  ;;  %v51_v55 = vld [vmem:[%s6861_s0 + $0xb0] sm:$0xff] }
  0x11   :  { %4638 = vmatpush3.bf16.msra.mxu0 %v4635_v12  ;;  %5002 = vmatpush3.bf16.msra.mxu1 %v4635_v12  ;;  %v276_v56 = vld [vmem:[%s6861_s0 + $0x7b8] sm:$0xff]  ;;  %v277_v58 = vld [vmem:[%s6861_s0 + $0x7c0] sm:$0xff]  ;;  %v278_v60 = vld [vmem:[%s6861_s0 + $0x7c8] sm:$0xff] }
  0x12   :  { %4640 = vmatprep.subr.bf16.mxu0 %v4639_v15  ;;  %4995 = vmatprep.subr.bf16.mxu1 %v4639_v15  ;;  %v52_v57 = vld [vmem:[%s6861_s0 + $0xb8] sm:$0xff]  ;;  %v53_v59 = vld [vmem:[%s6861_s0 + $0xc0] sm:$0xff]  ;;  %v54_v61 = vld [vmem:[%s6861_s0 + $0xc8] sm:$0xff] }
  0x13   :  { %v279_v62 = vld [vmem:[%s6861_s0 + $0x7d0] sm:$0xff]  ;;  %v280_v0 = vld [vmem:[%s6861_s0 + $0x7d8] sm:$0xff]  ;;  %v281_v2 = vld [vmem:[%s6861_s0 + $0x7e0] sm:$0xff] }
  0x14   :  { %v55_v63 = vld [vmem:[%s6861_s0 + $0xd0] sm:$0xff]  ;;  %v56_v1 = vld [vmem:[%s6861_s0 + $0xd8] sm:$0xff]  ;;  %v57_v3 = vld [vmem:[%s6861_s0 + $0xe0] sm:$0xff] }
  0x15   :  { %4642 = vmatpush3.bf16.msra.mxu0 %v4639_v15  ;;  %5003 = vmatpush3.bf16.msra.mxu1 %v4639_v15  ;;  %v282_v4 = vld [vmem:[%s6861_s0 + $0x7e8] sm:$0xff]  ;;  %v283_v6 = vld [vmem:[%s6861_s0 + $0x7f0] sm:$0xff]  ;;  %v284_v8 = vld [vmem:[%s6861_s0 + $0x7f8] sm:$0xff] }
  0x16   :  { %4644 = vmatprep.subr.bf16.mxu0 %v4643_v18  ;;  %4996 = vmatprep.subr.bf16.mxu1 %v4643_v18  ;;  %v58_v5 = vld [vmem:[%s6861_s0 + $0xe8] sm:$0xff]  ;;  %v59_v7 = vld [vmem:[%s6861_s0 + $0xf0] sm:$0xff]  ;;  %v60_v9 = vld [vmem:[%s6861_s0 + $0xf8] sm:$0xff] }
  0x17   :  { %v285_v10 = vld [vmem:[%s6861_s0 + $0x800] sm:$0xff]  ;;  %v286_v12 = vld [vmem:[%s6861_s0 + $0x808] sm:$0xff]  ;;  %v287_v14 = vld [vmem:[%s6861_s0 + $0x810] sm:$0xff] }
  0x18   :  { %v61_v11 = vld [vmem:[%s6861_s0 + $0x100] sm:$0xff]  ;;  %v62_v13 = vld [vmem:[%s6861_s0 + $0x108] sm:$0xff]  ;;  %v63_v15 = vld [vmem:[%s6861_s0 + $0x110] sm:$0xff] }
  0x19   :  { %4646 = vmatpush3.bf16.msra.mxu0 %v4643_v18  ;;  %5004 = vmatpush3.bf16.msra.mxu1 %v4643_v18  ;;  %v288_v16 = vld [vmem:[%s6861_s0 + $0x818] sm:$0xff]  ;;  %v289_v18 = vld [vmem:[%s6861_s0 + $0x820] sm:$0xff]  ;;  %v290_v20 = vld [vmem:[%s6861_s0 + $0x828] sm:$0xff] }
  0x1a   :  { %4648 = vmatprep.subr.bf16.mxu0 %v4647_v21  ;;  %4997 = vmatprep.subr.bf16.mxu1 %v4647_v21  ;;  %v64_v17 = vld [vmem:[%s6861_s0 + $0x118] sm:$0xff]  ;;  %v65_v19 = vld [vmem:[%s6861_s0 + $0x120] sm:$0xff]  ;;  %v291_v22 = vld [vmem:[%s6861_s0 + $0x830] sm:$0xff] }
  0x1b   :  { %v67_v23 = vld [vmem:[%s6861_s0 + $0x130] sm:$0xff] }
  0x1c   :  { %v75_v38 = vld [vmem:[%s6861_s0 + $0x170] sm:$0xff] }
  0x1d   :  { %4650 = vmatpush3.bf16.msra.mxu0 %v4647_v21  ;;  %5005 = vmatpush3.bf16.msra.mxu1 %v4647_v21  ;;  %v66_v21 = vld [vmem:[%s6861_s0 + $0x128] sm:$0xff] }
  0x1e   :  { %4652 = vmatprep.subr.bf16.mxu0 %v4651_v24  ;;  %4998 = vmatprep.subr.bf16.mxu1 %v4651_v24 }
  0x21   :  { %4654 = vmatpush3.bf16.msra.mxu0 %v4651_v24  ;;  %5006 = vmatpush3.bf16.msra.mxu1 %v4651_v24  ;;  %v292_v24 = vld [vmem:[%s6861_s0 + $0x838] sm:$0xff] }
  0x24   :  { %4122 = vmatmul.mubr.f32.vlgmr.msra.gmra.mrb[0].mxu0 %v30_v25  ;;  %4479 = vmatmul.mubr.f32.vlgmr.msra.gmra.mrb[0].mxu1 %v268_v40  ;;  %v68_v25 = vld [vmem:[%s6861_s0 + $0x138] sm:$0xff] }
  0x25   :  { %4124 = vmatprep.mubr.f32.mxu0 %v31_v26  ;;  %4481 = vmatprep.mubr.f32.mxu1 %v269_v42  ;;  %v293_v26 = vld [vmem:[%s6861_s0 + $0x840] sm:$0xff]  ;;  %v300_v40 = vld [vmem:[%s6861_s0 + $0x878] sm:$0xff] }
  0x26   :  { %v77_v42 = vld [vmem:[%s6861_s0 + $0x180] sm:$0xff] }
  0x28   :  { %4125 = vmatmul.mubr.f32.gmra.mrb[2].mxu0 %v32_v27  ;;  %4482 = vmatmul.mubr.f32.gmra.mrb[2].mxu1 %v270_v44  ;;  %v69_v27 = vld [vmem:[%s6861_s0 + $0x140] sm:$0xff]  ;;  %v302_v44 = vld [vmem:[%s6861_s0 + $0x888] sm:$0xff] }
  0x29   :  { %4127 = vmatprep.mubr.f32.mxu0 %v33_v28  ;;  %4484 = vmatprep.mubr.f32.mxu1 %v271_v46  ;;  %v294_v28 = vld [vmem:[%s6861_s0 + $0x848] sm:$0xff]  ;;  %v79_v46 = vld [vmem:[%s6861_s0 + $0x190] sm:$0xff] }
  0x2c   :  { %4128 = vmatmul.mubr.f32.gmra.mrb[4].mxu0 %v34_v29  ;;  %4485 = vmatmul.mubr.f32.gmra.mrb[4].mxu1 %v272_v48  ;;  %v70_v29 = vld [vmem:[%s6861_s0 + $0x148] sm:$0xff]  ;;  %v304_v48 = vld [vmem:[%s6861_s0 + $0x898] sm:$0xff] }
  0x2d   :  { %4130 = vmatprep.mubr.f32.mxu0 %v35_v30  ;;  %4487 = vmatprep.mubr.f32.mxu1 %v273_v50  ;;  %v295_v30 = vld [vmem:[%s6861_s0 + $0x850] sm:$0xff]  ;;  %v81_v50 = vld [vmem:[%s6861_s0 + $0x1a0] sm:$0xff] }
  0x30   :  { %4131 = vmatmul.mubr.f32.gmra.mrb[6].mxu0 %v36_v31  ;;  %4488 = vmatmul.mubr.f32.gmra.mrb[6].mxu1 %v274_v52  ;;  %v71_v31 = vld [vmem:[%s6861_s0 + $0x150] sm:$0xff]  ;;  %v306_v52 = vld [vmem:[%s6861_s0 + $0x8a8] sm:$0xff] }
  0x31   :  { %4133 = vmatprep.mubr.f32.mxu0 %v37_v32  ;;  %4490 = vmatprep.mubr.f32.mxu1 %v275_v54  ;;  %v296_v32 = vld [vmem:[%s6861_s0 + $0x858] sm:$0xff]  ;;  %v83_v54 = vld [vmem:[%s6861_s0 + $0x1b0] sm:$0xff] }
  0x34   :  { %4134 = vmatmul.mubr.f32.gmra.mrb[8].mxu0 %v38_v33  ;;  %4491 = vmatmul.mubr.f32.gmra.mrb[8].mxu1 %v276_v56  ;;  %v72_v33 = vld [vmem:[%s6861_s0 + $0x158] sm:$0xff] }
  0x35   :  { %4136 = vmatprep.mubr.f32.mxu0 %v39_v34  ;;  %4493 = vmatprep.mubr.f32.mxu1 %v277_v58  ;;  %v73_v34 = vld [vmem:[%s6861_s0 + $0x160] sm:$0xff]  ;;  %v308_v56 = vld [vmem:[%s6861_s0 + $0x8b8] sm:$0xff] }
  0x36   :  { %v85_v58 = vld [vmem:[%s6861_s0 + $0x1c0] sm:$0xff] }
  0x38   :  { %4137 = vmatmul.mubr.f32.gmra.mrb[10].mxu0 %v40_v35  ;;  %4494 = vmatmul.mubr.f32.gmra.mrb[10].mxu1 %v278_v60  ;;  %v297_v35 = vld [vmem:[%s6861_s0 + $0x860] sm:$0xff]  ;;  %v310_v60 = vld [vmem:[%s6861_s0 + $0x8c8] sm:$0xff] }
  0x39   :  { %4139 = vmatprep.mubr.f32.mxu0 %v41_v36  ;;  %4496 = vmatprep.mubr.f32.mxu1 %v279_v62  ;;  %v298_v36 = vld [vmem:[%s6861_s0 + $0x868] sm:$0xff]  ;;  %v87_v62 = vld [vmem:[%s6861_s0 + $0x1d0] sm:$0xff] }
  0x3c   :  { %4140 = vmatmul.mubr.f32.gmra.mrb[12].mxu0 %v42_v37  ;;  %4497 = vmatmul.mubr.f32.gmra.mrb[12].mxu1 %v280_v0  ;;  %v74_v37 = vld [vmem:[%s6861_s0 + $0x168] sm:$0xff]  ;;  %v312_v0 = vld [vmem:[%s6861_s0 + $0x8d8] sm:$0xff] }
  0x3d   :  { %4142 = vmatprep.mubr.f32.mxu0 %v43_v39  ;;  %4499 = vmatprep.mubr.f32.mxu1 %v281_v2  ;;  %v299_v39 = vld [vmem:[%s6861_s0 + $0x870] sm:$0xff]  ;;  %v89_v2 = vld [vmem:[%s6861_s0 + $0x1e0] sm:$0xff] }
  0x40   :  { %4143 = vmatmul.mubr.f32.gmra.mrb[14].mxu0 %v44_v41  ;;  %4500 = vmatmul.mubr.f32.gmra.mrb[14].mxu1 %v282_v4  ;;  %v76_v41 = vld [vmem:[%s6861_s0 + $0x178] sm:$0xff]  ;;  %v314_v4 = vld [vmem:[%s6861_s0 + $0x8e8] sm:$0xff] }
  0x41   :  { %4145 = vmatprep.mubr.f32.mxu0 %v45_v43  ;;  %4502 = vmatprep.mubr.f32.mxu1 %v283_v6  ;;  %v301_v43 = vld [vmem:[%s6861_s0 + $0x880] sm:$0xff]  ;;  %v91_v6 = vld [vmem:[%s6861_s0 + $0x1f0] sm:$0xff] }
  0x44   :  { %4146 = vmatmul.mubr.f32.gmra.mrb[16].mxu0 %v46_v45  ;;  %4503 = vmatmul.mubr.f32.gmra.mrb[16].mxu1 %v284_v8  ;;  %v78_v45 = vld [vmem:[%s6861_s0 + $0x188] sm:$0xff]  ;;  %v316_v8 = vld [vmem:[%s6861_s0 + $0x8f8] sm:$0xff] }
  0x45   :  { %4148 = vmatprep.mubr.f32.mxu0 %v47_v47  ;;  %4505 = vmatprep.mubr.f32.mxu1 %v285_v10  ;;  %v303_v47 = vld [vmem:[%s6861_s0 + $0x890] sm:$0xff]  ;;  %v93_v10 = vld [vmem:[%s6861_s0 + $0x200] sm:$0xff] }
  0x48   :  { %4149 = vmatmul.mubr.f32.gmra.mrb[18].mxu0 %v48_v49  ;;  %4506 = vmatmul.mubr.f32.gmra.mrb[18].mxu1 %v286_v12  ;;  %v80_v49 = vld [vmem:[%s6861_s0 + $0x198] sm:$0xff]  ;;  %v318_v12 = vld [vmem:[%s6861_s0 + $0x908] sm:$0xff] }
  0x49   :  { %4151 = vmatprep.mubr.f32.mxu0 %v49_v51  ;;  %4508 = vmatprep.mubr.f32.mxu1 %v287_v14  ;;  %v305_v51 = vld [vmem:[%s6861_s0 + $0x8a0] sm:$0xff]  ;;  %v95_v14 = vld [vmem:[%s6861_s0 + $0x210] sm:$0xff] }
  0x4c   :  { %4152 = vmatmul.mubr.f32.gmra.mrb[20].mxu0 %v50_v53  ;;  %4509 = vmatmul.mubr.f32.gmra.mrb[20].mxu1 %v288_v16  ;;  %v82_v53 = vld [vmem:[%s6861_s0 + $0x1a8] sm:$0xff]  ;;  %v320_v16 = vld [vmem:[%s6861_s0 + $0x918] sm:$0xff] }
  0x4d   :  { %4154 = vmatprep.mubr.f32.mxu0 %v51_v55  ;;  %4511 = vmatprep.mubr.f32.mxu1 %v289_v18  ;;  %v307_v55 = vld [vmem:[%s6861_s0 + $0x8b0] sm:$0xff]  ;;  %v97_v18 = vld [vmem:[%s6861_s0 + $0x220] sm:$0xff] }
  0x50   :  { %4155 = vmatmul.mubr.f32.gmra.mrb[22].mxu0 %v52_v57  ;;  %4512 = vmatmul.mubr.f32.gmra.mrb[22].mxu1 %v290_v20  ;;  %v84_v57 = vld [vmem:[%s6861_s0 + $0x1b8] sm:$0xff]  ;;  %v322_v20 = vld [vmem:[%s6861_s0 + $0x928] sm:$0xff] }
  0x51   :  { %4157 = vmatprep.mubr.f32.mxu0 %v53_v59  ;;  %4514 = vmatprep.mubr.f32.mxu1 %v291_v22  ;;  %v309_v59 = vld [vmem:[%s6861_s0 + $0x8c0] sm:$0xff]  ;;  %v99_v22 = vld [vmem:[%s6861_s0 + $0x230] sm:$0xff] }
  0x54   :  { %4158 = vmatmul.mubr.f32.gmra.mrb[24].mxu0 %v54_v61  ;;  %4515 = vmatmul.mubr.f32.gmra.mrb[24].mxu1 %v292_v24  ;;  %v86_v61 = vld [vmem:[%s6861_s0 + $0x1c8] sm:$0xff]  ;;  %v324_v24 = vld [vmem:[%s6861_s0 + $0x938] sm:$0xff] }
  0x55   :  { %4160 = vmatprep.mubr.f32.mxu0 %v55_v63  ;;  %4517 = vmatprep.mubr.f32.mxu1 %v293_v26  ;;  %v311_v63 = vld [vmem:[%s6861_s0 + $0x8d0] sm:$0xff]  ;;  %v101_v26 = vld [vmem:[%s6861_s0 + $0x240] sm:$0xff] }
  0x58   :  { %4161 = vmatmul.mubr.f32.gmra.mrb[26].mxu0 %v56_v1  ;;  %4518 = vmatmul.mubr.f32.gmra.mrb[26].mxu1 %v294_v28  ;;  %v88_v1 = vld [vmem:[%s6861_s0 + $0x1d8] sm:$0xff]  ;;  %v326_v28 = vld [vmem:[%s6861_s0 + $0x948] sm:$0xff] }
  0x59   :  { %4163 = vmatprep.mubr.f32.mxu0 %v57_v3  ;;  %4520 = vmatprep.mubr.f32.mxu1 %v295_v30  ;;  %v313_v3 = vld [vmem:[%s6861_s0 + $0x8e0] sm:$0xff]  ;;  %v103_v30 = vld [vmem:[%s6861_s0 + $0x250] sm:$0xff] }
  0x5c   :  { %4164 = vmatmul.mubr.f32.gmra.mrb[28].mxu0 %v58_v5  ;;  %4521 = vmatmul.mubr.f32.gmra.mrb[28].mxu1 %v296_v32  ;;  %v90_v5 = vld [vmem:[%s6861_s0 + $0x1e8] sm:$0xff]  ;;  %v328_v32 = vld [vmem:[%s6861_s0 + $0x958] sm:$0xff] }
  0x5d   :  { %4166 = vmatprep.mubr.f32.mxu0 %v59_v7  ;;  %4523 = vmatprep.mubr.f32.mxu1 %v297_v35  ;;  %v315_v7 = vld [vmem:[%s6861_s0 + $0x8f0] sm:$0xff]  ;;  %v329_v35 = vld [vmem:[%s6861_s0 + $0x960] sm:$0xff] }
  0x60   :  { %4167 = vmatmul.mubr.f32.gmra.mrb[30].mxu0 %v60_v9  ;;  %4524 = vmatmul.mubr.f32.gmra.mrb[30].mxu1 %v298_v36  ;;  %v92_v9 = vld [vmem:[%s6861_s0 + $0x1f8] sm:$0xff]  ;;  %v330_v36 = vld [vmem:[%s6861_s0 + $0x968] sm:$0xff] }
  0x61   :  { %4169 = vmatprep.mubr.f32.mxu0 %v61_v11  ;;  %4526 = vmatprep.mubr.f32.mxu1 %v299_v39  ;;  %v317_v11 = vld [vmem:[%s6861_s0 + $0x900] sm:$0xff]  ;;  %v331_v39 = vld [vmem:[%s6861_s0 + $0x970] sm:$0xff] }
  0x64   :  { %4170 = vmatmul.mubr.f32.gmra.mrb[32].mxu0 %v62_v13  ;;  %4527 = vmatmul.mubr.f32.gmra.mrb[32].mxu1 %v300_v40  ;;  %v94_v13 = vld [vmem:[%s6861_s0 + $0x208] sm:$0xff]  ;;  %v332_v40 = vld [vmem:[%s6861_s0 + $0x978] sm:$0xff] }
  0x65   :  { %4172 = vmatprep.mubr.f32.mxu0 %v63_v15  ;;  %4529 = vmatprep.mubr.f32.mxu1 %v301_v43  ;;  %v319_v15 = vld [vmem:[%s6861_s0 + $0x910] sm:$0xff]  ;;  %v333_v43 = vld [vmem:[%s6861_s0 + $0x980] sm:$0xff] }
  0x68   :  { %4173 = vmatmul.mubr.f32.gmra.mrb[34].mxu0 %v64_v17  ;;  %4530 = vmatmul.mubr.f32.gmra.mrb[34].mxu1 %v302_v44  ;;  %v96_v17 = vld [vmem:[%s6861_s0 + $0x218] sm:$0xff]  ;;  %v334_v44 = vld [vmem:[%s6861_s0 + $0x988] sm:$0xff] }
  0x69   :  { %4175 = vmatprep.mubr.f32.mxu0 %v65_v19  ;;  %4532 = vmatprep.mubr.f32.mxu1 %v303_v47  ;;  %v321_v19 = vld [vmem:[%s6861_s0 + $0x920] sm:$0xff]  ;;  %v335_v47 = vld [vmem:[%s6861_s0 + $0x990] sm:$0xff] }
  0x6c   :  { %4176 = vmatmul.mubr.f32.gmra.mrb[36].mxu0 %v66_v21  ;;  %4533 = vmatmul.mubr.f32.gmra.mrb[36].mxu1 %v304_v48  ;;  %v98_v21 = vld [vmem:[%s6861_s0 + $0x228] sm:$0xff]  ;;  %v336_v48 = vld [vmem:[%s6861_s0 + $0x998] sm:$0xff] }
  0x6d   :  { %4178 = vmatprep.mubr.f32.mxu0 %v67_v23  ;;  %4535 = vmatprep.mubr.f32.mxu1 %v305_v51  ;;  %v323_v23 = vld [vmem:[%s6861_s0 + $0x930] sm:$0xff]  ;;  %v337_v51 = vld [vmem:[%s6861_s0 + $0x9a0] sm:$0xff] }
  0x70   :  { %4179 = vmatmul.mubr.f32.gmra.mrb[38].mxu0 %v68_v25  ;;  %4536 = vmatmul.mubr.f32.gmra.mrb[38].mxu1 %v306_v52  ;;  %v100_v25 = vld [vmem:[%s6861_s0 + $0x238] sm:$0xff]  ;;  %v338_v52 = vld [vmem:[%s6861_s0 + $0x9a8] sm:$0xff] }
  0x71   :  { %4181 = vmatprep.mubr.f32.mxu0 %v69_v27  ;;  %4538 = vmatprep.mubr.f32.mxu1 %v307_v55  ;;  %v325_v27 = vld [vmem:[%s6861_s0 + $0x940] sm:$0xff]  ;;  %v339_v55 = vld [vmem:[%s6861_s0 + $0x9b0] sm:$0xff] }
  0x74   :  { %4182 = vmatmul.mubr.f32.gmra.mrb[40].mxu0 %v70_v29  ;;  %4539 = vmatmul.mubr.f32.gmra.mrb[40].mxu1 %v308_v56  ;;  %v102_v29 = vld [vmem:[%s6861_s0 + $0x248] sm:$0xff]  ;;  %v340_v56 = vld [vmem:[%s6861_s0 + $0x9b8] sm:$0xff] }
  0x75   :  { %4184 = vmatprep.mubr.f32.mxu0 %v71_v31  ;;  %4541 = vmatprep.mubr.f32.mxu1 %v309_v59  ;;  %v327_v31 = vld [vmem:[%s6861_s0 + $0x950] sm:$0xff]  ;;  %v341_v59 = vld [vmem:[%s6861_s0 + $0x9c0] sm:$0xff] }
  0x78   :  { %4185 = vmatmul.mubr.f32.gmra.mrb[42].mxu0 %v72_v33  ;;  %4542 = vmatmul.mubr.f32.gmra.mrb[42].mxu1 %v310_v60  ;;  %v104_v33 = vld [vmem:[%s6861_s0 + $0x258] sm:$0xff]  ;;  %v342_v60 = vld [vmem:[%s6861_s0 + $0x9c8] sm:$0xff] }
  0x79   :  { %4187 = vmatprep.mubr.f32.mxu0 %v73_v34  ;;  %4544 = vmatprep.mubr.f32.mxu1 %v311_v63  ;;  %v105_v34 = vld [vmem:[%s6861_s0 + $0x260] sm:$0xff]  ;;  %v343_v63 = vld [vmem:[%s6861_s0 + $0x9d0] sm:$0xff] }
  0x7c   :  { %4188 = vmatmul.mubr.f32.gmra.mrb[44].mxu0 %v74_v37  ;;  %4545 = vmatmul.mubr.f32.gmra.mrb[44].mxu1 %v312_v0  ;;  %v106_v37 = vld [vmem:[%s6861_s0 + $0x268] sm:$0xff]  ;;  %v344_v0 = vld [vmem:[%s6861_s0 + $0x9d8] sm:$0xff] }
  0x7d   :  { %4190 = vmatprep.mubr.f32.mxu0 %v75_v38  ;;  %4547 = vmatprep.mubr.f32.mxu1 %v313_v3  ;;  %v107_v38 = vld [vmem:[%s6861_s0 + $0x270] sm:$0xff]  ;;  %v345_v3 = vld [vmem:[%s6861_s0 + $0x9e0] sm:$0xff] }
  0x80   :  { %4191 = vmatmul.mubr.f32.gmra.mrb[46].mxu0 %v76_v41  ;;  %4548 = vmatmul.mubr.f32.gmra.mrb[46].mxu1 %v314_v4  ;;  %v108_v41 = vld [vmem:[%s6861_s0 + $0x278] sm:$0xff]  ;;  %v346_v4 = vld [vmem:[%s6861_s0 + $0x9e8] sm:$0xff] }
  0x81   :  { %4193 = vmatprep.mubr.f32.mxu0 %v77_v42  ;;  %4550 = vmatprep.mubr.f32.mxu1 %v315_v7  ;;  %v109_v42 = vld [vmem:[%s6861_s0 + $0x280] sm:$0xff]  ;;  %v347_v7 = vld [vmem:[%s6861_s0 + $0x9f0] sm:$0xff] }
  0x84   :  { %4194 = vmatmul.mubr.f32.gmra.mrb[48].mxu0 %v78_v45  ;;  %4551 = vmatmul.mubr.f32.gmra.mrb[48].mxu1 %v316_v8  ;;  %v110_v45 = vld [vmem:[%s6861_s0 + $0x288] sm:$0xff]  ;;  %v348_v8 = vld [vmem:[%s6861_s0 + $0x9f8] sm:$0xff] }
  0x85   :  { %4196 = vmatprep.mubr.f32.mxu0 %v79_v46  ;;  %4553 = vmatprep.mubr.f32.mxu1 %v317_v11  ;;  %v111_v46 = vld [vmem:[%s6861_s0 + $0x290] sm:$0xff]  ;;  %v2358_v11 = vld [vmem:[%s6862_s1 + $0x8] sm:$0xff] }
  0x88   :  { %4197 = vmatmul.mubr.f32.gmra.mrb[50].mxu0 %v80_v49  ;;  %4554 = vmatmul.mubr.f32.gmra.mrb[50].mxu1 %v318_v12  ;;  %v112_v49 = vld [vmem:[%s6861_s0 + $0x298] sm:$0xff]  ;;  %v126_v12 = vld [vmem:[%s6861_s0 + $0x308] sm:$0xff] }
  0x89   :  { %4199 = vmatprep.mubr.f32.mxu0 %v81_v50  ;;  %4556 = vmatprep.mubr.f32.mxu1 %v319_v15  ;;  %v113_v50 = vld [vmem:[%s6861_s0 + $0x2a0] sm:$0xff] }
  0x8a   :  { %v129_v15 = vld [vmem:[%s6861_s0 + $0x320] sm:$0xff] }
  0x8c   :  { %4200 = vmatmul.mubr.f32.gmra.mrb[52].mxu0 %v82_v53  ;;  %4557 = vmatmul.mubr.f32.gmra.mrb[52].mxu1 %v320_v16  ;;  %v114_v53 = vld [vmem:[%s6861_s0 + $0x2a8] sm:$0xff] }
  0x8d   :  { %4202 = vmatprep.mubr.f32.mxu0 %v83_v54  ;;  %4559 = vmatprep.mubr.f32.mxu1 %v321_v19  ;;  %v115_v54 = vld [vmem:[%s6861_s0 + $0x2b0] sm:$0xff]  ;;  %v130_v16 = vld [vmem:[%s6861_s0 + $0x328] sm:$0xff]  ;;  %v133_v19 = vld [vmem:[%s6861_s0 + $0x340] sm:$0xff] }
  0x90   :  { %4203 = vmatmul.mubr.f32.gmra.mrb[54].mxu0 %v84_v57  ;;  %4560 = vmatmul.mubr.f32.gmra.mrb[54].mxu1 %v322_v20  ;;  %v116_v57 = vld [vmem:[%s6861_s0 + $0x2b8] sm:$0xff]  ;;  %v134_v20 = vld [vmem:[%s6861_s0 + $0x348] sm:$0xff] }
  0x91   :  { %4205 = vmatprep.mubr.f32.mxu0 %v85_v58  ;;  %4562 = vmatprep.mubr.f32.mxu1 %v323_v23  ;;  %v117_v58 = vld [vmem:[%s6861_s0 + $0x2c0] sm:$0xff]  ;;  %v136_v23 = vld [vmem:[%s6861_s0 + $0x358] sm:$0xff] }
  0x94   :  { %4206 = vmatmul.mubr.f32.gmra.mrb[56].mxu0 %v86_v61  ;;  %4563 = vmatmul.mubr.f32.gmra.mrb[56].mxu1 %v324_v24  ;;  %v118_v61 = vld [vmem:[%s6861_s0 + $0x2c8] sm:$0xff]  ;;  %v137_v24 = vld [vmem:[%s6861_s0 + $0x360] sm:$0xff] }
  0x95   :  { %4208 = vmatprep.mubr.f32.mxu0 %v87_v62  ;;  %4565 = vmatprep.mubr.f32.mxu1 %v325_v27  ;;  %v119_v62 = vld [vmem:[%s6861_s0 + $0x2d0] sm:$0xff] }
  0x98   :  { %4209 = vmatmul.mubr.f32.gmra.mrb[58].mxu0 %v88_v1  ;;  %4566 = vmatmul.mubr.f32.gmra.mrb[58].mxu1 %v326_v28  ;;  %v120_v1 = vld [vmem:[%s6861_s0 + $0x2d8] sm:$0xff] }
  0x99   :  { %4211 = vmatprep.mubr.f32.mxu0 %v89_v2  ;;  %4568 = vmatprep.mubr.f32.mxu1 %v327_v31  ;;  %v121_v2 = vld [vmem:[%s6861_s0 + $0x2e0] sm:$0xff]  ;;  %v139_v31 = vld [vmem:[%s6861_s0 + $0x370] sm:$0xff] }
  0x9c   :  { %4212 = vmatmul.mubr.f32.gmra.mrb[60].mxu0 %v90_v5  ;;  %4569 = vmatmul.mubr.f32.gmra.mrb[60].mxu1 %v328_v32  ;;  %v122_v5 = vld [vmem:[%s6861_s0 + $0x2e8] sm:$0xff] }
  0x9d   :  { %4214 = vmatprep.mubr.f32.mxu0 %v91_v6  ;;  %4571 = vmatprep.mubr.f32.mxu1 %v329_v35  ;;  %v123_v6 = vld [vmem:[%s6861_s0 + $0x2f0] sm:$0xff] }
  0xa0   :  { %4215 = vmatmul.mubr.f32.gmra.mrb[62].mxu0 %v92_v9  ;;  %4572 = vmatmul.mubr.f32.gmra.mrb[62].mxu1 %v330_v36  ;;  %v124_v9 = vld [vmem:[%s6861_s0 + $0x2f8] sm:$0xff] }
  0xa1   :  { %4217 = vmatprep.mubr.f32.mxu0 %v93_v10  ;;  %4574 = vmatprep.mubr.f32.mxu1 %v331_v39  ;;  %v125_v10 = vld [vmem:[%s6861_s0 + $0x300] sm:$0xff] }
  0xa4   :  { %4218 = vmatmul.mubr.f32.gmra.mrb[64].mxu0 %v94_v13  ;;  %4575 = vmatmul.mubr.f32.gmra.mrb[64].mxu1 %v332_v40  ;;  %v127_v13 = vld [vmem:[%s6861_s0 + $0x310] sm:$0xff]  ;;  %v141_v40 = vld [vmem:[%s6861_s0 + $0x380] sm:$0xff] }
  0xa5   :  { %4220 = vmatprep.mubr.f32.mxu0 %v95_v14  ;;  %4577 = vmatprep.mubr.f32.mxu1 %v333_v43  ;;  %v128_v14 = vld [vmem:[%s6861_s0 + $0x318] sm:$0xff] }
  0xa8   :  { %4221 = vmatmul.mubr.f32.gmra.mrb[66].mxu0 %v96_v17  ;;  %4578 = vmatmul.mubr.f32.gmra.mrb[66].mxu1 %v334_v44  ;;  %v131_v17 = vld [vmem:[%s6861_s0 + $0x330] sm:$0xff] }
  0xa9   :  { %4223 = vmatprep.mubr.f32.mxu0 %v97_v18  ;;  %4580 = vmatprep.mubr.f32.mxu1 %v335_v47  ;;  %v132_v18 = vld [vmem:[%s6861_s0 + $0x338] sm:$0xff]  ;;  %v142_v47 = vld [vmem:[%s6861_s0 + $0x388] sm:$0xff] }
  0xac   :  { %4224 = vmatmul.mubr.f32.gmra.mrb[68].mxu0 %v98_v21  ;;  %4581 = vmatmul.mubr.f32.gmra.mrb[68].mxu1 %v336_v48  ;;  %v135_v21 = vld [vmem:[%s6861_s0 + $0x350] sm:$0xff] }
  0xad   :  { %4226 = vmatprep.mubr.f32.mxu0 %v99_v22  ;;  %4583 = vmatprep.mubr.f32.mxu1 %v337_v51  ;;  %v5680_v22 = vld [vmem:[%s6863_s3] ss:$0 sm:$0xff] }
  0xb0   :  { %4227 = vmatmul.mubr.f32.gmra.mrb[70].mxu0 %v100_v25  ;;  %4584 = vmatmul.mubr.f32.gmra.mrb[70].mxu1 %v338_v52 }
  0xb1   :  { %4229 = vmatprep.mubr.f32.mxu0 %v101_v26  ;;  %4586 = vmatprep.mubr.f32.mxu1 %v339_v55 }
  0xb4   :  { %4230 = vmatmul.mubr.f32.gmra.mrb[72].mxu0 %v102_v29  ;;  %4587 = vmatmul.mubr.f32.gmra.mrb[72].mxu1 %v340_v56  ;;  %v138_v29 = vld [vmem:[%s6861_s0 + $0x368] sm:$0xff]  ;;  %v144_v56 = vld [vmem:[%s6861_s0 + $0x398] sm:$0xff] }
  0xb5   :  { %4232 = vmatprep.mubr.f32.mxu0 %v103_v30  ;;  %4589 = vmatprep.mubr.f32.mxu1 %v341_v59 }
  0xb8   :  { %4233 = vmatmul.mubr.f32.gmra.mrb[74].mxu0 %v104_v33  ;;  %4590 = vmatmul.mubr.f32.gmra.mrb[74].mxu1 %v342_v60 }
  0xb9   :  { %4235 = vmatprep.mubr.f32.mxu0 %v105_v34  ;;  %4592 = vmatprep.mubr.f32.mxu1 %v343_v63 }
  0xbc   :  { %4236 = vmatmul.mubr.f32.gmra.mrb[76].mxu0 %v106_v37  ;;  %4593 = vmatmul.mubr.f32.gmra.mrb[76].mxu1 %v344_v0 }
  0xbd   :  { %4238 = vmatprep.mubr.f32.mxu0 %v107_v38  ;;  %4595 = vmatprep.mubr.f32.mxu1 %v345_v3  ;;  %v140_v38 = vld [vmem:[%s6861_s0 + $0x378] sm:$0xff]  ;;  %v147_v3 = vld [vmem:[%s6861_s0 + $0x3b0] sm:$0xff] }
  0xc0   :  { %4239 = vmatmul.mubr.f32.gmra.mrb[78].mxu0 %v108_v41  ;;  %4596 = vmatmul.mubr.f32.gmra.mrb[78].mxu1 %v346_v4 }
  0xc1   :  { %4241 = vmatprep.mubr.f32.mxu0 %v109_v42  ;;  %4598 = vmatprep.mubr.f32.mxu1 %v347_v7 }
  0xc4   :  { %4242 = vmatmul.mubr.f32.gmra.mrb[80].mxu0 %v110_v45  ;;  %4599 = vmatmul.mubr.f32.gmra.mrb[80].mxu1 %v348_v8 }
  0xc5   :  { %4244 = vmatprep.mubr.f32.mxu0 %v111_v46  ;;  %2461 = vmatprep.mubr.f32.mxu1 %v2358_v11 }
  0xc8   :  { %4245 = vmatmul.mubr.f32.gmra.mrb[82].mxu0 %v112_v49  ;;  %v143_v49 = vld [vmem:[%s6861_s0 + $0x390] sm:$0xff] }
  0xc9   :  { %4247 = vmatprep.mubr.f32.mxu0 %v113_v50 }
  0xcc   :  { %4248 = vmatmul.mubr.f32.gmra.mrb[84].mxu0 %v114_v53 }
  0xcd   :  { %4250 = vmatprep.mubr.f32.mxu0 %v115_v54 }
  0xd0   :  { %4251 = vmatmul.mubr.f32.gmra.mrb[86].mxu0 %v116_v57 }
  0xd1   :  { %4253 = vmatprep.mubr.f32.mxu0 %v117_v58  ;;  %v145_v58 = vld [vmem:[%s6861_s0 + $0x3a0] sm:$0xff] }
  0xd4   :  { %4254 = vmatmul.mubr.f32.gmra.mrb[88].mxu0 %v118_v61 }
  0xd5   :  { %4256 = vmatprep.mubr.f32.mxu0 %v119_v62 }
  0xd8   :  { %4257 = vmatmul.mubr.f32.gmra.mrb[90].mxu0 %v120_v1  ;;  %v146_v1 = vld [vmem:[%s6861_s0 + $0x3a8] sm:$0xff] }
  0xd9   :  { %4259 = vmatprep.mubr.f32.mxu0 %v121_v2 }
  0xdc   :  { %4260 = vmatmul.mubr.f32.gmra.mrb[92].mxu0 %v122_v5 }
  0xdd   :  { %4262 = vmatprep.mubr.f32.mxu0 %v123_v6 }
  0xe0   :  { %4263 = vmatmul.mubr.f32.gmra.mrb[94].mxu0 %v124_v9 }
  0xe1   :  { %4265 = vmatprep.mubr.f32.mxu0 %v125_v10  ;;  %v148_v10 = vld [vmem:[%s6861_s0 + $0x3b8] sm:$0xff] }
  0xe4   :  { %4266 = vmatmul.mubr.f32.gmra.mrb[96].mxu0 %v126_v12  ;;  %v149_v12 = vld [vmem:[%s6861_s0 + $0x3c0] sm:$0xff] }
  0xe5   :  { %4268 = vmatprep.mubr.f32.mxu0 %v127_v13 }
  0xe8   :  { %4269 = vmatmul.mubr.f32.gmra.mrb[98].mxu0 %v128_v14 }
  0xe9   :  { %4271 = vmatprep.mubr.f32.mxu0 %v129_v15 }
  0xec   :  { %4272 = vmatmul.mubr.f32.gmra.mrb[100].mxu0 %v130_v16 }
  0xed   :  { %4274 = vmatprep.mubr.f32.mxu0 %v131_v17 }
  0xf0   :  { %4275 = vmatmul.mubr.f32.gmra.mrb[102].mxu0 %v132_v18 }
  0xf1   :  { %4277 = vmatprep.mubr.f32.mxu0 %v133_v19  ;;  %v150_v19 = vld [vmem:[%s6861_s0 + $0x3c8] sm:$0xff] }
  0xf4   :  { %4278 = vmatmul.mubr.f32.gmra.mrb[104].mxu0 %v134_v20 }
  0xf5   :  { %4280 = vmatprep.mubr.f32.mxu0 %v135_v21  ;;  %v151_v21 = vld [vmem:[%s6861_s0 + $0x3d0] sm:$0xff] }
  0xf7   :  { %v4123_v25 = vpop.f32.mrb[0].mxu0 }
  0xf8   :  { %v444_v26 = vadd.f32 %v4123_v25, %v5680_v22  ;;  %v438_v27 = vpop.f32.mrb[1].mxu0  ;;  %4281 = vmatmul.mubr.f32.gmra.mrb[106].mxu0 %v136_v23 }
  0xf9   :  { %v439_v28 = vadd.f32 %v5680_v22, %v438_v27  ;;  %4283 = vmatprep.mubr.f32.mxu0 %v137_v24 }
  0xfa   :  { %v2038_v30 = vmax.f32 %v444_v26, 0.0 }
  0xfb   :  { %v2037_v32 = vmax.f32 %v439_v28, 0.0  ;;  %v4126_v33 = vpop.f32.mrb[2].mxu0 }
  0xfc   :  { %v454_v34 = vadd.f32 %v4126_v33, %v5680_v22  ;;  %v448_v35 = vpop.f32.mrb[3].mxu0  ;;  %4284 = vmatmul.mubr.f32.gmra.mrb[108].mxu0 %v138_v29  ;;  %v152_v29 = vld [vmem:[%s6861_s0 + $0x3d8] sm:$0xff] }
  0xfd   :  { %v5697_v36 = vpack.c.bf16 %v2038_v30, %v2037_v32  ;;  %v449_v37 = vadd.f32 %v5680_v22, %v448_v35  ;;  %4286 = vmatprep.mubr.f32.mxu0 %v139_v31  ;;  %v153_v31 = vld [vmem:[%s6861_s0 + $0x3e0] sm:$0xff] }
  0xfe   :  { %v2040_v39 = vmax.f32 %v454_v34, 0.0 }
  0xff   :  { %v2039_v41 = vmax.f32 %v449_v37, 0.0  ;;  %v4129_v42 = vpop.f32.mrb[4].mxu0 }
 0x100   :  { %v464_v43 = vadd.f32 %v4129_v42, %v5680_v22  ;;  %v458_v44 = vpop.f32.mrb[5].mxu0  ;;  %4287 = vmatmul.mubr.f32.gmra.mrb[110].mxu0 %v140_v38 }
 0x101   :  { %v5707_v45 = vpack.c.bf16 %v2040_v39, %v2039_v41  ;;  %v459_v46 = vadd.f32 %v5680_v22, %v458_v44  ;;  %4289 = vmatprep.mubr.f32.mxu0 %v141_v40  ;;  %v154_v39 = vld [vmem:[%s6861_s0 + $0x3e8] sm:$0xff]  ;;  %v155_v41 = vld [vmem:[%s6861_s0 + $0x3f0] sm:$0xff] }
 0x102   :  { %v2042_v48 = vmax.f32 %v464_v43, 0.0 }
 0x103   :  { %v2041_v50 = vmax.f32 %v459_v46, 0.0  ;;  %v4132_v51 = vpop.f32.mrb[6].mxu0 }
 0x104   :  { %v474_v52 = vadd.f32 %v4132_v51, %v5680_v22  ;;  %v468_v53 = vpop.f32.mrb[7].mxu0  ;;  %4290 = vmatmul.mubr.f32.gmra.mrb[112].mxu0 %v142_v47  ;;  %v157_v51 = vld [vmem:[%s6861_s0 + $0x400] sm:$0xff] }
 0x105   :  { %v5717_v54 = vpack.c.bf16 %v2042_v48, %v2041_v50  ;;  %v469_v55 = vadd.f32 %v5680_v22, %v468_v53  ;;  %4292 = vmatprep.mubr.f32.mxu0 %v143_v49  ;;  %v156_v49 = vld [vmem:[%s6861_s0 + $0x3f8] sm:$0xff] }
 0x106   :  { %v2044_v57 = vmax.f32 %v474_v52, 0.0 }
 0x107   :  { %v2043_v59 = vmax.f32 %v469_v55, 0.0  ;;  %v4135_v60 = vpop.f32.mrb[8].mxu0 }
 0x108   :  { %v484_v61 = vadd.f32 %v4135_v60, %v5680_v22  ;;  %v478_v62 = vpop.f32.mrb[9].mxu0  ;;  %4293 = vmatmul.mubr.f32.gmra.mrb[114].mxu0 %v144_v56 }
 0x109   :  { %v5727_v63 = vpack.c.bf16 %v2044_v57, %v2043_v59  ;;  %v479_v0 = vadd.f32 %v5680_v22, %v478_v62  ;;  %4295 = vmatprep.mubr.f32.mxu0 %v145_v58  ;;  %v158_v59 = vld [vmem:[%s6861_s0 + $0x408] sm:$0xff] }
 0x10a   :  { %v2046_v2 = vmax.f32 %v484_v61, 0.0  ;;  %v159_v61 = vld [vmem:[%s6861_s0 + $0x410] sm:$0xff] }
 0x10b   :  { %v2045_v4 = vmax.f32 %v479_v0, 0.0  ;;  %v4138_v5 = vpop.f32.mrb[10].mxu0 }
 0x10c   :  { %v494_v6 = vadd.f32 %v4138_v5, %v5680_v22  ;;  %v488_v7 = vpop.f32.mrb[11].mxu0  ;;  %4296 = vmatmul.mubr.f32.gmra.mrb[116].mxu0 %v146_v1 }
 0x10d   :  { %v5737_v8 = vpack.c.bf16 %v2046_v2, %v2045_v4  ;;  %v489_v9 = vadd.f32 %v5680_v22, %v488_v7  ;;  %4298 = vmatprep.mubr.f32.mxu0 %v147_v3  ;;  %v160_v4 = vld [vmem:[%s6861_s0 + $0x418] sm:$0xff] }
 0x10e   :  { %v2048_v11 = vmax.f32 %v494_v6, 0.0  ;;  %v161_v6 = vld [vmem:[%s6861_s0 + $0x420] sm:$0xff] }
 0x10f   :  { %v2047_v13 = vmax.f32 %v489_v9, 0.0  ;;  %v4141_v14 = vpop.f32.mrb[12].mxu0 }
 0x110   :  { %v504_v15 = vadd.f32 %v4141_v14, %v5680_v22  ;;  %v498_v16 = vpop.f32.mrb[13].mxu0  ;;  %4299 = vmatmul.mubr.f32.gmra.mrb[118].mxu0 %v148_v10 }
 0x111   :  { %v5747_v17 = vpack.c.bf16 %v2048_v11, %v2047_v13  ;;  %v499_v18 = vadd.f32 %v5680_v22, %v498_v16  ;;  %4301 = vmatprep.mubr.f32.mxu0 %v149_v12  ;;  %v162_v13 = vld [vmem:[%s6861_s0 + $0x428] sm:$0xff] }
 0x112   :  { %v2050_v20 = vmax.f32 %v504_v15, 0.0  ;;  %v163_v15 = vld [vmem:[%s6861_s0 + $0x430] sm:$0xff] }
 0x113   :  { %v2049_v23 = vmax.f32 %v499_v18, 0.0  ;;  %v4144_v24 = vpop.f32.mrb[14].mxu0 }
 0x114   :  { %v514_v25 = vadd.f32 %v4144_v24, %v5680_v22  ;;  %v508_v26 = vpop.f32.mrb[15].mxu0  ;;  %4302 = vmatmul.mubr.f32.gmra.mrb[120].mxu0 %v150_v19 }
 0x115   :  { %v5757_v27 = vpack.c.bf16 %v2050_v20, %v2049_v23  ;;  %v509_v28 = vadd.f32 %v5680_v22, %v508_v26  ;;  %4304 = vmatprep.mubr.f32.mxu0 %v151_v21  ;;  %v164_v23 = vld [vmem:[%s6861_s0 + $0x438] sm:$0xff] }
 0x116   :  { %v2052_v30 = vmax.f32 %v514_v25, 0.0  ;;  %v165_v25 = vld [vmem:[%s6861_s0 + $0x440] sm:$0xff] }
 0x117   :  { %v2051_v32 = vmax.f32 %v509_v28, 0.0  ;;  %v4147_v33 = vpop.f32.mrb[16].mxu0 }
 0x118   :  { %v524_v34 = vadd.f32 %v4147_v33, %v5680_v22  ;;  %v518_v35 = vpop.f32.mrb[17].mxu0  ;;  %4305 = vmatmul.mubr.f32.gmra.mrb[122].mxu0 %v152_v29 }
 0x119   :  { %v5767_v37 = vpack.c.bf16 %v2052_v30, %v2051_v32  ;;  %v519_v38 = vadd.f32 %v5680_v22, %v518_v35  ;;  %4307 = vmatprep.mubr.f32.mxu0 %v153_v31  ;;  %v166_v32 = vld [vmem:[%s6861_s0 + $0x448] sm:$0xff] }
 0x11a   :  { %v2054_v40 = vmax.f32 %v524_v34, 0.0  ;;  %v167_v34 = vld [vmem:[%s6861_s0 + $0x450] sm:$0xff] }
 0x11b   :  { %v2053_v42 = vmax.f32 %v519_v38, 0.0  ;;  %v4150_v43 = vpop.f32.mrb[18].mxu0 }
 0x11c   :  { %v534_v44 = vadd.f32 %v4150_v43, %v5680_v22  ;;  %v528_v46 = vpop.f32.mrb[19].mxu0  ;;  %4308 = vmatmul.mubr.f32.gmra.mrb[124].mxu0 %v154_v39 }
 0x11d   :  { %v4655_v47 = vpack.c.bf16 %v2054_v40, %v2053_v42  ;;  %v529_v48 = vadd.f32 %v5680_v22, %v528_v46  ;;  %4310 = vmatprep.mubr.f32.mxu0 %v155_v41  ;;  %v168_v42 = vld [vmem:[%s6861_s0 + $0x458] sm:$0xff] }
 0x11e   :  { %v2056_v50 = vmax.f32 %v534_v44, 0.0  ;;  %v169_v44 = vld [vmem:[%s6861_s0 + $0x460] sm:$0xff] }
 0x11f   :  { %v2055_v52 = vmax.f32 %v529_v48, 0.0  ;;  %v4153_v53 = vpop.f32.mrb[20].mxu0  ;;  %4656 = vmatprep.subr.bf16.mxu1 %v4655_v47 }
 0x120   :  { %v544_v55 = vadd.f32 %v4153_v53, %v5680_v22  ;;  %v538_v56 = vpop.f32.mrb[21].mxu0  ;;  %4311 = vmatmul.mubr.f32.gmra.mrb[126].mxu0 %v156_v49  ;;  %4658 = vmatpush3.bf16.msra.mxu1 %v5697_v36  ;;  %v171_v53 = vld [vmem:[%s6861_s0 + $0x470] sm:$0xff] }
 0x121   :  { %v4659_v57 = vpack.c.bf16 %v2056_v50, %v2055_v52  ;;  %v539_v58 = vadd.f32 %v5680_v22, %v538_v56  ;;  %4313 = vmatprep.mubr.f32.mxu0 %v157_v51  ;;  %v170_v51 = vld [vmem:[%s6861_s0 + $0x468] sm:$0xff] }
 0x122   :  { %v2058_v60 = vmax.f32 %v544_v55, 0.0 }
 0x123   :  { %v2057_v62 = vmax.f32 %v539_v58, 0.0  ;;  %v4156_v0 = vpop.f32.mrb[22].mxu0  ;;  %4660 = vmatprep.subr.bf16.mxu1 %v4659_v57 }
 0x124   :  { %v554_v1 = vadd.f32 %v4156_v0, %v5680_v22  ;;  %v548_v2 = vpop.f32.mrb[23].mxu0  ;;  %4314 = vmatmul.mubr.f32.gmra.mrb[128].mxu0 %v158_v59  ;;  %4662 = vmatpush3.bf16.msra.mxu1 %v5707_v45 }
 0x125   :  { %v4663_v36 = vpack.c.bf16 %v2058_v60, %v2057_v62  ;;  %v549_v3 = vadd.f32 %v5680_v22, %v548_v2  ;;  %4316 = vmatprep.mubr.f32.mxu0 %v159_v61  ;;  %v172_v61 = vld [vmem:[%s6861_s0 + $0x478] sm:$0xff]  ;;  %v2378_v62 = vld [vmem:[%s6862_s1 + $0xa8] sm:$0x3] }
 0x126   :  { %v2060_v5 = vmax.f32 %v554_v1, 0.0 }
 0x127   :  { %v2059_v7 = vmax.f32 %v549_v3, 0.0  ;;  %v4159_v9 = vpop.f32.mrb[24].mxu0  ;;  %4664 = vmatprep.subr.bf16.mxu1 %v4663_v36 }
 0x128   :  { %v564_v10 = vadd.f32 %v4159_v9, %v5680_v22  ;;  %v558_v11 = vpop.f32.mrb[25].mxu0  ;;  %4317 = vmatmul.mubr.f32.gmra.mrb[130].mxu0 %v160_v4  ;;  %4666 = vmatpush3.bf16.msra.mxu1 %v5717_v54  ;;  %v2377_v4 = vld [vmem:[%s6862_s1 + $0xa0] sm:$0x3]  ;;  %v2360_v9 = vld [vmem:[%s6862_s1 + $0x18] sm:$0xff] }
 0x129   :  { %v4667_v45 = vpack.c.bf16 %v2060_v5, %v2059_v7  ;;  %v559_v12 = vadd.f32 %v5680_v22, %v558_v11  ;;  %4319 = vmatprep.mubr.f32.mxu0 %v161_v6  ;;  %v174_v7 = vld [vmem:[%s6861_s0 + $0x488] sm:$0xff]  ;;  %v175_v11 = vld [vmem:[%s6861_s0 + $0x490] sm:$0xff] }
 0x12a   :  { %v2062_v14 = vmax.f32 %v564_v10, 0.0 }
 0x12b   :  { %v2061_v16 = vmax.f32 %v559_v12, 0.0  ;;  %v4162_v18 = vpop.f32.mrb[26].mxu0  ;;  %4668 = vmatprep.subr.bf16.mxu1 %v4667_v45 }
 0x12c   :  { %v574_v19 = vadd.f32 %v4162_v18, %v5680_v22  ;;  %v568_v20 = vpop.f32.mrb[27].mxu0  ;;  %4320 = vmatmul.mubr.f32.gmra.mrb[132].mxu0 %v162_v13  ;;  %4670 = vmatpush3.bf16.msra.mxu1 %v5727_v63  ;;  %v176_v18 = vld [vmem:[%s6861_s0 + $0x498] sm:$0xff] }
 0x12d   :  { %v4671_v54 = vpack.c.bf16 %v2062_v14, %v2061_v16  ;;  %v569_v21 = vadd.f32 %v5680_v22, %v568_v20  ;;  %4322 = vmatprep.mubr.f32.mxu0 %v163_v15  ;;  %v177_v20 = vld [vmem:[%s6861_s0 + $0x4a0] sm:$0xff] }
 0x12e   :  { %v2064_v24 = vmax.f32 %v574_v19, 0.0 }
 0x12f   :  { %v2063_v26 = vmax.f32 %v569_v21, 0.0  ;;  %v4165_v28 = vpop.f32.mrb[28].mxu0  ;;  %4672 = vmatprep.subr.bf16.mxu1 %v4671_v54 }
 0x130   :  { %v584_v29 = vadd.f32 %v4165_v28, %v5680_v22  ;;  %v578_v30 = vpop.f32.mrb[29].mxu0  ;;  %4323 = vmatmul.mubr.f32.gmra.mrb[134].mxu0 %v164_v23  ;;  %4674 = vmatpush3.bf16.msra.mxu1 %v5737_v8  ;;  %v178_v28 = vld [vmem:[%s6861_s0 + $0x4a8] sm:$0xff] }
 0x131   :  { %v4675_v63 = vpack.c.bf16 %v2064_v24, %v2063_v26  ;;  %v579_v31 = vadd.f32 %v5680_v22, %v578_v30  ;;  %4325 = vmatprep.mubr.f32.mxu0 %v165_v25  ;;  %v179_v30 = vld [vmem:[%s6861_s0 + $0x4b0] sm:$0xff] }
 0x132   :  { %v2066_v33 = vmax.f32 %v584_v29, 0.0 }
 0x133   :  { %v2065_v35 = vmax.f32 %v579_v31, 0.0  ;;  %v4168_v38 = vpop.f32.mrb[30].mxu0  ;;  %4676 = vmatprep.subr.bf16.mxu1 %v4675_v63 }
 0x134   :  { %v594_v39 = vadd.f32 %v4168_v38, %v5680_v22  ;;  %v588_v40 = vpop.f32.mrb[31].mxu0  ;;  %4326 = vmatmul.mubr.f32.gmra.mrb[136].mxu0 %v166_v32  ;;  %4678 = vmatpush3.bf16.msra.mxu1 %v5747_v17  ;;  %v180_v38 = vld [vmem:[%s6861_s0 + $0x4b8] sm:$0xff] }
 0x135   :  { %v4679_v8 = vpack.c.bf16 %v2066_v33, %v2065_v35  ;;  %v589_v41 = vadd.f32 %v5680_v22, %v588_v40  ;;  %4328 = vmatprep.mubr.f32.mxu0 %v167_v34  ;;  %v181_v40 = vld [vmem:[%s6861_s0 + $0x4c0] sm:$0xff] }
 0x136   :  { %v2068_v43 = vmax.f32 %v594_v39, 0.0 }
 0x137   :  { %v2067_v46 = vmax.f32 %v589_v41, 0.0  ;;  %v4171_v47 = vpop.f32.mrb[32].mxu0  ;;  %4680 = vmatprep.subr.bf16.mxu1 %v4679_v8 }
 0x138   :  { %v604_v48 = vadd.f32 %v4171_v47, %v5680_v22  ;;  %v598_v49 = vpop.f32.mrb[33].mxu0  ;;  %4329 = vmatmul.mubr.f32.gmra.mrb[138].mxu0 %v168_v42  ;;  %4682 = vmatpush3.bf16.msra.mxu1 %v5757_v27  ;;  %v2357_v27 = vld [vmem:[%s6862_s1] sm:$0xff]  ;;  %v182_v47 = vld [vmem:[%s6861_s0 + $0x4c8] sm:$0xff] }
 0x139   :  { %v4683_v17 = vpack.c.bf16 %v2068_v43, %v2067_v46  ;;  %v599_v50 = vadd.f32 %v5680_v22, %v598_v49  ;;  %4331 = vmatprep.mubr.f32.mxu0 %v169_v44  ;;  %v183_v49 = vld [vmem:[%s6861_s0 + $0x4d0] sm:$0xff] }
 0x13a   :  { %v2070_v52 = vmax.f32 %v604_v48, 0.0 }
 0x13b   :  { %v2069_v55 = vmax.f32 %v599_v50, 0.0  ;;  %v4174_v56 = vpop.f32.mrb[34].mxu0  ;;  %4684 = vmatprep.subr.bf16.mxu1 %v4683_v17 }
 0x13c   :  { %v614_v57 = vadd.f32 %v4174_v56, %v5680_v22  ;;  %v608_v58 = vpop.f32.mrb[35].mxu0  ;;  %4332 = vmatmul.mubr.f32.gmra.mrb[140].mxu0 %v170_v51  ;;  %4686 = vmatpush3.bf16.msra.mxu1 %v5767_v37  ;;  %v173_v37 = vld [vmem:[%s6861_s0 + $0x480] sm:$0xff]  ;;  %v184_v56 = vld [vmem:[%s6861_s0 + $0x4d8] sm:$0xff] }
 0x13d   :  { %v5852_v59 = vpack.c.bf16 %v2070_v52, %v2069_v55  ;;  %v609_v60 = vadd.f32 %v5680_v22, %v608_v58  ;;  %4334 = vmatprep.mubr.f32.mxu0 %v171_v53  ;;  %v185_v58 = vld [vmem:[%s6861_s0 + $0x4e0] sm:$0xff] }
 0x13e   :  { %v2072_v0 = vmax.f32 %v614_v57, 0.0 }
 0x13f   :  { %v2071_v1 = vmax.f32 %v609_v60, 0.0  ;;  %v4177_v2 = vpop.f32.mrb[36].mxu0  ;;  %2462 = vmatmul.mubr.f32.vlgmr.msra.gmra.mrb[82].mxu1 %v2357_v27 }
 0x140   :  { %v624_v36 = vadd.f32 %v4177_v2, %v5680_v22  ;;  %v618_v3 = vpop.f32.mrb[37].mxu0  ;;  %4335 = vmatmul.mubr.f32.gmra.mrb[142].mxu0 %v172_v61  ;;  %2466 = vmatprep.mubr.f32.mxu1 %v2378_v62 }
 0x141   :  { %v5868_v5 = vpack.c.bf16 %v2072_v0, %v2071_v1  ;;  %v619_v6 = vadd.f32 %v5680_v22, %v618_v3  ;;  %4337 = vmatprep.mubr.f32.mxu0 %v173_v37  ;;  %v186_v1 = vld [vmem:[%s6861_s0 + $0x4e8] sm:$0xff] }
 0x142   :  { %v2074_v10 = vmax.f32 %v624_v36, 0.0  ;;  %v187_v36 = vld [vmem:[%s6861_s0 + $0x4f0] sm:$0xff] }
 0x143   :  { %v2073_v45 = vmax.f32 %v619_v6, 0.0  ;;  %v4180_v12 = vpop.f32.mrb[38].mxu0  ;;  %2467 = vmatmul.mubr.f32.gmra.mrb[84].mxu1 %v2377_v4 }
 0x144   :  { %v634_v13 = vadd.f32 %v4180_v12, %v5680_v22  ;;  %v628_v14 = vpop.f32.mrb[39].mxu0  ;;  %4338 = vmatmul.mubr.f32.gmra.mrb[144].mxu0 %v174_v7  ;;  %2536 = vmatprep.mubr.f32.mxu1 %v2360_v9  ;;  %v189_v12 = vld [vmem:[%s6861_s0 + $0x500] sm:$0xff] }
 0x145   :  { %v5881_v15 = vpack.c.bf16 %v2074_v10, %v2073_v45  ;;  %v629_v16 = vadd.f32 %v5680_v22, %v628_v14  ;;  %4340 = vmatprep.mubr.f32.mxu0 %v175_v11  ;;  %v188_v11 = vld [vmem:[%s6861_s0 + $0x4f8] sm:$0xff] }
 0x146   :  { %v2076_v19 = vmax.f32 %v634_v13, 0.0 }
 0x147   :  { %v2075_v54 = vmax.f32 %v629_v16, 0.0  ;;  %v4183_v21 = vpop.f32.mrb[40].mxu0 }
 0x148   :  { %v644_v23 = vadd.f32 %v4183_v21, %v5680_v22  ;;  %v638_v24 = vpop.f32.mrb[41].mxu0  ;;  %4341 = vmatmul.mubr.f32.gmra.mrb[146].mxu0 %v176_v18 }
 0x149   :  { %v5891_v25 = vpack.c.bf16 %v2076_v19, %v2075_v54  ;;  %v639_v26 = vadd.f32 %v5680_v22, %v638_v24  ;;  %4343 = vmatprep.mubr.f32.mxu0 %v177_v20  ;;  %v190_v54 = vld [vmem:[%s6861_s0 + $0x508] sm:$0xff] }
 0x14a   :  { %v2078_v29 = vmax.f32 %v644_v23, 0.0  ;;  %v191_v23 = vld [vmem:[%s6861_s0 + $0x510] sm:$0xff] }
 0x14b   :  { %v2077_v63 = vmax.f32 %v639_v26, 0.0  ;;  %v4186_v31 = vpop.f32.mrb[42].mxu0 }
 0x14c   :  { %v654_v32 = vadd.f32 %v4186_v31, %v5680_v22  ;;  %v648_v33 = vpop.f32.mrb[43].mxu0  ;;  %4344 = vmatmul.mubr.f32.gmra.mrb[148].mxu0 %v178_v28 }
 0x14d   :  { %v5901_v34 = vpack.c.bf16 %v2078_v29, %v2077_v63  ;;  %v649_v35 = vadd.f32 %v5680_v22, %v648_v33  ;;  %4346 = vmatprep.mubr.f32.mxu0 %v179_v30  ;;  %v192_v63 = vld [vmem:[%s6861_s0 + $0x518] sm:$0xff] }
 0x14e   :  { %v2080_v39 = vmax.f32 %v654_v32, 0.0  ;;  %v193_v32 = vld [vmem:[%s6861_s0 + $0x520] sm:$0xff] }
 0x14f   :  { %v2079_v8 = vmax.f32 %v649_v35, 0.0  ;;  %v4189_v41 = vpop.f32.mrb[44].mxu0 }
 0x150   :  { %v664_v42 = vadd.f32 %v4189_v41, %v5680_v22  ;;  %v658_v43 = vpop.f32.mrb[45].mxu0  ;;  %4347 = vmatmul.mubr.f32.gmra.mrb[150].mxu0 %v180_v38 }
 0x151   :  { %v5911_v44 = vpack.c.bf16 %v2080_v39, %v2079_v8  ;;  %v659_v46 = vadd.f32 %v5680_v22, %v658_v43  ;;  %4349 = vmatprep.mubr.f32.mxu0 %v181_v40  ;;  %v194_v8 = vld [vmem:[%s6861_s0 + $0x528] sm:$0xff] }
 0x152   :  { %v2082_v48 = vmax.f32 %v664_v42, 0.0  ;;  %v195_v42 = vld [vmem:[%s6861_s0 + $0x530] sm:$0xff] }
 0x153   :  { %v2081_v17 = vmax.f32 %v659_v46, 0.0  ;;  %v4192_v50 = vpop.f32.mrb[46].mxu0 }
 0x154   :  { %v674_v51 = vadd.f32 %v4192_v50, %v5680_v22  ;;  %v668_v52 = vpop.f32.mrb[47].mxu0  ;;  %4350 = vmatmul.mubr.f32.gmra.mrb[152].mxu0 %v182_v47 }
 0x155   :  { %v5921_v53 = vpack.c.bf16 %v2082_v48, %v2081_v17  ;;  %v669_v55 = vadd.f32 %v5680_v22, %v668_v52  ;;  %4352 = vmatprep.mubr.f32.mxu0 %v183_v49  ;;  %v196_v17 = vld [vmem:[%s6861_s0 + $0x538] sm:$0xff] }
 0x156   :  { %v2084_v57 = vmax.f32 %v674_v51, 0.0  ;;  %v197_v51 = vld [vmem:[%s6861_s0 + $0x540] sm:$0xff] }
 0x157   :  { %v2083_v27 = vmax.f32 %v669_v55, 0.0  ;;  %v4195_v60 = vpop.f32.mrb[48].mxu0 }
 0x158   :  { %v684_v61 = vadd.f32 %v4195_v60, %v5680_v22  ;;  %v678_v62 = vpop.f32.mrb[49].mxu0  ;;  %4353 = vmatmul.mubr.f32.gmra.mrb[154].mxu0 %v184_v56 }
 0x159   :  { %v5931_v0 = vpack.c.bf16 %v2084_v57, %v2083_v27  ;;  %v679_v37 = vadd.f32 %v5680_v22, %v678_v62  ;;  %4355 = vmatprep.mubr.f32.mxu0 %v185_v58  ;;  %v198_v27 = vld [vmem:[%s6861_s0 + $0x548] sm:$0xff] }
 0x15a   :  { %v2086_v2 = vmax.f32 %v684_v61, 0.0  ;;  %v199_v61 = vld [vmem:[%s6861_s0 + $0x550] sm:$0xff] }
 0x15b   :  { %v2085_v3 = vmax.f32 %v679_v37, 0.0  ;;  %v4198_v4 = vpop.f32.mrb[50].mxu0 }
 0x15c   :  { %v694_v6 = vadd.f32 %v4198_v4, %v5680_v22  ;;  %v688_v7 = vpop.f32.mrb[51].mxu0  ;;  %4356 = vmatmul.mubr.f32.gmra.mrb[156].mxu0 %v186_v1 }
 0x15d   :  { %v4687_v9 = vpack.c.bf16 %v2086_v2, %v2085_v3  ;;  %v689_v10 = vadd.f32 %v5680_v22, %v688_v7  ;;  %4358 = vmatprep.mubr.f32.mxu0 %v187_v36  ;;  %v200_v3 = vld [vmem:[%s6861_s0 + $0x558] sm:$0xff] }
 0x15e   :  { %v2088_v45 = vmax.f32 %v694_v6, 0.0  ;;  %v201_v6 = vld [vmem:[%s6861_s0 + $0x560] sm:$0xff] }
 0x15f   :  { %v2087_v13 = vmax.f32 %v689_v10, 0.0  ;;  %v4201_v14 = vpop.f32.mrb[52].mxu0  ;;  %4688 = vmatprep.subr.bf16.mxu1 %v4687_v9 }
 0x160   :  { %v704_v16 = vadd.f32 %v4201_v14, %v5680_v22  ;;  %v698_v18 = vpop.f32.mrb[53].mxu0  ;;  %4359 = vmatmul.mubr.f32.gmra.mrb[158].mxu0 %v188_v11  ;;  %4690 = vmatpush3.bf16.msra.mxu1 %v5852_v59  ;;  %v203_v14 = vld [vmem:[%s6861_s0 + $0x570] sm:$0xff] }
 0x161   :  { %v4691_v19 = vpack.c.bf16 %v2088_v45, %v2087_v13  ;;  %v699_v20 = vadd.f32 %v5680_v22, %v698_v18  ;;  %4361 = vmatprep.mubr.f32.mxu0 %v189_v12  ;;  %v202_v12 = vld [vmem:[%s6861_s0 + $0x568] sm:$0xff] }
 0x162   :  { %v2090_v21 = vmax.f32 %v704_v16, 0.0 }
 0x163   :  { %v2089_v24 = vmax.f32 %v699_v20, 0.0  ;;  %v4204_v26 = vpop.f32.mrb[54].mxu0  ;;  %4692 = vmatprep.subr.bf16.mxu1 %v4691_v19 }
 0x164   :  { %v714_v28 = vadd.f32 %v4204_v26, %v5680_v22  ;;  %v708_v29 = vpop.f32.mrb[55].mxu0  ;;  %4362 = vmatmul.mubr.f32.gmra.mrb[160].mxu0 %v190_v54  ;;  %4694 = vmatpush3.bf16.msra.mxu1 %v5868_v5 }
 0x165   :  { %v4695_v59 = vpack.c.bf16 %v2090_v21, %v2089_v24  ;;  %v709_v30 = vadd.f32 %v5680_v22, %v708_v29  ;;  %4364 = vmatprep.mubr.f32.mxu0 %v191_v23  ;;  %v204_v23 = vld [vmem:[%s6861_s0 + $0x578] sm:$0xff] }
 0x166   :  { %v2092_v31 = vmax.f32 %v714_v28, 0.0  ;;  %v2380_v24 = vld [vmem:[%s6862_s1 + $0xb8] sm:$0x3] }
 0x167   :  { %v2091_v33 = vmax.f32 %v709_v30, 0.0  ;;  %v4207_v35 = vpop.f32.mrb[56].mxu0  ;;  %4696 = vmatprep.subr.bf16.mxu1 %v4695_v59 }
 0x168   :  { %v724_v38 = vadd.f32 %v4207_v35, %v5680_v22  ;;  %v718_v39 = vpop.f32.mrb[57].mxu0  ;;  %4365 = vmatmul.mubr.f32.gmra.mrb[162].mxu0 %v192_v63  ;;  %4698 = vmatpush3.bf16.msra.mxu1 %v5881_v15  ;;  %v2379_v63 = vld [vmem:[%s6862_s1 + $0xb0] sm:$0x3]  ;;  %v2362_v35 = vld [vmem:[%s6862_s1 + $0x28] sm:$0xff] }
 0x169   :  { %v4699_v5 = vpack.c.bf16 %v2092_v31, %v2091_v33  ;;  %v719_v40 = vadd.f32 %v5680_v22, %v718_v39  ;;  %4367 = vmatprep.mubr.f32.mxu0 %v193_v32  ;;  %v206_v33 = vld [vmem:[%s6861_s0 + $0x588] sm:$0xff]  ;;  %v207_v39 = vld [vmem:[%s6861_s0 + $0x590] sm:$0xff] }
 0x16a   :  { %v2094_v41 = vmax.f32 %v724_v38, 0.0 }
 0x16b   :  { %v2093_v43 = vmax.f32 %v719_v40, 0.0  ;;  %v4210_v46 = vpop.f32.mrb[58].mxu0  ;;  %4700 = vmatprep.subr.bf16.mxu1 %v4699_v5 }
 0x16c   :  { %v734_v47 = vadd.f32 %v4210_v46, %v5680_v22  ;;  %v728_v48 = vpop.f32.mrb[59].mxu0  ;;  %4368 = vmatmul.mubr.f32.gmra.mrb[164].mxu0 %v194_v8  ;;  %4702 = vmatpush3.bf16.msra.mxu1 %v5891_v25  ;;  %v208_v46 = vld [vmem:[%s6861_s0 + $0x598] sm:$0xff] }
 0x16d   :  { %v4703_v15 = vpack.c.bf16 %v2094_v41, %v2093_v43  ;;  %v729_v49 = vadd.f32 %v5680_v22, %v728_v48  ;;  %4370 = vmatprep.mubr.f32.mxu0 %v195_v42  ;;  %v209_v48 = vld [vmem:[%s6861_s0 + $0x5a0] sm:$0xff] }
 0x16e   :  { %v2096_v50 = vmax.f32 %v734_v47, 0.0 }
 0x16f   :  { %v2095_v52 = vmax.f32 %v729_v49, 0.0  ;;  %v4213_v55 = vpop.f32.mrb[60].mxu0  ;;  %4704 = vmatprep.subr.bf16.mxu1 %v4703_v15 }
 0x170   :  { %v744_v56 = vadd.f32 %v4213_v55, %v5680_v22  ;;  %v738_v57 = vpop.f32.mrb[61].mxu0  ;;  %4371 = vmatmul.mubr.f32.gmra.mrb[166].mxu0 %v196_v17  ;;  %4706 = vmatpush3.bf16.msra.mxu1 %v5901_v34  ;;  %v210_v55 = vld [vmem:[%s6861_s0 + $0x5a8] sm:$0xff] }
 0x171   :  { %v4707_v25 = vpack.c.bf16 %v2096_v50, %v2095_v52  ;;  %v739_v58 = vadd.f32 %v5680_v22, %v738_v57  ;;  %4373 = vmatprep.mubr.f32.mxu0 %v197_v51  ;;  %v211_v57 = vld [vmem:[%s6861_s0 + $0x5b0] sm:$0xff] }
 0x172   :  { %v2098_v60 = vmax.f32 %v744_v56, 0.0 }
 0x173   :  { %v2097_v62 = vmax.f32 %v739_v58, 0.0  ;;  %v4216_v37 = vpop.f32.mrb[62].mxu0  ;;  %4708 = vmatprep.subr.bf16.mxu1 %v4707_v25 }
 0x174   :  { %v754_v1 = vadd.f32 %v4216_v37, %v5680_v22  ;;  %v748_v2 = vpop.f32.mrb[63].mxu0  ;;  %4374 = vmatmul.mubr.f32.gmra.mrb[168].mxu0 %v198_v27  ;;  %4710 = vmatpush3.bf16.msra.mxu1 %v5911_v44  ;;  %v212_v37 = vld [vmem:[%s6861_s0 + $0x5b8] sm:$0xff] }
 0x175   :  { %v4711_v34 = vpack.c.bf16 %v2098_v60, %v2097_v62  ;;  %v749_v36 = vadd.f32 %v5680_v22, %v748_v2  ;;  %4376 = vmatprep.mubr.f32.mxu0 %v199_v61  ;;  %v213_v2 = vld [vmem:[%s6861_s0 + $0x5c0] sm:$0xff] }
 0x176   :  { %v2100_v4 = vmax.f32 %v754_v1, 0.0 }
 0x177   :  { %v2099_v7 = vmax.f32 %v749_v36, 0.0  ;;  %v4219_v9 = vpop.f32.mrb[64].mxu0  ;;  %4712 = vmatprep.subr.bf16.mxu1 %v4711_v34 }
 0x178   :  { %v764_v10 = vadd.f32 %v4219_v9, %v5680_v22  ;;  %v758_v11 = vpop.f32.mrb[65].mxu0  ;;  %4377 = vmatmul.mubr.f32.gmra.mrb[170].mxu0 %v200_v3  ;;  %4714 = vmatpush3.bf16.msra.mxu1 %v5921_v53  ;;  %v2359_v53 = vld [vmem:[%s6862_s1 + $0x10] sm:$0xff]  ;;  %v214_v9 = vld [vmem:[%s6861_s0 + $0x5c8] sm:$0xff] }
 0x179   :  { %v4715_v44 = vpack.c.bf16 %v2100_v4, %v2099_v7  ;;  %v759_v45 = vadd.f32 %v5680_v22, %v758_v11  ;;  %4379 = vmatprep.mubr.f32.mxu0 %v201_v6  ;;  %v215_v11 = vld [vmem:[%s6861_s0 + $0x5d0] sm:$0xff] }
 0x17a   :  { %v2102_v13 = vmax.f32 %v764_v10, 0.0 }
 0x17b   :  { %v2101_v16 = vmax.f32 %v759_v45, 0.0  ;;  %v4222_v18 = vpop.f32.mrb[66].mxu0  ;;  %4716 = vmatprep.subr.bf16.mxu1 %v4715_v44 }
 0x17c   :  { %v774_v19 = vadd.f32 %v4222_v18, %v5680_v22  ;;  %v768_v20 = vpop.f32.mrb[67].mxu0  ;;  %4380 = vmatmul.mubr.f32.gmra.mrb[172].mxu0 %v202_v12  ;;  %4718 = vmatpush3.bf16.msra.mxu1 %v5931_v0  ;;  %v205_v0 = vld [vmem:[%s6861_s0 + $0x580] sm:$0xff]  ;;  %v216_v18 = vld [vmem:[%s6861_s0 + $0x5d8] sm:$0xff] }
 0x17d   :  { %v6016_v54 = vpack.c.bf16 %v2102_v13, %v2101_v16  ;;  %v769_v21 = vadd.f32 %v5680_v22, %v768_v20  ;;  %4382 = vmatprep.mubr.f32.mxu0 %v203_v14  ;;  %v217_v20 = vld [vmem:[%s6861_s0 + $0x5e0] sm:$0xff] }
 0x17e   :  { %v2104_v26 = vmax.f32 %v774_v19, 0.0 }
 0x17f   :  { %v2103_v28 = vmax.f32 %v769_v21, 0.0  ;;  %v4225_v29 = vpop.f32.mrb[68].mxu0  ;;  %2537 = vmatmul.mubr.f32.vlgmr.msra.gmra.mrb[86].mxu1 %v2359_v53 }
 0x180   :  { %v784_v59 = vadd.f32 %v4225_v29, %v5680_v22  ;;  %v778_v30 = vpop.f32.mrb[69].mxu0  ;;  %4383 = vmatmul.mubr.f32.gmra.mrb[174].mxu0 %v204_v23  ;;  %2541 = vmatprep.mubr.f32.mxu1 %v2380_v24 }
 0x181   :  { %v6032_v31 = vpack.c.bf16 %v2104_v26, %v2103_v28  ;;  %v779_v32 = vadd.f32 %v5680_v22, %v778_v30  ;;  %4385 = vmatprep.mubr.f32.mxu0 %v205_v0  ;;  %v218_v28 = vld [vmem:[%s6861_s0 + $0x5e8] sm:$0xff] }
 0x182   :  { %v2106_v38 = vmax.f32 %v784_v59, 0.0  ;;  %v219_v59 = vld [vmem:[%s6861_s0 + $0x5f0] sm:$0xff] }
 0x183   :  { %v2105_v5 = vmax.f32 %v779_v32, 0.0  ;;  %v4228_v40 = vpop.f32.mrb[70].mxu0  ;;  %2542 = vmatmul.mubr.f32.gmra.mrb[88].mxu1 %v2379_v63 }
 0x184   :  { %v794_v8 = vadd.f32 %v4228_v40, %v5680_v22  ;;  %v788_v41 = vpop.f32.mrb[71].mxu0  ;;  %4386 = vmatmul.mubr.f32.gmra.mrb[176].mxu0 %v206_v33  ;;  %2611 = vmatprep.mubr.f32.mxu1 %v2362_v35  ;;  %v221_v40 = vld [vmem:[%s6861_s0 + $0x600] sm:$0xff] }
 0x185   :  { %v6045_v42 = vpack.c.bf16 %v2106_v38, %v2105_v5  ;;  %v789_v43 = vadd.f32 %v5680_v22, %v788_v41  ;;  %4388 = vmatprep.mubr.f32.mxu0 %v207_v39  ;;  %v220_v39 = vld [vmem:[%s6861_s0 + $0x5f8] sm:$0xff] }
 0x186   :  { %v2108_v47 = vmax.f32 %v794_v8, 0.0 }
 0x187   :  { %v2107_v15 = vmax.f32 %v789_v43, 0.0  ;;  %v4231_v49 = vpop.f32.mrb[72].mxu0  ;;  %v6115_v43 = vld [vmem:[%s6863_s3] ss:$0 sm:$0xff] }
 0x188   :  { %v804_v17 = vadd.f32 %v4231_v49, %v5680_v22  ;;  %v798_v50 = vpop.f32.mrb[73].mxu0  ;;  %4389 = vmatmul.mubr.f32.gmra.mrb[178].mxu0 %v208_v46 }
 0x189   :  { %v6055_v51 = vpack.c.bf16 %v2108_v47, %v2107_v15  ;;  %v799_v52 = vadd.f32 %v5680_v22, %v798_v50  ;;  %4391 = vmatprep.mubr.f32.mxu0 %v209_v48  ;;  %v222_v15 = vld [vmem:[%s6861_s0 + $0x608] sm:$0xff] }
 0x18a   :  { %v2110_v56 = vmax.f32 %v804_v17, 0.0  ;;  %v223_v17 = vld [vmem:[%s6861_s0 + $0x610] sm:$0xff] }
 0x18b   :  { %v2109_v25 = vmax.f32 %v799_v52, 0.0  ;;  %v4234_v58 = vpop.f32.mrb[74].mxu0 }
 0x18c   :  { %v814_v27 = vadd.f32 %v4234_v58, %v5680_v22  ;;  %v808_v60 = vpop.f32.mrb[75].mxu0  ;;  %4392 = vmatmul.mubr.f32.gmra.mrb[180].mxu0 %v210_v55 }
 0x18d   :  { %v6065_v61 = vpack.c.bf16 %v2110_v56, %v2109_v25  ;;  %v809_v62 = vadd.f32 %v5680_v22, %v808_v60  ;;  %4394 = vmatprep.mubr.f32.mxu0 %v211_v57  ;;  %v224_v25 = vld [vmem:[%s6861_s0 + $0x618] sm:$0xff] }
 0x18e   :  { %v2112_v1 = vmax.f32 %v814_v27, 0.0  ;;  %v225_v27 = vld [vmem:[%s6861_s0 + $0x620] sm:$0xff] }
 0x18f   :  { %v2111_v34 = vmax.f32 %v809_v62, 0.0  ;;  %v4237_v36 = vpop.f32.mrb[76].mxu0 }
 0x190   :  { %v824_v3 = vadd.f32 %v4237_v36, %v5680_v22  ;;  %v818_v4 = vpop.f32.mrb[77].mxu0  ;;  %4395 = vmatmul.mubr.f32.gmra.mrb[182].mxu0 %v212_v37 }
 0x191   :  { %v6075_v6 = vpack.c.bf16 %v2112_v1, %v2111_v34  ;;  %v819_v7 = vadd.f32 %v5680_v22, %v818_v4  ;;  %4397 = vmatprep.mubr.f32.mxu0 %v213_v2  ;;  %v226_v34 = vld [vmem:[%s6861_s0 + $0x628] sm:$0xff] }
 0x192   :  { %v2114_v10 = vmax.f32 %v824_v3, 0.0  ;;  %v227_v3 = vld [vmem:[%s6861_s0 + $0x630] sm:$0xff] }
 0x193   :  { %v2113_v44 = vmax.f32 %v819_v7, 0.0  ;;  %v4240_v45 = vpop.f32.mrb[78].mxu0 }
 0x194   :  { %v834_v12 = vadd.f32 %v4240_v45, %v5680_v22  ;;  %v828_v13 = vpop.f32.mrb[79].mxu0  ;;  %4398 = vmatmul.mubr.f32.gmra.mrb[184].mxu0 %v214_v9 }
 0x195   :  { %v6085_v14 = vpack.c.bf16 %v2114_v10, %v2113_v44  ;;  %v829_v16 = vadd.f32 %v5680_v22, %v828_v13  ;;  %4400 = vmatprep.mubr.f32.mxu0 %v215_v11  ;;  %v228_v44 = vld [vmem:[%s6861_s0 + $0x638] sm:$0xff]  ;;  %v4480_v13 = vpop.f32.mrb[0].mxu1 }
 0x196   :  { %v2116_v19 = vmax.f32 %v834_v12, 0.0  ;;  %v229_v12 = vld [vmem:[%s6861_s0 + $0x640] sm:$0xff] }
 0x197   :  { %v2115_v53 = vmax.f32 %v829_v16, 0.0  ;;  %v4243_v21 = vpop.f32.mrb[80].mxu0 }
 0x198   :  { %v844_v23 = vadd.f32 %v4243_v21, %v5680_v22  ;;  %v838_v24 = vpop.f32.mrb[81].mxu0  ;;  %4401 = vmatmul.mubr.f32.gmra.mrb[186].mxu0 %v216_v18 }
 0x199   :  { %v6095_v26 = vpack.c.bf16 %v2116_v19, %v2115_v53  ;;  %v839_v0 = vadd.f32 %v5680_v22, %v838_v24  ;;  %4403 = vmatprep.mubr.f32.mxu0 %v217_v20  ;;  %v1628_v19 = vpop.f32.mrb[1].mxu1  ;;  %v1634_v53 = vadd.f32 %v6115_v43, %v4480_v13 }
 0x19a   :  { %v2118_v29 = vmax.f32 %v844_v23, 0.0  ;;  %v1629_v21 = vadd.f32 %v6115_v43, %v1628_v19 }
 0x19b   :  { %v2117_v30 = vmax.f32 %v839_v0, 0.0  ;;  %v4246_v63 = vpop.f32.mrb[82].mxu0  ;;  %v230_v0 = vld [vmem:[%s6861_s0 + $0x648] sm:$0xff] }
 0x19c   :  { %v854_v32 = vadd.f32 %v4246_v63, %v5680_v22  ;;  %v848_v33 = vpop.f32.mrb[83].mxu0  ;;  %4404 = vmatmul.mubr.f32.gmra.mrb[188].mxu0 %v218_v28 }
 0x19d   :  { %v4719_v35 = vpack.c.bf16 %v2118_v29, %v2117_v30  ;;  %v849_v38 = vadd.f32 %v5680_v22, %v848_v33  ;;  %4406 = vmatprep.mubr.f32.mxu0 %v219_v59  ;;  %v231_v29 = vld [vmem:[%s6861_s0 + $0x650] sm:$0xff]  ;;  %v2276_v59 = vmax.f32 %v1634_v53, 0.0  ;;  %v2275_v30 = vmax.f32 %v1629_v21, 0.0 }
 0x19e   :  { %v2120_v5 = vmax.f32 %v854_v32, 0.0 }
 0x19f   :  { %v2119_v8 = vmax.f32 %v849_v38, 0.0  ;;  %v4249_v41 = vpop.f32.mrb[84].mxu0  ;;  %4720 = vmatprep.subr.bf16.mxu1 %v4719_v35 }
 0x1a0   :  { %v864_v22 = vadd.f32 %v6115_v43, %v4249_v41  ;;  %v858_v46 = vpop.f32.mrb[85].mxu0  ;;  %4407 = vmatmul.mubr.f32.gmra.mrb[190].mxu0 %v220_v39  ;;  %4722 = vmatpush3.bf16.msra.mxu1 %v6016_v54  ;;  %v6166_v39 = vpack.c.bf16 %v2276_v59, %v2275_v30  ;;  %v232_v41 = vld [vmem:[%s6861_s0 + $0x658] sm:$0xff]  ;;  %v238_v59 = vld [vmem:[%s6861_s0 + $0x688] sm:$0xff] }
 0x1a1   :  { %v4723_v47 = vpack.c.bf16 %v2120_v5, %v2119_v8  ;;  %v859_v48 = vadd.f32 %v6115_v43, %v858_v46  ;;  %4409 = vmatprep.mubr.f32.mxu0 %v221_v40  ;;  %v2364_v30 = vld [vmem:[%s6862_s1 + $0x38] sm:$0xff] }
 0x1a2   :  { %v2122_v49 = vmax.f32 %v864_v22, 0.0 }
 0x1a3   :  { %v2121_v50 = vmax.f32 %v859_v48, 0.0  ;;  %v4252_v52 = vpop.f32.mrb[86].mxu0  ;;  %4724 = vmatprep.subr.bf16.mxu1 %v4723_v47  ;;  %v233_v47 = vld [vmem:[%s6861_s0 + $0x660] sm:$0xff] }
 0x1a4   :  { %v874_v55 = vadd.f32 %v6115_v43, %v4252_v52  ;;  %v868_v56 = vpop.f32.mrb[87].mxu0  ;;  %4410 = vmatmul.mubr.f32.gmra.mrb[192].mxu0 %v222_v15  ;;  %4726 = vmatpush3.bf16.msra.mxu1 %v6032_v31 }
 0x1a5   :  { %v4727_v54 = vpack.c.bf16 %v2122_v49, %v2121_v50  ;;  %v869_v57 = vadd.f32 %v6115_v43, %v868_v56  ;;  %4412 = vmatprep.mubr.f32.mxu0 %v223_v17 }
 0x1a6   :  { %v2124_v58 = vmax.f32 %v874_v55, 0.0 }
 0x1a7   :  { %v2123_v60 = vmax.f32 %v869_v57, 0.0  ;;  %v4255_v62 = vpop.f32.mrb[88].mxu0  ;;  %4728 = vmatprep.subr.bf16.mxu1 %v4727_v54 }
 0x1a8   :  { %v884_v37 = vadd.f32 %v6115_v43, %v4255_v62  ;;  %v878_v1 = vpop.f32.mrb[89].mxu0  ;;  %4413 = vmatmul.mubr.f32.gmra.mrb[194].mxu0 %v224_v25  ;;  %4730 = vmatpush3.bf16.msra.mxu1 %v6045_v42  ;;  %v235_v62 = vld [vmem:[%s6861_s0 + $0x670] sm:$0xff] }
 0x1a9   :  { %v4731_v31 = vpack.c.bf16 %v2124_v58, %v2123_v60  ;;  %v879_v2 = vadd.f32 %v6115_v43, %v878_v1  ;;  %4415 = vmatprep.mubr.f32.mxu0 %v225_v27  ;;  %v234_v58 = vld [vmem:[%s6861_s0 + $0x668] sm:$0xff] }
 0x1aa   :  { %v2126_v36 = vmax.f32 %v884_v37, 0.0 }
 0x1ab   :  { %v2125_v4 = vmax.f32 %v879_v2, 0.0  ;;  %v4258_v7 = vpop.f32.mrb[90].mxu0  ;;  %4732 = vmatprep.subr.bf16.mxu1 %v4731_v31 }
 0x1ac   :  { %v894_v9 = vadd.f32 %v6115_v43, %v4258_v7  ;;  %v888_v10 = vpop.f32.mrb[91].mxu0  ;;  %4416 = vmatmul.mubr.f32.gmra.mrb[196].mxu0 %v226_v34  ;;  %4734 = vmatpush3.bf16.msra.mxu1 %v6055_v51 }
 0x1ad   :  { %v4735_v42 = vpack.c.bf16 %v2126_v36, %v2125_v4  ;;  %v889_v11 = vadd.f32 %v6115_v43, %v888_v10  ;;  %4418 = vmatprep.mubr.f32.mxu0 %v227_v3  ;;  %v2361_v4 = vld [vmem:[%s6862_s1 + $0x20] sm:$0xff] }
 0x1ae   :  { %v2128_v45 = vmax.f32 %v894_v9, 0.0 }
 0x1af   :  { %v2127_v16 = vmax.f32 %v889_v11, 0.0  ;;  %v4261_v18 = vpop.f32.mrb[92].mxu0  ;;  %4736 = vmatprep.subr.bf16.mxu1 %v4735_v42  ;;  %v236_v11 = vld [vmem:[%s6861_s0 + $0x678] sm:$0xff] }
 0x1b0   :  { %v904_v51 = vadd.f32 %v6115_v43, %v4261_v18  ;;  %v898_v20 = vpop.f32.mrb[93].mxu0  ;;  %4419 = vmatmul.mubr.f32.gmra.mrb[198].mxu0 %v228_v44  ;;  %4738 = vmatpush3.bf16.msra.mxu1 %v6065_v61  ;;  %v4483_v61 = vpop.f32.mrb[2].mxu1 }
 0x1b1   :  { %v4739_v23 = vpack.c.bf16 %v2128_v45, %v2127_v16  ;;  %v899_v24 = vadd.f32 %v6115_v43, %v898_v20  ;;  %4421 = vmatprep.mubr.f32.mxu0 %v229_v12  ;;  %v1638_v33 = vpop.f32.mrb[3].mxu1  ;;  %v1644_v5 = vadd.f32 %v6115_v43, %v4483_v61  ;;  %v237_v12 = vld [vmem:[%s6861_s0 + $0x680] sm:$0xff] }
 0x1b2   :  { %v2130_v28 = vmax.f32 %v904_v51, 0.0  ;;  %v1639_v22 = vadd.f32 %v6115_v43, %v1638_v33  ;;  %v4486_v48 = vpop.f32.mrb[4].mxu1 }
 0x1b3   :  { %v2129_v63 = vmax.f32 %v899_v24, 0.0  ;;  %v4264_v32 = vpop.f32.mrb[94].mxu0  ;;  %4740 = vmatprep.subr.bf16.mxu1 %v4739_v23  ;;  %v1648_v50 = vpop.f32.mrb[5].mxu1  ;;  %v1654_v56 = vadd.f32 %v6115_v43, %v4486_v48  ;;  %v2381_v23 = vld [vmem:[%s6862_s1 + $0xc0] sm:$0x3] }
 0x1b4   :  { %v914_v35 = vadd.f32 %v6115_v43, %v4264_v32  ;;  %v908_v38 = vpop.f32.mrb[95].mxu0  ;;  %4422 = vmatmul.mubr.f32.gmra.mrb[200].mxu0 %v230_v0  ;;  %4742 = vmatpush3.bf16.msra.mxu1 %v6075_v6  ;;  %v2278_v6 = vmax.f32 %v1644_v5, 0.0  ;;  %v2277_v17 = vmax.f32 %v1639_v22, 0.0  ;;  %v1649_v54 = vadd.f32 %v6115_v43, %v1648_v50  ;;  %v4489_v1 = vpop.f32.mrb[6].mxu1  ;;  %v239_v32 = vld [vmem:[%s6861_s0 + $0x690] sm:$0xff]  ;;  %v241_v50 = vld [vmem:[%s6861_s0 + $0x6a0] sm:$0xff] }
 0x1b5   :  { %v4743_v40 = vpack.c.bf16 %v2130_v28, %v2129_v63  ;;  %v909_v8 = vadd.f32 %v6115_v43, %v908_v38  ;;  %4424 = vmatprep.mubr.f32.mxu0 %v231_v29  ;;  %v1658_v34 = vpop.f32.mrb[7].mxu1  ;;  %v1664_v9 = vadd.f32 %v6115_v43, %v4489_v1 }
 0x1b6   :  { %v2132_v46 = vmax.f32 %v914_v35, 0.0  ;;  %v6185_v27 = vpack.c.bf16 %v2278_v6, %v2277_v17  ;;  %v2279_v37 = vmax.f32 %v1649_v54, 0.0  ;;  %v1659_v44 = vadd.f32 %v6115_v43, %v1658_v34  ;;  %v4492_v16 = vpop.f32.mrb[8].mxu1 }
 0x1b7   :  { %v2131_v15 = vmax.f32 %v909_v8, 0.0  ;;  %v4267_v49 = vpop.f32.mrb[96].mxu0  ;;  %4744 = vmatprep.subr.bf16.mxu1 %v4743_v40  ;;  %v2282_v13 = vmax.f32 %v1664_v9, 0.0  ;;  %v1668_v20 = vpop.f32.mrb[9].mxu1  ;;  %v1674_v24 = vadd.f32 %v6115_v43, %v4492_v16 }
 0x1b8   :  { %v924_v52 = vadd.f32 %v6115_v43, %v4267_v49  ;;  %v918_v55 = vpop.f32.mrb[97].mxu0  ;;  %4425 = vmatmul.mubr.f32.gmra.mrb[202].mxu0 %v232_v41  ;;  %4746 = vmatpush3.bf16.msra.mxu1 %v6085_v14  ;;  %v2280_v14 = vmax.f32 %v1654_v56, 0.0  ;;  %v2281_v51 = vmax.f32 %v1659_v44, 0.0  ;;  %v1669_v0 = vadd.f32 %v6115_v43, %v1668_v20  ;;  %v4495_v38 = vpop.f32.mrb[10].mxu1 }
 0x1b9   :  { %v4747_v57 = vpack.c.bf16 %v2132_v46, %v2131_v15  ;;  %v919_v25 = vadd.f32 %v6115_v43, %v918_v55  ;;  %4427 = vmatprep.mubr.f32.mxu0 %v233_v47  ;;  %v2284_v33 = vmax.f32 %v1674_v24, 0.0  ;;  %v1678_v8 = vpop.f32.mrb[11].mxu1  ;;  %v1684_v47 = vadd.f32 %v6115_v43, %v4495_v38  ;;  %v240_v15 = vld [vmem:[%s6861_s0 + $0x698] sm:$0xff] }
 0x1ba   :  { %v2134_v60 = vmax.f32 %v924_v52, 0.0  ;;  %v6195_v7 = vpack.c.bf16 %v2280_v14, %v2279_v37  ;;  %v6226_v61 = vpack.c.bf16 %v2282_v13, %v2281_v51  ;;  %v2283_v35 = vmax.f32 %v1669_v0, 0.0  ;;  %v4498_v55 = vpop.f32.mrb[12].mxu1  ;;  %v244_v51 = vld [vmem:[%s6861_s0 + $0x6b8] sm:$0xff] }
 0x1bb   :  { %v2133_v31 = vmax.f32 %v919_v25, 0.0  ;;  %v4270_v2 = vpop.f32.mrb[98].mxu0  ;;  %4748 = vmatprep.subr.bf16.mxu1 %v4747_v57  ;;  %v1679_v49 = vadd.f32 %v6115_v43, %v1678_v8  ;;  %v2286_v52 = vmax.f32 %v1684_v47, 0.0  ;;  %v1688_v25 = vpop.f32.mrb[13].mxu1 }
 0x1bc   :  { %v934_v36 = vadd.f32 %v6115_v43, %v4270_v2  ;;  %v928_v3 = vpop.f32.mrb[99].mxu0  ;;  %4428 = vmatmul.mubr.f32.gmra.mrb[204].mxu0 %v234_v58  ;;  %4750 = vmatpush3.bf16.msra.mxu1 %v6095_v26  ;;  %v2382_v26 = vld [vmem:[%s6862_s1 + $0xc8] sm:$0x3]  ;;  %v6232_v46 = vpack.c.bf16 %v2284_v33, %v2283_v35  ;;  %v1689_v14 = vadd.f32 %v6115_v43, %v1688_v25  ;;  %v4501_v9 = vpop.f32.mrb[14].mxu1 }
 0x1bd   :  { %v6198_v10 = vpack.c.bf16 %v2134_v60, %v2133_v31  ;;  %v929_v42 = vadd.f32 %v6115_v43, %v928_v3  ;;  %4430 = vmatprep.mubr.f32.mxu0 %v235_v62  ;;  %v2285_v57 = vmax.f32 %v1679_v49, 0.0  ;;  %v1694_v62 = vadd.f32 %v6115_v43, %v4498_v55  ;;  %v242_v31 = vld [vmem:[%s6861_s0 + $0x6a8] sm:$0xff] }
 0x1be   :  { %v2136_v45 = vmax.f32 %v934_v36, 0.0  ;;  %v243_v36 = vld [vmem:[%s6861_s0 + $0x6b0] sm:$0xff]  ;;  %v1704_v13 = vadd.f32 %v6115_v43, %v4501_v9 }
 0x1bf   :  { %v2135_v18 = vmax.f32 %v929_v42, 0.0  ;;  %v4273_v19 = vpop.f32.mrb[100].mxu0  ;;  %2612 = vmatmul.mubr.f32.vlgmr.msra.gmra.mrb[90].mxu1 %v2361_v4  ;;  %v6254_v2 = vpack.c.bf16 %v2286_v52, %v2285_v57  ;;  %v2288_v3 = vmax.f32 %v1694_v62, 0.0  ;;  %v2287_v4 = vmax.f32 %v1689_v14, 0.0  ;;  %v249_v62 = vld [vmem:[%s6861_s0 + $0x6e0] sm:$0xff] }
 0x1c0   :  { %v944_v53 = vadd.f32 %v6115_v43, %v4273_v19  ;;  %v938_v21 = vpop.f32.mrb[101].mxu0  ;;  %4431 = vmatmul.mubr.f32.gmra.mrb[206].mxu0 %v236_v11  ;;  %2616 = vmatprep.mubr.f32.mxu1 %v2382_v26  ;;  %v1698_v26 = vpop.f32.mrb[15].mxu1 }
 0x1c1   :  { %v6217_v28 = vpack.c.bf16 %v2136_v45, %v2135_v18  ;;  %v939_v29 = vadd.f32 %v6115_v43, %v938_v21  ;;  %4433 = vmatprep.mubr.f32.mxu0 %v237_v12  ;;  %v6260_v12 = vpack.c.bf16 %v2288_v3, %v2287_v4  ;;  %v1699_v16 = vadd.f32 %v6115_v43, %v1698_v26  ;;  %v4504_v24 = vpop.f32.mrb[16].mxu1 }
 0x1c2   :  { %v2138_v63 = vmax.f32 %v944_v53, 0.0  ;;  %v245_v53 = vld [vmem:[%s6861_s0 + $0x6c0] sm:$0xff]  ;;  %v2290_v21 = vmax.f32 %v1704_v13, 0.0  ;;  %v1714_v33 = vadd.f32 %v6115_v43, %v4504_v24  ;;  %v250_v13 = vld [vmem:[%s6861_s0 + $0x6e8] sm:$0xff] }
 0x1c3   :  { %v2137_v5 = vmax.f32 %v939_v29, 0.0  ;;  %v4276_v40 = vpop.f32.mrb[102].mxu0  ;;  %2617 = vmatmul.mubr.f32.gmra.mrb[92].mxu1 %v2381_v23  ;;  %v2289_v23 = vmax.f32 %v1699_v16, 0.0 }
 0x1c4   :  { %v954_v41 = vadd.f32 %v6115_v43, %v4276_v40  ;;  %v948_v22 = vpop.f32.mrb[103].mxu0  ;;  %4434 = vmatmul.mubr.f32.gmra.mrb[208].mxu0 %v238_v59  ;;  %2686 = vmatprep.mubr.f32.mxu1 %v2364_v30  ;;  %v1708_v59 = vpop.f32.mrb[17].mxu1  ;;  %v246_v40 = vld [vmem:[%s6861_s0 + $0x6c8] sm:$0xff] }
 0x1c5   :  { %v6235_v6 = vpack.c.bf16 %v2138_v63, %v2137_v5  ;;  %v949_v48 = vadd.f32 %v6115_v43, %v948_v22  ;;  %4436 = vmatprep.mubr.f32.mxu0 %v239_v32  ;;  %v6274_v32 = vpack.c.bf16 %v2290_v21, %v2289_v23  ;;  %v1709_v35 = vadd.f32 %v6115_v43, %v1708_v59 }
 0x1c6   :  { %v2140_v17 = vmax.f32 %v954_v41, 0.0  ;;  %v247_v41 = vld [vmem:[%s6861_s0 + $0x6d0] sm:$0xff]  ;;  %v2292_v22 = vmax.f32 %v1714_v33, 0.0 }
 0x1c7   :  { %v2139_v56 = vmax.f32 %v949_v48, 0.0  ;;  %v4279_v54 = vpop.f32.mrb[104].mxu0  ;;  %v2291_v47 = vmax.f32 %v1709_v35, 0.0  ;;  %v4507_v48 = vpop.f32.mrb[18].mxu1 }
 0x1c8   :  { %v964_v58 = vadd.f32 %v6115_v43, %v4279_v54  ;;  %v958_v60 = vpop.f32.mrb[105].mxu0  ;;  %4437 = vmatmul.mubr.f32.gmra.mrb[210].mxu0 %v240_v15 }
 0x1c9   :  { %v6248_v37 = vpack.c.bf16 %v2140_v17, %v2139_v56  ;;  %v959_v1 = vadd.f32 %v6115_v43, %v958_v60  ;;  %4439 = vmatprep.mubr.f32.mxu0 %v241_v50  ;;  %v1718_v17 = vpop.f32.mrb[19].mxu1  ;;  %v6288_v55 = vpack.c.bf16 %v2292_v22, %v2291_v47  ;;  %v1724_v56 = vadd.f32 %v6115_v43, %v4507_v48 }
 0x1ca   :  { %v2142_v34 = vmax.f32 %v964_v58, 0.0  ;;  %v1719_v54 = vadd.f32 %v6115_v43, %v1718_v17  ;;  %v248_v58 = vld [vmem:[%s6861_s0 + $0x6d8] sm:$0xff] }
 0x1cb   :  { %v2141_v42 = vmax.f32 %v959_v1, 0.0  ;;  %v4282_v11 = vpop.f32.mrb[106].mxu0  ;;  %v2294_v14 = vmax.f32 %v1724_v56, 0.0 }
 0x1cc   :  { %v974_v44 = vadd.f32 %v6115_v43, %v4282_v11  ;;  %v968_v45 = vpop.f32.mrb[107].mxu0  ;;  %4440 = vmatmul.mubr.f32.gmra.mrb[212].mxu0 %v242_v31  ;;  %v2293_v1 = vmax.f32 %v1719_v54, 0.0  ;;  %v4510_v31 = vpop.f32.mrb[20].mxu1 }
 0x1cd   :  { %v6264_v18 = vpack.c.bf16 %v2142_v34, %v2141_v42  ;;  %v969_v19 = vadd.f32 %v6115_v43, %v968_v45  ;;  %4442 = vmatprep.mubr.f32.mxu0 %v243_v36  ;;  %v1728_v3 = vpop.f32.mrb[21].mxu1  ;;  %v1734_v11 = vadd.f32 %v6115_v43, %v4510_v31 }
 0x1ce   :  { %v2144_v20 = vmax.f32 %v974_v44, 0.0  ;;  %v6302_v42 = vpack.c.bf16 %v2294_v14, %v2293_v1  ;;  %v1729_v26 = vadd.f32 %v6115_v43, %v1728_v3  ;;  %v255_v14 = vld [vmem:[%s6861_s0 + $0x710] sm:$0xff] }
 0x1cf   :  { %v2143_v0 = vmax.f32 %v969_v19, 0.0  ;;  %v4285_v29 = vpop.f32.mrb[108].mxu0  ;;  %v251_v19 = vld [vmem:[%s6861_s0 + $0x6f0] sm:$0xff] }
 0x1d0   :  { %v984_v30 = vadd.f32 %v6115_v43, %v4285_v29  ;;  %v978_v63 = vpop.f32.mrb[109].mxu0  ;;  %4443 = vmatmul.mubr.f32.gmra.mrb[214].mxu0 %v244_v51  ;;  %v2296_v51 = vmax.f32 %v1734_v11, 0.0 }
 0x1d1   :  { %v6278_v38 = vpack.c.bf16 %v2144_v20, %v2143_v0  ;;  %v979_v5 = vadd.f32 %v6115_v43, %v978_v63  ;;  %4445 = vmatprep.mubr.f32.mxu0 %v245_v53  ;;  %v2295_v20 = vmax.f32 %v1729_v26, 0.0  ;;  %v4513_v53 = vpop.f32.mrb[22].mxu1 }
 0x1d2   :  { %v2146_v8 = vmax.f32 %v984_v30, 0.0  ;;  %v1738_v24 = vpop.f32.mrb[23].mxu1  ;;  %v1744_v30 = vadd.f32 %v6115_v43, %v4513_v53 }
 0x1d3   :  { %v2145_v15 = vmax.f32 %v979_v5, 0.0  ;;  %v4288_v49 = vpop.f32.mrb[110].mxu0  ;;  %v6316_v59 = vpack.c.bf16 %v2296_v51, %v2295_v20  ;;  %v1739_v63 = vadd.f32 %v6115_v43, %v1738_v24  ;;  %v252_v5 = vld [vmem:[%s6861_s0 + $0x6f8] sm:$0xff]  ;;  %v4516_v47 = vpop.f32.mrb[24].mxu1  ;;  %v257_v20 = vld [vmem:[%s6861_s0 + $0x720] sm:$0xff] }
 0x1d4   :  { %v994_v50 = vadd.f32 %v6115_v43, %v4288_v49  ;;  %v988_v52 = vpop.f32.mrb[111].mxu0  ;;  %4446 = vmatmul.mubr.f32.gmra.mrb[216].mxu0 %v246_v40  ;;  %v1748_v49 = vpop.f32.mrb[25].mxu1  ;;  %v1754_v56 = vadd.f32 %v6115_v43, %v4516_v47 }
 0x1d5   :  { %v6292_v57 = vpack.c.bf16 %v2146_v8, %v2145_v15  ;;  %v989_v25 = vadd.f32 %v6115_v43, %v988_v52  ;;  %4448 = vmatprep.mubr.f32.mxu0 %v247_v41  ;;  %v253_v8 = vld [vmem:[%s6861_s0 + $0x700] sm:$0xff]  ;;  %v2298_v41 = vmax.f32 %v1744_v30, 0.0  ;;  %v2297_v22 = vmax.f32 %v1739_v63, 0.0  ;;  %v4519_v1 = vpop.f32.mrb[26].mxu1 }
 0x1d6   :  { %v2148_v60 = vmax.f32 %v994_v50, 0.0  ;;  %v1758_v3 = vpop.f32.mrb[27].mxu1  ;;  %v1764_v11 = vadd.f32 %v6115_v43, %v4519_v1  ;;  %v261_v1 = vld [vmem:[%s6861_s0 + $0x740] sm:$0xff] }
 0x1d7   :  { %v2147_v34 = vmax.f32 %v989_v25, 0.0  ;;  %v4291_v36 = vpop.f32.mrb[112].mxu0  ;;  %v6329_v52 = vpack.c.bf16 %v2298_v41, %v2297_v22  ;;  %v1759_v26 = vadd.f32 %v6115_v43, %v1758_v3  ;;  %v259_v22 = vld [vmem:[%s6861_s0 + $0x730] sm:$0xff] }
 0x1d8   :  { %v1004_v4 = vadd.f32 %v6115_v43, %v4291_v36  ;;  %v998_v9 = vpop.f32.mrb[113].mxu0  ;;  %4449 = vmatmul.mubr.f32.gmra.mrb[218].mxu0 %v248_v58  ;;  %v254_v58 = vld [vmem:[%s6861_s0 + $0x708] sm:$0xff] }
 0x1d9   :  { %v6306_v44 = vpack.c.bf16 %v2148_v60, %v2147_v34  ;;  %v999_v45 = vadd.f32 %v6115_v43, %v998_v9  ;;  %4451 = vmatprep.mubr.f32.mxu0 %v249_v62  ;;  %v1749_v60 = vadd.f32 %v6115_v43, %v1748_v49  ;;  %v2301_v53 = vmax.f32 %v1759_v26, 0.0 }
 0x1da   :  { %v2150_v16 = vmax.f32 %v1004_v4, 0.0 }
 0x1db   :  { %v2149_v21 = vmax.f32 %v999_v45, 0.0  ;;  %v4294_v23 = vpop.f32.mrb[114].mxu0  ;;  %v2299_v36 = vmax.f32 %v1749_v60, 0.0 }
 0x1dc   :  { %v1014_v0 = vadd.f32 %v6115_v43, %v4294_v23  ;;  %v1008_v29 = vpop.f32.mrb[115].mxu0  ;;  %4452 = vmatmul.mubr.f32.gmra.mrb[220].mxu0 %v250_v13 }
 0x1dd   :  { %v4751_v33 = vpack.c.bf16 %v2150_v16, %v2149_v21  ;;  %v1009_v35 = vadd.f32 %v6115_v43, %v1008_v29  ;;  %4454 = vmatprep.mubr.f32.mxu0 %v251_v19  ;;  %v256_v16 = vld [vmem:[%s6861_s0 + $0x718] sm:$0xff]  ;;  %v4522_v21 = vpop.f32.mrb[28].mxu1 }
 0x1de   :  { %v2152_v40 = vmax.f32 %v1014_v0, 0.0  ;;  %v1768_v0 = vpop.f32.mrb[29].mxu1 }
 0x1df   :  { %v2151_v48 = vmax.f32 %v1009_v35, 0.0  ;;  %v4297_v15 = vpop.f32.mrb[116].mxu0  ;;  %4752 = vmatprep.subr.bf16.mxu1 %v4751_v33  ;;  %v1774_v33 = vadd.f32 %v6115_v43, %v4522_v21  ;;  %v4525_v47 = vpop.f32.mrb[30].mxu1 }
 0x1e0   :  { %v1024_v17 = vadd.f32 %v6115_v43, %v4297_v15  ;;  %v1018_v50 = vpop.f32.mrb[117].mxu0  ;;  %4455 = vmatmul.mubr.f32.gmra.mrb[222].mxu0 %v252_v5  ;;  %4754 = vmatpush3.bf16.msra.mxu1 %v6198_v10  ;;  %v2300_v10 = vmax.f32 %v1754_v56, 0.0 }
 0x1e1   :  { %v4755_v54 = vpack.c.bf16 %v2152_v40, %v2151_v48  ;;  %v1019_v25 = vadd.f32 %v6115_v43, %v1018_v50  ;;  %4457 = vmatprep.mubr.f32.mxu0 %v253_v8  ;;  %v258_v40 = vld [vmem:[%s6861_s0 + $0x728] sm:$0xff]  ;;  %v1769_v8 = vadd.f32 %v6115_v43, %v1768_v0 }
 0x1e2   :  { %v2154_v62 = vmax.f32 %v1024_v17, 0.0  ;;  %v6348_v19 = vpack.c.bf16 %v2300_v10, %v2299_v36  ;;  %v1778_v17 = vpop.f32.mrb[31].mxu1 }
 0x1e3   :  { %v2153_v31 = vmax.f32 %v1019_v25, 0.0  ;;  %v4300_v34 = vpop.f32.mrb[118].mxu0  ;;  %4756 = vmatprep.subr.bf16.mxu1 %v4755_v54  ;;  %v2303_v49 = vmax.f32 %v1769_v8, 0.0  ;;  %v1784_v54 = vadd.f32 %v6115_v43, %v4525_v47  ;;  %v1779_v25 = vadd.f32 %v6115_v43, %v1778_v17  ;;  %v265_v47 = vld [vmem:[%s6861_s0 + $0x760] sm:$0xff] }
 0x1e4   :  { %v1034_v4 = vadd.f32 %v6115_v43, %v4300_v34  ;;  %v1028_v9 = vpop.f32.mrb[119].mxu0  ;;  %4458 = vmatmul.mubr.f32.gmra.mrb[224].mxu0 %v254_v58  ;;  %4758 = vmatpush3.bf16.msra.mxu1 %v6217_v28  ;;  %v2302_v28 = vmax.f32 %v1764_v11, 0.0  ;;  %v4528_v34 = vpop.f32.mrb[32].mxu1 }
 0x1e5   :  { %v4759_v45 = vpack.c.bf16 %v2154_v62, %v2153_v31  ;;  %v1029_v13 = vadd.f32 %v6115_v43, %v1028_v9  ;;  %4460 = vmatprep.mubr.f32.mxu0 %v255_v14  ;;  %v260_v62 = vld [vmem:[%s6861_s0 + $0x738] sm:$0xff]  ;;  %v2305_v31 = vmax.f32 %v1779_v25, 0.0 }
 0x1e6   :  { %v2156_v51 = vmax.f32 %v1034_v4, 0.0  ;;  %v6355_v63 = vpack.c.bf16 %v2302_v28, %v2301_v53  ;;  %v1788_v4 = vpop.f32.mrb[33].mxu1  ;;  %v263_v53 = vld [vmem:[%s6861_s0 + $0x750] sm:$0xff] }
 0x1e7   :  { %v2155_v23 = vmax.f32 %v1029_v13, 0.0  ;;  %v4303_v24 = vpop.f32.mrb[120].mxu0  ;;  %4760 = vmatprep.subr.bf16.mxu1 %v4759_v45  ;;  %v1794_v45 = vadd.f32 %v6115_v43, %v4528_v34  ;;  %v4531_v21 = vpop.f32.mrb[34].mxu1 }
 0x1e8   :  { %v1044_v29 = vadd.f32 %v6115_v43, %v4303_v24  ;;  %v1038_v30 = vpop.f32.mrb[121].mxu0  ;;  %4461 = vmatmul.mubr.f32.gmra.mrb[226].mxu0 %v256_v16  ;;  %4762 = vmatpush3.bf16.msra.mxu1 %v6235_v6  ;;  %v2304_v6 = vmax.f32 %v1774_v33, 0.0 }
 0x1e9   :  { %v4763_v35 = vpack.c.bf16 %v2156_v51, %v2155_v23  ;;  %v1039_v5 = vadd.f32 %v6115_v43, %v1038_v30  ;;  %4463 = vmatprep.mubr.f32.mxu0 %v257_v20  ;;  %v262_v51 = vld [vmem:[%s6861_s0 + $0x748] sm:$0xff]  ;;  %v1789_v20 = vadd.f32 %v6115_v43, %v1788_v4 }
 0x1ea   :  { %v2158_v41 = vmax.f32 %v1044_v29, 0.0  ;;  %v6374_v14 = vpack.c.bf16 %v2304_v6, %v2303_v49  ;;  %v1798_v29 = vpop.f32.mrb[35].mxu1 }
 0x1eb   :  { %v2157_v48 = vmax.f32 %v1039_v5, 0.0  ;;  %v4306_v15 = vpop.f32.mrb[122].mxu0  ;;  %4764 = vmatprep.subr.bf16.mxu1 %v4763_v35  ;;  %v2307_v0 = vmax.f32 %v1789_v20, 0.0  ;;  %v1804_v35 = vadd.f32 %v6115_v43, %v4531_v21  ;;  %v1799_v5 = vadd.f32 %v6115_v43, %v1798_v29 }
 0x1ec   :  { %v1054_v50 = vadd.f32 %v6115_v43, %v4306_v15  ;;  %v1048_v56 = vpop.f32.mrb[123].mxu0  ;;  %4464 = vmatmul.mubr.f32.gmra.mrb[228].mxu0 %v258_v40  ;;  %4766 = vmatpush3.bf16.msra.mxu1 %v6248_v37  ;;  %v2306_v37 = vmax.f32 %v1784_v54, 0.0  ;;  %v4534_v15 = vpop.f32.mrb[36].mxu1 }
 0x1ed   :  { %v4767_v58 = vpack.c.bf16 %v2158_v41, %v2157_v48  ;;  %v1049_v60 = vadd.f32 %v6115_v43, %v1048_v56  ;;  %4466 = vmatprep.mubr.f32.mxu0 %v259_v22  ;;  %v264_v41 = vld [vmem:[%s6861_s0 + $0x758] sm:$0xff]  ;;  %v2309_v48 = vmax.f32 %v1799_v5, 0.0 }
 0x1ee   :  { %v2160_v10 = vmax.f32 %v1054_v50, 0.0  ;;  %v6381_v26 = vpack.c.bf16 %v2306_v37, %v2305_v31  ;;  %v1808_v50 = vpop.f32.mrb[37].mxu1 }
 0x1ef   :  { %v2159_v36 = vmax.f32 %v1049_v60, 0.0  ;;  %v4309_v3 = vpop.f32.mrb[124].mxu0  ;;  %4768 = vmatprep.subr.bf16.mxu1 %v4767_v58  ;;  %v1814_v58 = vadd.f32 %v6115_v43, %v4534_v15  ;;  %v4537_v34 = vpop.f32.mrb[38].mxu1 }
 0x1f0   :  { %v1064_v9 = vadd.f32 %v6115_v43, %v4309_v3  ;;  %v1058_v11 = vpop.f32.mrb[125].mxu0  ;;  %4467 = vmatmul.mubr.f32.gmra.mrb[230].mxu0 %v260_v62  ;;  %4770 = vmatpush3.bf16.msra.mxu1 %v6264_v18  ;;  %v2308_v18 = vmax.f32 %v1794_v45, 0.0  ;;  %v1818_v4 = vpop.f32.mrb[39].mxu1  ;;  %v2363_v45 = vld [vmem:[%s6862_s1 + $0x30] sm:$0xff] }
 0x1f1   :  { %v4771_v13 = vpack.c.bf16 %v2160_v10, %v2159_v36  ;;  %v1059_v16 = vadd.f32 %v6115_v43, %v1058_v11  ;;  %4469 = vmatprep.mubr.f32.mxu0 %v261_v1  ;;  %v266_v10 = vld [vmem:[%s6861_s0 + $0x768] sm:$0xff]  ;;  %v1809_v1 = vadd.f32 %v6115_v43, %v1808_v50  ;;  %v2312_v31 = vmax.f32 %v1814_v58, 0.0 }
 0x1f2   :  { %v2162_v28 = vmax.f32 %v1064_v9, 0.0  ;;  %v6400_v22 = vpack.c.bf16 %v2308_v18, %v2307_v0 }
 0x1f3   :  { %v2161_v23 = vmax.f32 %v1059_v16, 0.0  ;;  %v4312_v24 = vpop.f32.mrb[126].mxu0  ;;  %4772 = vmatprep.subr.bf16.mxu1 %v4771_v13  ;;  %v1824_v13 = vadd.f32 %v6115_v43, %v4537_v34  ;;  %v1819_v16 = vadd.f32 %v6115_v43, %v1818_v4 }
 0x1f4   :  { %v1074_v30 = vadd.f32 %v6115_v43, %v4312_v24  ;;  %v1068_v33 = vpop.f32.mrb[127].mxu0  ;;  %4470 = vmatmul.mubr.f32.gmra.mrb[232].mxu0 %v262_v51  ;;  %4774 = vmatpush3.bf16.msra.mxu1 %v6278_v38  ;;  %v2310_v38 = vmax.f32 %v1804_v35, 0.0  ;;  %v2383_v35 = vld [vmem:[%s6862_s1 + $0xd0] sm:$0x3] }
 0x1f5   :  { %v4775_v40 = vpack.c.bf16 %v2162_v28, %v2161_v23  ;;  %v1069_v8 = vadd.f32 %v6115_v43, %v1068_v33  ;;  %4472 = vmatprep.mubr.f32.mxu0 %v263_v53  ;;  %v2384_v28 = vld [vmem:[%s6862_s1 + $0xd8] sm:$0x3]  ;;  %v2313_v21 = vmax.f32 %v1819_v16, 0.0  ;;  %v4540_v23 = vpop.f32.mrb[40].mxu1 }
 0x1f6   :  { %v2164_v6 = vmax.f32 %v1074_v30, 0.0  ;;  %v6407_v25 = vpack.c.bf16 %v2310_v38, %v2309_v48  ;;  %v1828_v29 = vpop.f32.mrb[41].mxu1 }
 0x1f7   :  { %v2163_v49 = vmax.f32 %v1069_v8, 0.0  ;;  %v4315_v17 = vpop.f32.mrb[128].mxu0  ;;  %4776 = vmatprep.subr.bf16.mxu1 %v4775_v40  ;;  %v1834_v40 = vadd.f32 %v6115_v43, %v4540_v23  ;;  %v1829_v8 = vadd.f32 %v6115_v43, %v1828_v29 }
 0x1f8   :  { %v1084_v56 = vadd.f32 %v6115_v43, %v4315_v17  ;;  %v1078_v54 = vpop.f32.mrb[129].mxu0  ;;  %4473 = vmatmul.mubr.f32.gmra.mrb[234].mxu0 %v264_v41  ;;  %4778 = vmatpush3.bf16.msra.mxu1 %v6292_v57  ;;  %v2311_v57 = vmax.f32 %v1809_v1, 0.0 }
 0x1f9   :  { %v4779_v60 = vpack.c.bf16 %v2164_v6, %v2163_v49  ;;  %v1079_v62 = vadd.f32 %v6115_v43, %v1078_v54  ;;  %4475 = vmatprep.mubr.f32.mxu0 %v265_v47  ;;  %v2366_v47 = vld [vmem:[%s6862_s1 + $0x48] sm:$0xff]  ;;  %v2316_v48 = vmax.f32 %v1834_v40, 0.0  ;;  %v2315_v15 = vmax.f32 %v1829_v8, 0.0  ;;  %v4543_v49 = vpop.f32.mrb[42].mxu1 }
 0x1fa   :  { %v2166_v37 = vmax.f32 %v1084_v56, 0.0  ;;  %v6428_v53 = vpack.c.bf16 %v2312_v31, %v2311_v57  ;;  %v1838_v56 = vpop.f32.mrb[43].mxu1 }
 0x1fb   :  { %v2165_v36 = vmax.f32 %v1079_v62, 0.0  ;;  %v4318_v3 = vpop.f32.mrb[130].mxu0  ;;  %4780 = vmatprep.subr.bf16.mxu1 %v4779_v60  ;;  %v6445_v60 = vpack.c.bf16 %v2316_v48, %v2315_v15  ;;  %v1844_v62 = vadd.f32 %v6115_v43, %v4543_v49 }
 0x1fc   :  { %v1094_v9 = vadd.f32 %v6115_v43, %v4318_v3  ;;  %v1088_v11 = vpop.f32.mrb[131].mxu0  ;;  %4476 = vmatmul.mubr.f32.gmra.mrb[236].mxu0 %v266_v10  ;;  %4782 = vmatpush3.bf16.msra.mxu1 %v6306_v44  ;;  %v2314_v44 = vmax.f32 %v1824_v13, 0.0  ;;  %v1839_v10 = vadd.f32 %v6115_v43, %v1838_v56  ;;  %v4546_v3 = vpop.f32.mrb[44].mxu1 }
 0x1fd   :  { %v6422_v51 = vpack.c.bf16 %v2166_v37, %v2165_v36  ;;  %v1089_v20 = vadd.f32 %v6115_v43, %v1088_v11  ;;  %v2318_v34 = vmax.f32 %v1844_v62, 0.0  ;;  %v1854_v16 = vadd.f32 %v6115_v43, %v4546_v3 }
 0x1fe   :  { %v2168_v18 = vmax.f32 %v1094_v9, 0.0  ;;  %v6434_v5 = vpack.c.bf16 %v2314_v44, %v2313_v21  ;;  %v2317_v36 = vmax.f32 %v1839_v10, 0.0  ;;  %v1848_v9 = vpop.f32.mrb[45].mxu1 }
 0x1ff   :  { %v2167_v24 = vmax.f32 %v1089_v20, 0.0  ;;  %v4321_v0 = vpop.f32.mrb[132].mxu0  ;;  %2687 = vmatmul.mubr.f32.vlgmr.msra.gmra.mrb[94].mxu1 %v2363_v45  ;;  %v1849_v20 = vadd.f32 %v6115_v43, %v1848_v9  ;;  %v2320_v21 = vmax.f32 %v1854_v16, 0.0 }
 0x200   :  { %v1104_v30 = vadd.f32 %v6115_v43, %v4321_v0  ;;  %v1098_v33 = vpop.f32.mrb[133].mxu0  ;;  %2691 = vmatprep.mubr.f32.mxu1 %v2384_v28  ;;  %v6453_v13 = vpack.c.bf16 %v2318_v34, %v2317_v36 }
 0x201   :  { %v6438_v41 = vpack.c.bf16 %v2168_v18, %v2167_v24  ;;  %v1099_v6 = vadd.f32 %v6115_v43, %v1098_v33  ;;  %v2319_v23 = vmax.f32 %v1849_v20, 0.0  ;;  %v4549_v24 = vpop.f32.mrb[46].mxu1  ;;  %v6479_v20 = vld [vmem:[%s6863_s3] ss:$0 sm:$0xff] }
 0x202   :  { %v2170_v38 = vmax.f32 %v1104_v30, 0.0  ;;  %v1858_v30 = vpop.f32.mrb[47].mxu1  ;;  %v1864_v8 = vadd.f32 %v6115_v43, %v4549_v24 }
 0x203   :  { %v2169_v17 = vmax.f32 %v1099_v6, 0.0  ;;  %v4324_v50 = vpop.f32.mrb[134].mxu0  ;;  %2692 = vmatmul.mubr.f32.gmra.mrb[96].mxu1 %v2383_v35  ;;  %v6461_v40 = vpack.c.bf16 %v2320_v21, %v2319_v23  ;;  %v1859_v6 = vadd.f32 %v6115_v43, %v1858_v30 }
 0x204   :  { %v1114_v54 = vadd.f32 %v6115_v43, %v4324_v50  ;;  %v1108_v58 = vpop.f32.mrb[135].mxu0  ;;  %2761 = vmatprep.mubr.f32.mxu1 %v2366_v47  ;;  %v2322_v15 = vmax.f32 %v1864_v8, 0.0 }
 0x205   :  { %v6449_v1 = vpack.c.bf16 %v2170_v38, %v2169_v17  ;;  %v1109_v37 = vadd.f32 %v6115_v43, %v1108_v58  ;;  %v2321_v49 = vmax.f32 %v1859_v6, 0.0  ;;  %v4552_v17 = vpop.f32.mrb[48].mxu1 }
 0x206   :  { %v2172_v31 = vmax.f32 %v1114_v54, 0.0  ;;  %v1868_v54 = vpop.f32.mrb[49].mxu1 }
 0x207   :  { %v2171_v57 = vmax.f32 %v1109_v37, 0.0  ;;  %v4327_v4 = vpop.f32.mrb[136].mxu0  ;;  %v6469_v10 = vpack.c.bf16 %v2322_v15, %v2321_v49  ;;  %v1874_v37 = vadd.f32 %v6115_v43, %v4552_v17  ;;  %v4555_v9 = vpop.f32.mrb[50].mxu1 }
 0x208   :  { %v1124_v11 = vadd.f32 %v6115_v43, %v4327_v4  ;;  %v1118_v45 = vpop.f32.mrb[137].mxu0  ;;  %v1878_v16 = vpop.f32.mrb[51].mxu1  ;;  %v1884_v23 = vadd.f32 %v6479_v20, %v4555_v9 }
 0x209   :  { %v6457_v28 = vpack.c.bf16 %v2172_v31, %v2171_v57  ;;  %v1119_v18 = vadd.f32 %v6115_v43, %v1118_v45  ;;  %v1869_v31 = vadd.f32 %v6115_v43, %v1868_v54  ;;  %v2324_v57 = vmax.f32 %v1874_v37, 0.0 }
 0x20a   :  { %v2174_v44 = vmax.f32 %v1124_v11, 0.0  ;;  %v2326_v30 = vmax.f32 %v1884_v23, 0.0 }
 0x20b   :  { %v2173_v0 = vmax.f32 %v1119_v18, 0.0  ;;  %v4330_v29 = vpop.f32.mrb[138].mxu0  ;;  %v2323_v4 = vmax.f32 %v1869_v31, 0.0 }
 0x20c   :  { %v1134_v33 = vadd.f32 %v6115_v43, %v4330_v29  ;;  %v1128_v35 = vpop.f32.mrb[139].mxu0 }
 0x20d   :  { %v6465_v47 = vpack.c.bf16 %v2174_v44, %v2173_v0  ;;  %v1129_v38 = vadd.f32 %v6115_v43, %v1128_v35  ;;  %v6482_v21 = vpack.c.bf16 %v2324_v57, %v2323_v4  ;;  %v4558_v35 = vpop.f32.mrb[52].mxu1 }
 0x20e   :  { %v2176_v48 = vmax.f32 %v1134_v33, 0.0  ;;  %v1894_v17 = vadd.f32 %v6479_v20, %v4558_v35 }
 0x20f   :  { %v2175_v50 = vmax.f32 %v1129_v38, 0.0  ;;  %v4333_v56 = vpop.f32.mrb[140].mxu0  ;;  %v1888_v38 = vpop.f32.mrb[53].mxu1 }
 0x210   :  { %v1144_v58 = vadd.f32 %v6115_v43, %v4333_v56  ;;  %v1138_v62 = vpop.f32.mrb[141].mxu0  ;;  %v4561_v31 = vpop.f32.mrb[54].mxu1 }
 0x211   :  { %v6473_v34 = vpack.c.bf16 %v2176_v48, %v2175_v50  ;;  %v1139_v36 = vadd.f32 %v6115_v43, %v1138_v62  ;;  %v1879_v43 = vadd.f32 %v6479_v20, %v1878_v16  ;;  %v1889_v50 = vadd.f32 %v6479_v20, %v1888_v38  ;;  %v1898_v57 = vpop.f32.mrb[55].mxu1 }
 0x212   :  { %v2178_v3 = vmax.f32 %v1144_v58, 0.0  ;;  %v2328_v62 = vmax.f32 %v1894_v17, 0.0  ;;  %v1899_v16 = vadd.f32 %v6479_v20, %v1898_v57 }
 0x213   :  { %v2177_v11 = vmax.f32 %v1139_v36, 0.0  ;;  %v4336_v45 = vpop.f32.mrb[142].mxu0  ;;  %v2325_v33 = vmax.f32 %v1879_v43, 0.0  ;;  %v2327_v37 = vmax.f32 %v1889_v50, 0.0 }
 0x214   :  { %v1154_v18 = vadd.f32 %v6479_v20, %v4336_v45  ;;  %v1148_v44 = vpop.f32.mrb[143].mxu0  ;;  %v1904_v45 = vadd.f32 %v6479_v20, %v4561_v31 }
 0x215   :  { %v6486_v24 = vpack.c.bf16 %v2178_v3, %v2177_v11  ;;  %v1149_v0 = vadd.f32 %v6479_v20, %v1148_v44  ;;  %v6490_v49 = vpack.c.bf16 %v2326_v30, %v2325_v33  ;;  %v6498_v11 = vpack.c.bf16 %v2328_v62, %v2327_v37 }
 0x216   :  { %v2180_v29 = vmax.f32 %v1154_v18, 0.0  ;;  %v2330_v43 = vmax.f32 %v1904_v45, 0.0 }
 0x217   :  { %v2179_v8 = vmax.f32 %v1149_v0, 0.0  ;;  %v4339_v6 = vpop.f32.mrb[144].mxu0  ;;  %v2329_v0 = vmax.f32 %v1899_v16, 0.0 }
 0x218   :  { %v1164_v48 = vadd.f32 %v6479_v20, %v4339_v6  ;;  %v1158_v15 = vpop.f32.mrb[145].mxu0 }
 0x219   :  { %v6494_v56 = vpack.c.bf16 %v2180_v29, %v2179_v8  ;;  %v1159_v54 = vadd.f32 %v6479_v20, %v1158_v15  ;;  %v4564_v29 = vpop.f32.mrb[56].mxu1  ;;  %v6505_v38 = vpack.c.bf16 %v2330_v43, %v2329_v0 }
 0x21a   :  { %v2182_v58 = vmax.f32 %v1164_v48, 0.0  ;;  %v1908_v35 = vpop.f32.mrb[57].mxu1  ;;  %v1914_v48 = vadd.f32 %v6479_v20, %v4564_v29 }
 0x21b   :  { %v2181_v36 = vmax.f32 %v1159_v54, 0.0  ;;  %v4342_v3 = vpop.f32.mrb[146].mxu0  ;;  %v1909_v15 = vadd.f32 %v6479_v20, %v1908_v35  ;;  %v4567_v37 = vpop.f32.mrb[58].mxu1 }
 0x21c   :  { %v1174_v4 = vadd.f32 %v6479_v20, %v4342_v3  ;;  %v1168_v9 = vpop.f32.mrb[147].mxu0  ;;  %v1918_v3 = vpop.f32.mrb[59].mxu1 }
 0x21d   :  { %v4783_v18 = vpack.c.bf16 %v2182_v58, %v2181_v36  ;;  %v1169_v44 = vadd.f32 %v6479_v20, %v1168_v9  ;;  %v2332_v58 = vmax.f32 %v1914_v48, 0.0  ;;  %v2331_v62 = vmax.f32 %v1909_v15, 0.0  ;;  %v4570_v0 = vpop.f32.mrb[60].mxu1 }
 0x21e   :  { %v2184_v23 = vmax.f32 %v1174_v4, 0.0  ;;  %v1924_v9 = vadd.f32 %v6479_v20, %v4567_v37  ;;  %v1919_v45 = vadd.f32 %v6479_v20, %v1918_v3 }
 0x21f   :  { %v2183_v30 = vmax.f32 %v1169_v44, 0.0  ;;  %v4345_v33 = vpop.f32.mrb[148].mxu0  ;;  %4784 = vmatprep.subr.bf16.mxu1 %v4783_v18  ;;  %v6512_v4 = vpack.c.bf16 %v2332_v58, %v2331_v62 }
 0x220   :  { %v1184_v8 = vadd.f32 %v6479_v20, %v4345_v33  ;;  %v1178_v6 = vpop.f32.mrb[149].mxu0  ;;  %4786 = vmatpush3.bf16.msra.mxu1 %v6422_v51  ;;  %v2333_v43 = vmax.f32 %v1919_v45, 0.0  ;;  %v1928_v33 = vpop.f32.mrb[61].mxu1 }
 0x221   :  { %v4787_v17 = vpack.c.bf16 %v2184_v23, %v2183_v30  ;;  %v1179_v50 = vadd.f32 %v6479_v20, %v1178_v6  ;;  %v2334_v23 = vmax.f32 %v1924_v9, 0.0  ;;  %v1934_v6 = vadd.f32 %v6479_v20, %v4570_v0  ;;  %v4573_v62 = vpop.f32.mrb[62].mxu1 }
 0x222   :  { %v2186_v54 = vmax.f32 %v1184_v8, 0.0  ;;  %v1929_v48 = vadd.f32 %v6479_v20, %v1928_v33 }
 0x223   :  { %v2185_v31 = vmax.f32 %v1179_v50, 0.0  ;;  %v4348_v36 = vpop.f32.mrb[150].mxu0  ;;  %4788 = vmatprep.subr.bf16.mxu1 %v4787_v17  ;;  %v6519_v8 = vpack.c.bf16 %v2334_v23, %v2333_v43 }
 0x224   :  { %v1194_v57 = vadd.f32 %v6479_v20, %v4348_v36  ;;  %v1188_v51 = vpop.f32.mrb[151].mxu0  ;;  %4790 = vmatpush3.bf16.msra.mxu1 %v6438_v41  ;;  %v2335_v58 = vmax.f32 %v1929_v48, 0.0  ;;  %v1938_v36 = vpop.f32.mrb[63].mxu1 }
 0x225   :  { %v4791_v16 = vpack.c.bf16 %v2186_v54, %v2185_v31  ;;  %v1189_v18 = vadd.f32 %v6479_v20, %v1188_v51  ;;  %6869 = vst [vmem:[#allocation2_spill] sm:$0xff] %v6519_v8  ;;  %v2336_v54 = vmax.f32 %v1934_v6, 0.0  ;;  %v1944_v51 = vadd.f32 %v6479_v20, %v4573_v62  ;;  %v4576_v43 = vpop.f32.mrb[64].mxu1 }
 0x226   :  { %v2188_v44 = vmax.f32 %v1194_v57, 0.0  ;;  %v1939_v9 = vadd.f32 %v6479_v20, %v1938_v36 }
 0x227   :  { %v2187_v29 = vmax.f32 %v1189_v18, 0.0  ;;  %v4351_v30 = vpop.f32.mrb[152].mxu0  ;;  %4792 = vmatprep.subr.bf16.mxu1 %v4791_v16  ;;  %v6526_v57 = vpack.c.bf16 %v2336_v54, %v2335_v58 }
 0x228   :  { %v1204_v35 = vadd.f32 %v6479_v20, %v4351_v30  ;;  %v1198_v41 = vpop.f32.mrb[153].mxu0  ;;  %4794 = vmatpush3.bf16.msra.mxu1 %v6449_v1  ;;  %v2337_v23 = vmax.f32 %v1939_v9, 0.0  ;;  %v1948_v30 = vpop.f32.mrb[65].mxu1 }
 0x229   :  { %v4795_v15 = vpack.c.bf16 %v2188_v44, %v2187_v29  ;;  %v1199_v17 = vadd.f32 %v6479_v20, %v1198_v41  ;;  %6870 = vst [vmem:[#allocation3_spill] sm:$0xff] %v6526_v57  ;;  %v2338_v44 = vmax.f32 %v1944_v51, 0.0  ;;  %v1954_v41 = vadd.f32 %v6479_v20, %v4576_v43  ;;  %v4579_v58 = vpop.f32.mrb[66].mxu1 }
 0x22a   :  { %v2190_v50 = vmax.f32 %v1204_v35, 0.0  ;;  %v1949_v6 = vadd.f32 %v6479_v20, %v1948_v30 }
 0x22b   :  { %v2189_v37 = vmax.f32 %v1199_v17, 0.0  ;;  %v4354_v31 = vpop.f32.mrb[154].mxu0  ;;  %4796 = vmatprep.subr.bf16.mxu1 %v4795_v15  ;;  %v6533_v35 = vpack.c.bf16 %v2338_v44, %v2337_v23 }
 0x22c   :  { %v1214_v3 = vadd.f32 %v6479_v20, %v4354_v31  ;;  %v1208_v1 = vpop.f32.mrb[155].mxu0  ;;  %4798 = vmatpush3.bf16.msra.mxu1 %v6457_v28  ;;  %v2339_v54 = vmax.f32 %v1949_v6, 0.0  ;;  %v1958_v31 = vpop.f32.mrb[67].mxu1 }
 0x22d   :  { %v4799_v45 = vpack.c.bf16 %v2190_v50, %v2189_v37  ;;  %v1209_v16 = vadd.f32 %v6479_v20, %v1208_v1  ;;  %6871 = vst [vmem:[#allocation4_spill] sm:$0xff] %v6533_v35  ;;  %v2340_v50 = vmax.f32 %v1954_v41, 0.0  ;;  %v1964_v1 = vadd.f32 %v6479_v20, %v4579_v58  ;;  %v4582_v23 = vpop.f32.mrb[68].mxu1 }
 0x22e   :  { %v2192_v18 = vmax.f32 %v1214_v3, 0.0  ;;  %v1959_v51 = vadd.f32 %v6479_v20, %v1958_v31 }
 0x22f   :  { %v2191_v0 = vmax.f32 %v1209_v16, 0.0  ;;  %v4357_v29 = vpop.f32.mrb[156].mxu0  ;;  %4800 = vmatprep.subr.bf16.mxu1 %v4799_v45  ;;  %v6540_v3 = vpack.c.bf16 %v2340_v50, %v2339_v54 }
 0x230   :  { %v1224_v33 = vadd.f32 %v6479_v20, %v4357_v29  ;;  %v1218_v28 = vpop.f32.mrb[157].mxu0  ;;  %4802 = vmatpush3.bf16.msra.mxu1 %v6465_v47  ;;  %v2341_v44 = vmax.f32 %v1959_v51, 0.0  ;;  %v1968_v29 = vpop.f32.mrb[69].mxu1 }
 0x231   :  { %v4803_v48 = vpack.c.bf16 %v2192_v18, %v2191_v0  ;;  %v1219_v15 = vadd.f32 %v6479_v20, %v1218_v28  ;;  %6872 = vst [vmem:[#allocation5_spill] sm:$0xff] %v6540_v3  ;;  %v2342_v18 = vmax.f32 %v1964_v1, 0.0  ;;  %v1974_v28 = vadd.f32 %v6479_v20, %v4582_v23  ;;  %v4585_v54 = vpop.f32.mrb[70].mxu1 }
 0x232   :  { %v2194_v17 = vmax.f32 %v1224_v33, 0.0  ;;  %v1969_v41 = vadd.f32 %v6479_v20, %v1968_v29  ;;  %v1984_v1 = vadd.f32 %v6479_v20, %v4585_v54 }
 0x233   :  { %v2193_v62 = vmax.f32 %v1219_v15, 0.0  ;;  %v4360_v37 = vpop.f32.mrb[158].mxu0  ;;  %4804 = vmatprep.subr.bf16.mxu1 %v4803_v48  ;;  %v6547_v33 = vpack.c.bf16 %v2342_v18, %v2341_v44 }
 0x234   :  { %v1234_v36 = vadd.f32 %v6479_v20, %v4360_v37  ;;  %v1228_v47 = vpop.f32.mrb[159].mxu0  ;;  %4806 = vmatpush3.bf16.msra.mxu1 %v6473_v34  ;;  %v2343_v50 = vmax.f32 %v1969_v41, 0.0  ;;  %v1978_v37 = vpop.f32.mrb[71].mxu1 }
 0x235   :  { %v4807_v9 = vpack.c.bf16 %v2194_v17, %v2193_v62  ;;  %v1229_v45 = vadd.f32 %v6479_v20, %v1228_v47  ;;  %v2344_v17 = vmax.f32 %v1974_v28, 0.0  ;;  %v1979_v51 = vadd.f32 %v6479_v20, %v1978_v37  ;;  %v4588_v23 = vpop.f32.mrb[72].mxu1  ;;  %v2385_v28 = vld [vmem:[%s6862_s1 + $0xe0] sm:$0x3] }
 0x236   :  { %v2196_v16 = vmax.f32 %v1234_v36, 0.0  ;;  %v2365_v36 = vld [vmem:[%s6862_s1 + $0x40] sm:$0xff]  ;;  %v1988_v29 = vpop.f32.mrb[73].mxu1 }
 0x237   :  { %v2195_v43 = vmax.f32 %v1229_v45, 0.0  ;;  %v4363_v0 = vpop.f32.mrb[160].mxu0  ;;  %4808 = vmatprep.subr.bf16.mxu1 %v4807_v9  ;;  %v6557_v47 = vpack.c.bf16 %v2344_v17, %v2343_v50  ;;  %v2345_v44 = vmax.f32 %v1979_v51, 0.0  ;;  %v2368_v50 = vld [vmem:[%s6862_s1 + $0x58] sm:$0xff]  ;;  %v4591_v37 = vpop.f32.mrb[74].mxu1 }
 0x238   :  { %v1244_v30 = vadd.f32 %v6479_v20, %v4363_v0  ;;  %v1238_v34 = vpop.f32.mrb[161].mxu0  ;;  %4810 = vmatpush3.bf16.msra.mxu1 %v6486_v24 }
 0x239   :  { %v4811_v6 = vpack.c.bf16 %v2196_v16, %v2195_v43  ;;  %v1239_v48 = vadd.f32 %v6479_v20, %v1238_v34  ;;  %v2386_v16 = vld [vmem:[%s6862_s1 + $0xe8] sm:$0x3] }
 0x23a   :  { %v2198_v15 = vmax.f32 %v1244_v30, 0.0 }
 0x23b   :  { %v2197_v58 = vmax.f32 %v1239_v48, 0.0  ;;  %v4366_v62 = vpop.f32.mrb[162].mxu0  ;;  %4812 = vmatprep.subr.bf16.mxu1 %v4811_v6  ;;  %v1994_v6 = vadd.f32 %v6479_v20, %v4588_v23  ;;  %v1989_v48 = vadd.f32 %v6479_v20, %v1988_v29 }
 0x23c   :  { %v1254_v31 = vadd.f32 %v6479_v20, %v4366_v62  ;;  %v1248_v24 = vpop.f32.mrb[163].mxu0  ;;  %4814 = vmatpush3.bf16.msra.mxu1 %v6494_v56  ;;  %v2346_v56 = vmax.f32 %v1984_v1, 0.0 }
 0x23d   :  { %v6561_v9 = vpack.c.bf16 %v2198_v15, %v2197_v58  ;;  %v1249_v45 = vadd.f32 %v6479_v20, %v1248_v24  ;;  %v2348_v58 = vmax.f32 %v1994_v6, 0.0  ;;  %v2347_v62 = vmax.f32 %v1989_v48, 0.0 }
 0x23e   :  { %v2200_v18 = vmax.f32 %v1254_v31, 0.0  ;;  %v6571_v41 = vpack.c.bf16 %v2346_v56, %v2345_v44 }
 0x23f   :  { %v2199_v43 = vmax.f32 %v1249_v45, 0.0  ;;  %v4369_v0 = vpop.f32.mrb[164].mxu0  ;;  %2762 = vmatmul.mubr.f32.vlgmr.msra.gmra.mrb[98].mxu1 %v2365_v36  ;;  %v1998_v36 = vpop.f32.mrb[75].mxu1  ;;  %v6582_v45 = vpack.c.bf16 %v2348_v58, %v2347_v62 }
 0x240   :  { %v1264_v30 = vadd.f32 %v6479_v20, %v4369_v0  ;;  %v1258_v34 = vpop.f32.mrb[165].mxu0  ;;  %2766 = vmatprep.mubr.f32.mxu1 %v2386_v16  ;;  %v2004_v16 = vadd.f32 %v6479_v20, %v4591_v37  ;;  %v4594_v56 = vpop.f32.mrb[76].mxu1 }
 0x241   :  { %v6575_v15 = vpack.c.bf16 %v2200_v18, %v2199_v43  ;;  %v1259_v17 = vadd.f32 %v6479_v20, %v1258_v34  ;;  %v1999_v18 = vadd.f32 %v6479_v20, %v1998_v36  ;;  %v2008_v43 = vpop.f32.mrb[77].mxu1  ;;  %v2014_v62 = vadd.f32 %v6479_v20, %v4594_v56 }
 0x242   :  { %v2202_v54 = vmax.f32 %v1264_v30, 0.0  ;;  %v2350_v29 = vmax.f32 %v2004_v16, 0.0  ;;  %v4597_v34 = vpop.f32.mrb[78].mxu1 }
 0x243   :  { %v2201_v31 = vmax.f32 %v1259_v17, 0.0  ;;  %v4372_v24 = vpop.f32.mrb[166].mxu0  ;;  %2767 = vmatmul.mubr.f32.gmra.mrb[100].mxu1 %v2385_v28  ;;  %v2349_v30 = vmax.f32 %v1999_v18, 0.0  ;;  %v2018_v48 = vpop.f32.mrb[79].mxu1  ;;  %v2024_v36 = vadd.f32 %v6479_v20, %v4597_v34  ;;  %v2352_v16 = vmax.f32 %v2014_v62, 0.0 }
 0x244   :  { %v1274_v1 = vadd.f32 %v6479_v20, %v4372_v24  ;;  %v1268_v51 = vpop.f32.mrb[167].mxu0  ;;  %2836 = vmatprep.mubr.f32.mxu1 %v2368_v50  ;;  %v4600_v37 = vpop.f32.mrb[80].mxu1 }
 0x245   :  { %v6586_v44 = vpack.c.bf16 %v2202_v54, %v2201_v31  ;;  %v1269_v23 = vadd.f32 %v6479_v20, %v1268_v51  ;;  %v6590_v58 = vpack.c.bf16 %v2350_v29, %v2349_v30  ;;  %v2009_v54 = vadd.f32 %v6479_v20, %v2008_v43 }
 0x246   :  { %v2204_v0 = vmax.f32 %v1274_v1, 0.0  ;;  %v2028_v1 = vpop.f32.mrb[81].mxu1  ;;  %v2354_v3 = vmax.f32 %v2024_v36, 0.0 }
 0x247   :  { %v2203_v28 = vmax.f32 %v1269_v23, 0.0  ;;  %v4375_v6 = vpop.f32.mrb[168].mxu0  ;;  %6873 = vst [vmem:[#allocation6_spill] sm:$0xff] %v6590_v58  ;;  %v2351_v18 = vmax.f32 %v2009_v54, 0.0  ;;  %v2019_v23 = vadd.f32 %v6479_v20, %v2018_v48  ;;  %v2029_v48 = vadd.f32 %v6479_v20, %v2028_v1 }
 0x248   :  { %v1284_v17 = vadd.f32 %v6479_v20, %v4375_v6  ;;  %v1278_v50 = vpop.f32.mrb[169].mxu0  ;;  %v3729_v6 = vpop.f32.mrb[82].mxu1 }
 0x249   :  { %v6594_v31 = vpack.c.bf16 %v2204_v0, %v2203_v28  ;;  %v1279_v24 = vadd.f32 %v6479_v20, %v1278_v50  ;;  %v3730_v56 = vpop.f32.mrb[83].mxu1  ;;  %v6600_v0 = vpack.c.bf16 %v2352_v16, %v2351_v18  ;;  %v2353_v28 = vmax.f32 %v2019_v23, 0.0 }
 0x24a   :  { %v2206_v51 = vmax.f32 %v1284_v17, 0.0  ;;  %v3732_v50 = vpop.f32.mrb[84].mxu1  ;;  %v2034_v17 = vadd.f32 %v6479_v20, %v4600_v37  ;;  %v3731_v36 = vadd.f32 %v3730_v56, %v3729_v6  ;;  %v2355_v16 = vmax.f32 %v2029_v48, 0.0 }
 0x24b   :  { %v2205_v29 = vmax.f32 %v1279_v24, 0.0  ;;  %v4378_v30 = vpop.f32.mrb[170].mxu0  ;;  %6874 = vst [vmem:[#allocation7_spill] sm:$0xff] %v6600_v0  ;;  %v3733_v62 = vpop.f32.mrb[85].mxu1  ;;  %v6607_v24 = vpack.c.bf16 %v2354_v3, %v2353_v28 }
 0x24c   :  { %v1294_v43 = vadd.f32 %v6479_v20, %v4378_v30  ;;  %v1288_v35 = vpop.f32.mrb[171].mxu0  ;;  %v2356_v58 = vmax.f32 %v2034_v17, 0.0  ;;  %v3734_v37 = vadd.f32 %v3733_v62, %v3732_v50 }
 0x24d   :  { %v6602_v57 = vpack.c.bf16 %v2206_v51, %v2205_v29  ;;  %v1289_v34 = vadd.f32 %v6479_v20, %v1288_v35 }
 0x24e   :  { %v2208_v54 = vmax.f32 %v1294_v43, 0.0  ;;  %v6613_v29 = vpack.c.bf16 %v2356_v58, %v2355_v16 }
 0x24f   :  { %v2207_v8 = vmax.f32 %v1289_v34, 0.0  ;;  %v4381_v30 = vpop.f32.mrb[172].mxu0 }
 0x250   :  { %v1304_v18 = vadd.f32 %v6479_v20, %v4381_v30  ;;  %v1298_v23 = vpop.f32.mrb[173].mxu0  ;;  %6875 = vst [vmem:[#allocation8_spill] sm:$0xff] %v6613_v29 }
 0x251   :  { %v6610_v51 = vpack.c.bf16 %v2208_v54, %v2207_v8  ;;  %v1299_v35 = vadd.f32 %v6479_v20, %v1298_v23 }
 0x252   :  { %v2210_v1 = vmax.f32 %v1304_v18, 0.0  ;;  %v3767_v0 = vpop.f32.mrb[86].mxu1 }
 0x253   :  { %v2209_v43 = vmax.f32 %v1299_v35, 0.0  ;;  %v4384_v3 = vpop.f32.mrb[174].mxu0  ;;  %v3768_v28 = vpop.f32.mrb[87].mxu1 }
 0x254   :  { %v1314_v6 = vadd.f32 %v6479_v20, %v4384_v3  ;;  %v1308_v56 = vpop.f32.mrb[175].mxu0  ;;  %v3769_v34 = vadd.f32 %v3768_v28, %v3767_v0 }
 0x255   :  { %v6616_v17 = vpack.c.bf16 %v2210_v1, %v2209_v43  ;;  %v1309_v48 = vadd.f32 %v6479_v20, %v1308_v56 }
 0x256   :  { %v2212_v8 = vmax.f32 %v1314_v6, 0.0  ;;  %v6619_v54 = vadd.f32 %v3769_v34, %v3731_v36  ;;  %v3770_v30 = vpop.f32.mrb[88].mxu1 }
 0x257   :  { %v2211_v58 = vmax.f32 %v1309_v48, 0.0  ;;  %v4387_v16 = vpop.f32.mrb[176].mxu0  ;;  %v3771_v50 = vpop.f32.mrb[89].mxu1 }
 0x258   :  { %v1324_v62 = vadd.f32 %v6479_v20, %v4387_v16  ;;  %v1318_v18 = vpop.f32.mrb[177].mxu0  ;;  %v3772_v23 = vadd.f32 %v3771_v50, %v3770_v30 }
 0x259   :  { %v6622_v35 = vpack.c.bf16 %v2212_v8, %v2211_v58  ;;  %v1319_v3 = vadd.f32 %v6479_v20, %v1318_v18 }
 0x25a   :  { %v2214_v0 = vmax.f32 %v1324_v62, 0.0  ;;  %v6625_v1 = vadd.f32 %v3772_v23, %v3734_v37 }
 0x25b   :  { %v2213_v43 = vmax.f32 %v1319_v3, 0.0  ;;  %v4390_v28 = vpop.f32.mrb[178].mxu0 }
 0x25c   :  { %v1334_v36 = vadd.f32 %v6479_v20, %v4390_v28  ;;  %v1328_v6 = vpop.f32.mrb[179].mxu0 }
 0x25d   :  { %v4815_v56 = vpack.c.bf16 %v2214_v0, %v2213_v43  ;;  %v1329_v34 = vadd.f32 %v6479_v20, %v1328_v6 }
 0x25e   :  { %v2216_v48 = vmax.f32 %v1334_v36, 0.0 }
 0x25f   :  { %v2215_v29 = vmax.f32 %v1329_v34, 0.0  ;;  %v4393_v16 = vpop.f32.mrb[180].mxu0  ;;  %4816 = vmatprep.subr.bf16.mxu1 %v4815_v56 }
 0x260   :  { %v1344_v8 = vadd.f32 %v6479_v20, %v4393_v16  ;;  %v1338_v30 = vpop.f32.mrb[181].mxu0  ;;  %4818 = vmatpush3.bf16.msra.mxu1 %v6561_v9 }
 0x261   :  { %v4819_v58 = vpack.c.bf16 %v2216_v48, %v2215_v29  ;;  %v1339_v37 = vadd.f32 %v6479_v20, %v1338_v30 }
 0x262   :  { %v2218_v50 = vmax.f32 %v1344_v8, 0.0 }
 0x263   :  { %v2217_v62 = vmax.f32 %v1339_v37, 0.0  ;;  %v4396_v18 = vpop.f32.mrb[182].mxu0  ;;  %4820 = vmatprep.subr.bf16.mxu1 %v4819_v58 }
 0x264   :  { %v1354_v23 = vadd.f32 %v6479_v20, %v4396_v18  ;;  %v1348_v3 = vpop.f32.mrb[183].mxu0  ;;  %4822 = vmatpush3.bf16.msra.mxu1 %v6575_v15 }
 0x265   :  { %v4823_v0 = vpack.c.bf16 %v2218_v50, %v2217_v62  ;;  %v1349_v43 = vadd.f32 %v6479_v20, %v1348_v3 }
 0x266   :  { %v2220_v28 = vmax.f32 %v1354_v23, 0.0 }
 0x267   :  { %v2219_v36 = vmax.f32 %v1349_v43, 0.0  ;;  %v4399_v6 = vpop.f32.mrb[184].mxu0  ;;  %4824 = vmatprep.subr.bf16.mxu1 %v4823_v0 }
 0x268   :  { %v1364_v9 = vadd.f32 %v6479_v20, %v4399_v6  ;;  %v1358_v29 = vpop.f32.mrb[185].mxu0  ;;  %4826 = vmatpush3.bf16.msra.mxu1 %v6586_v44 }
 0x269   :  { %v4827_v56 = vpack.c.bf16 %v2220_v28, %v2219_v36  ;;  %v1359_v34 = vadd.f32 %v6479_v20, %v1358_v29 }
 0x26a   :  { %v2222_v48 = vmax.f32 %v1364_v9, 0.0 }
 0x26b   :  { %v2221_v16 = vmax.f32 %v1359_v34, 0.0  ;;  %v4402_v8 = vpop.f32.mrb[186].mxu0  ;;  %4828 = vmatprep.subr.bf16.mxu1 %v4827_v56 }
 0x26c   :  { %v1374_v15 = vadd.f32 %v6479_v20, %v4402_v8  ;;  %v1368_v30 = vpop.f32.mrb[187].mxu0  ;;  %4830 = vmatpush3.bf16.msra.mxu1 %v6594_v31 }
 0x26d   :  { %v4831_v58 = vpack.c.bf16 %v2222_v48, %v2221_v16  ;;  %v1369_v37 = vadd.f32 %v6479_v20, %v1368_v30 }
 0x26e   :  { %v2224_v50 = vmax.f32 %v1374_v15, 0.0 }
 0x26f   :  { %v2223_v62 = vmax.f32 %v1369_v37, 0.0  ;;  %v4405_v18 = vpop.f32.mrb[188].mxu0  ;;  %4832 = vmatprep.subr.bf16.mxu1 %v4831_v58 }
 0x270   :  { %v1384_v44 = vadd.f32 %v6479_v20, %v4405_v18  ;;  %v1378_v23 = vpop.f32.mrb[189].mxu0  ;;  %4834 = vmatpush3.bf16.msra.mxu1 %v6602_v57 }
 0x271   :  { %v4835_v3 = vpack.c.bf16 %v2224_v50, %v2223_v62  ;;  %v1379_v0 = vadd.f32 %v6479_v20, %v1378_v23  ;;  %v2367_v62 = vld [vmem:[%s6862_s1 + $0x50] sm:$0xff] }
 0x272   :  { %v2226_v43 = vmax.f32 %v1384_v44, 0.0  ;;  %v2388_v44 = vld [vmem:[%s6862_s1 + $0xf8] sm:$0x3] }
 0x273   :  { %v2225_v28 = vmax.f32 %v1379_v0, 0.0  ;;  %v4408_v36 = vpop.f32.mrb[190].mxu0  ;;  %4836 = vmatprep.subr.bf16.mxu1 %v4835_v3 }
 0x274   :  { %v1394_v31 = vadd.f32 %v6479_v20, %v4408_v36  ;;  %v1388_v6 = vpop.f32.mrb[191].mxu0  ;;  %4838 = vmatpush3.bf16.msra.mxu1 %v6610_v51 }
 0x275   :  { %v4839_v9 = vpack.c.bf16 %v2226_v43, %v2225_v28  ;;  %v1389_v29 = vadd.f32 %v6479_v20, %v1388_v6  ;;  %v2370_v6 = vld [vmem:[%s6862_s1 + $0x68] sm:$0xff] }
 0x276   :  { %v2228_v56 = vmax.f32 %v1394_v31, 0.0 }
 0x277   :  { %v2227_v34 = vmax.f32 %v1389_v29, 0.0  ;;  %v4411_v48 = vpop.f32.mrb[192].mxu0  ;;  %4840 = vmatprep.subr.bf16.mxu1 %v4839_v9 }
 0x278   :  { %v1404_v57 = vadd.f32 %v6479_v20, %v4411_v48  ;;  %v1398_v16 = vpop.f32.mrb[193].mxu0  ;;  %4842 = vmatpush3.bf16.msra.mxu1 %v6616_v17 }
 0x279   :  { %v4843_v8 = vpack.c.bf16 %v2228_v56, %v2227_v34  ;;  %v1399_v15 = vadd.f32 %v6479_v20, %v1398_v16 }
 0x27a   :  { %v2230_v30 = vmax.f32 %v1404_v57, 0.0 }
 0x27b   :  { %v2229_v58 = vmax.f32 %v1399_v15, 0.0  ;;  %v4414_v37 = vpop.f32.mrb[194].mxu0  ;;  %4844 = vmatprep.subr.bf16.mxu1 %v4843_v8 }
 0x27c   :  { %v1414_v51 = vadd.f32 %v6479_v20, %v4414_v37  ;;  %v1408_v50 = vpop.f32.mrb[195].mxu0  ;;  %4846 = vmatpush3.bf16.msra.mxu1 %v6622_v35  ;;  %v2387_v35 = vld [vmem:[%s6862_s1 + $0xf0] sm:$0x3] }
 0x27d   :  { %v6655_v18 = vpack.c.bf16 %v2230_v30, %v2229_v58  ;;  %v1409_v17 = vadd.f32 %v6479_v20, %v1408_v50 }
 0x27e   :  { %v2232_v23 = vmax.f32 %v1414_v51, 0.0 }
 0x27f   :  { %v2231_v3 = vmax.f32 %v1409_v17, 0.0  ;;  %v4417_v0 = vpop.f32.mrb[196].mxu0  ;;  %2837 = vmatmul.mubr.f32.vlgmr.msra.gmra.mrb[102].mxu1 %v2367_v62 }
 0x280   :  { %v1424_v43 = vadd.f32 %v6479_v20, %v4417_v0  ;;  %v1418_v28 = vpop.f32.mrb[197].mxu0  ;;  %2841 = vmatprep.mubr.f32.mxu1 %v2388_v44 }
 0x281   :  { %v6665_v36 = vpack.c.bf16 %v2232_v23, %v2231_v3  ;;  %v1419_v31 = vadd.f32 %v6479_v20, %v1418_v28 }
 0x282   :  { %v2234_v9 = vmax.f32 %v1424_v43, 0.0 }
 0x283   :  { %v2233_v29 = vmax.f32 %v1419_v31, 0.0  ;;  %v4420_v56 = vpop.f32.mrb[198].mxu0  ;;  %2842 = vmatmul.mubr.f32.gmra.mrb[104].mxu1 %v2387_v35 }
 0x284   :  { %v1434_v34 = vadd.f32 %v6479_v20, %v4420_v56  ;;  %v1428_v48 = vpop.f32.mrb[199].mxu0  ;;  %2911 = vmatprep.mubr.f32.mxu1 %v2370_v6 }
 0x285   :  { %v6672_v57 = vpack.c.bf16 %v2234_v9, %v2233_v29  ;;  %v1429_v16 = vadd.f32 %v6479_v20, %v1428_v48 }
 0x286   :  { %v2236_v8 = vmax.f32 %v1434_v34, 0.0 }
 0x287   :  { %v2235_v15 = vmax.f32 %v1429_v16, 0.0  ;;  %v4423_v30 = vpop.f32.mrb[200].mxu0 }
 0x288   :  { %v1444_v58 = vadd.f32 %v6479_v20, %v4423_v30  ;;  %v1438_v37 = vpop.f32.mrb[201].mxu0 }
 0x289   :  { %v6676_v51 = vpack.c.bf16 %v2236_v8, %v2235_v15  ;;  %v1439_v50 = vadd.f32 %v6479_v20, %v1438_v37 }
 0x28a   :  { %v2238_v62 = vmax.f32 %v1444_v58, 0.0 }
 0x28b   :  { %v2237_v17 = vmax.f32 %v1439_v50, 0.0  ;;  %v4426_v44 = vpop.f32.mrb[202].mxu0 }
 0x28c   :  { %v1454_v23 = vadd.f32 %v6479_v20, %v4426_v44  ;;  %v1448_v3 = vpop.f32.mrb[203].mxu0 }
 0x28d   :  { %v6680_v0 = vpack.c.bf16 %v2238_v62, %v2237_v17  ;;  %v1449_v43 = vadd.f32 %v6479_v20, %v1448_v3 }
 0x28e   :  { %v2240_v28 = vmax.f32 %v1454_v23, 0.0 }
 0x28f   :  { %v2239_v35 = vmax.f32 %v1449_v43, 0.0  ;;  %v4429_v31 = vpop.f32.mrb[204].mxu0 }
 0x290   :  { %v1464_v6 = vadd.f32 %v6479_v20, %v4429_v31  ;;  %v1458_v9 = vpop.f32.mrb[205].mxu0 }
 0x291   :  { %v6684_v29 = vpack.c.bf16 %v2240_v28, %v2239_v35  ;;  %v1459_v56 = vadd.f32 %v6479_v20, %v1458_v9 }
 0x292   :  { %v2242_v34 = vmax.f32 %v1464_v6, 0.0  ;;  %v3805_v48 = vpop.f32.mrb[90].mxu1 }
 0x293   :  { %v2241_v16 = vmax.f32 %v1459_v56, 0.0  ;;  %v4432_v8 = vpop.f32.mrb[206].mxu0  ;;  %v3806_v15 = vpop.f32.mrb[91].mxu1 }
 0x294   :  { %v1474_v30 = vadd.f32 %v6479_v20, %v4432_v8  ;;  %v1468_v58 = vpop.f32.mrb[207].mxu0  ;;  %v3807_v37 = vadd.f32 %v3806_v15, %v3805_v48 }
 0x295   :  { %v6688_v50 = vpack.c.bf16 %v2242_v34, %v2241_v16  ;;  %v1469_v62 = vadd.f32 %v6479_v20, %v1468_v58 }
 0x296   :  { %v2244_v17 = vmax.f32 %v1474_v30, 0.0  ;;  %v6692_v44 = vadd.f32 %v3807_v37, %v6619_v54  ;;  %v3808_v23 = vpop.f32.mrb[92].mxu1 }
 0x297   :  { %v2243_v3 = vmax.f32 %v1469_v62, 0.0  ;;  %v4435_v43 = vpop.f32.mrb[208].mxu0  ;;  %v3809_v28 = vpop.f32.mrb[93].mxu1 }
 0x298   :  { %v1484_v35 = vadd.f32 %v6479_v20, %v4435_v43  ;;  %v1478_v31 = vpop.f32.mrb[209].mxu0  ;;  %v3810_v6 = vadd.f32 %v3809_v28, %v3808_v23 }
 0x299   :  { %v6695_v9 = vpack.c.bf16 %v2244_v17, %v2243_v3  ;;  %v1479_v56 = vadd.f32 %v6479_v20, %v1478_v31 }
 0x29a   :  { %v2246_v34 = vmax.f32 %v1484_v35, 0.0  ;;  %v6699_v48 = vadd.f32 %v3810_v6, %v6625_v1 }
 0x29b   :  { %v2245_v16 = vmax.f32 %v1479_v56, 0.0  ;;  %v4438_v8 = vpop.f32.mrb[210].mxu0 }
 0x29c   :  { %v1494_v54 = vadd.f32 %v6479_v20, %v4438_v8  ;;  %v1488_v15 = vpop.f32.mrb[211].mxu0 }
 0x29d   :  { %v4847_v30 = vpack.c.bf16 %v2246_v34, %v2245_v16  ;;  %v1489_v58 = vadd.f32 %v6479_v20, %v1488_v15 }
 0x29e   :  { %v2248_v37 = vmax.f32 %v1494_v54, 0.0 }
 0x29f   :  { %v2247_v62 = vmax.f32 %v1489_v58, 0.0  ;;  %v4441_v43 = vpop.f32.mrb[212].mxu0  ;;  %4848 = vmatprep.subr.bf16.mxu1 %v4847_v30 }
 0x2a0   :  { %v1504_v17 = vadd.f32 %v6479_v20, %v4441_v43  ;;  %v1498_v23 = vpop.f32.mrb[213].mxu0  ;;  %4850 = vmatpush3.bf16.msra.mxu1 %v6655_v18 }
 0x2a1   :  { %v4851_v3 = vpack.c.bf16 %v2248_v37, %v2247_v62  ;;  %v1499_v1 = vadd.f32 %v6479_v20, %v1498_v23 }
 0x2a2   :  { %v2250_v28 = vmax.f32 %v1504_v17, 0.0 }
 0x2a3   :  { %v2249_v35 = vmax.f32 %v1499_v1, 0.0  ;;  %v4444_v31 = vpop.f32.mrb[214].mxu0  ;;  %4852 = vmatprep.subr.bf16.mxu1 %v4851_v3 }
 0x2a4   :  { %v1514_v6 = vadd.f32 %v6479_v20, %v4444_v31  ;;  %v1508_v56 = vpop.f32.mrb[215].mxu0  ;;  %4854 = vmatpush3.bf16.msra.mxu1 %v6665_v36 }
 0x2a5   :  { %v4855_v34 = vpack.c.bf16 %v2250_v28, %v2249_v35  ;;  %v1509_v16 = vadd.f32 %v6479_v20, %v1508_v56 }
 0x2a6   :  { %v2252_v8 = vmax.f32 %v1514_v6, 0.0 }
 0x2a7   :  { %v2251_v54 = vmax.f32 %v1509_v16, 0.0  ;;  %v4447_v15 = vpop.f32.mrb[216].mxu0  ;;  %4856 = vmatprep.subr.bf16.mxu1 %v4855_v34 }
 0x2a8   :  { %v1524_v18 = vadd.f32 %v6479_v20, %v4447_v15  ;;  %v1518_v30 = vpop.f32.mrb[217].mxu0  ;;  %4858 = vmatpush3.bf16.msra.mxu1 %v6672_v57 }
 0x2a9   :  { %v4859_v58 = vpack.c.bf16 %v2252_v8, %v2251_v54  ;;  %v1519_v37 = vadd.f32 %v6479_v20, %v1518_v30 }
 0x2aa   :  { %v2254_v62 = vmax.f32 %v1524_v18, 0.0 }
 0x2ab   :  { %v2253_v43 = vmax.f32 %v1519_v37, 0.0  ;;  %v4450_v17 = vpop.f32.mrb[218].mxu0  ;;  %4860 = vmatprep.subr.bf16.mxu1 %v4859_v58 }
 0x2ac   :  { %v1534_v36 = vadd.f32 %v6479_v20, %v4450_v17  ;;  %v1528_v23 = vpop.f32.mrb[219].mxu0  ;;  %4862 = vmatpush3.bf16.msra.mxu1 %v6676_v51 }
 0x2ad   :  { %v4863_v3 = vpack.c.bf16 %v2254_v62, %v2253_v43  ;;  %v1529_v1 = vadd.f32 %v6479_v20, %v1528_v23 }
 0x2ae   :  { %v2256_v28 = vmax.f32 %v1534_v36, 0.0 }
 0x2af   :  { %v2255_v35 = vmax.f32 %v1529_v1, 0.0  ;;  %v4453_v31 = vpop.f32.mrb[220].mxu0  ;;  %4864 = vmatprep.subr.bf16.mxu1 %v4863_v3 }
 0x2b0   :  { %v1544_v57 = vadd.f32 %v6479_v20, %v4453_v31  ;;  %v1538_v6 = vpop.f32.mrb[221].mxu0  ;;  %4866 = vmatpush3.bf16.msra.mxu1 %v6680_v0 }
 0x2b1   :  { %v4867_v56 = vpack.c.bf16 %v2256_v28, %v2255_v35  ;;  %v1539_v34 = vadd.f32 %v6479_v20, %v1538_v6  ;;  %v2369_v35 = vld [vmem:[%s6862_s1 + $0x60] sm:$0xff] }
 0x2b2   :  { %v2258_v16 = vmax.f32 %v1544_v57, 0.0 }
 0x2b3   :  { %v2257_v8 = vmax.f32 %v1539_v34, 0.0  ;;  %v4456_v54 = vpop.f32.mrb[222].mxu0  ;;  %4868 = vmatprep.subr.bf16.mxu1 %v4867_v56 }
 0x2b4   :  { %v1554_v51 = vadd.f32 %v6479_v20, %v4456_v54  ;;  %v1548_v15 = vpop.f32.mrb[223].mxu0  ;;  %4870 = vmatpush3.bf16.msra.mxu1 %v6684_v29 }
 0x2b5   :  { %v4871_v18 = vpack.c.bf16 %v2258_v16, %v2257_v8  ;;  %v1549_v30 = vadd.f32 %v6479_v20, %v1548_v15  ;;  %v2389_v8 = vld [vmem:[%s6862_s1 + $0x100] sm:$0x3] }
 0x2b6   :  { %v2260_v58 = vmax.f32 %v1554_v51, 0.0  ;;  %v2372_v51 = vld [vmem:[%s6862_s1 + $0x78] sm:$0xff] }
 0x2b7   :  { %v2259_v37 = vmax.f32 %v1549_v30, 0.0  ;;  %v4459_v62 = vpop.f32.mrb[224].mxu0  ;;  %4872 = vmatprep.subr.bf16.mxu1 %v4871_v18 }
 0x2b8   :  { %v1564_v0 = vadd.f32 %v6479_v20, %v4459_v62  ;;  %v1558_v43 = vpop.f32.mrb[225].mxu0  ;;  %4874 = vmatpush3.bf16.msra.mxu1 %v6688_v50  ;;  %v2390_v50 = vld [vmem:[%s6862_s1 + $0x108] sm:$0x3] }
 0x2b9   :  { %v4875_v17 = vpack.c.bf16 %v2260_v58, %v2259_v37  ;;  %v1559_v36 = vadd.f32 %v6479_v20, %v1558_v43  ;;  %v5013_v58 = vld [vmem:[%s6863_s3] ss:$0 sm:$0xff] }
 0x2ba   :  { %v2262_v23 = vmax.f32 %v1564_v0, 0.0 }
 0x2bb   :  { %v2261_v3 = vmax.f32 %v1559_v36, 0.0  ;;  %v4462_v1 = vpop.f32.mrb[226].mxu0  ;;  %4876 = vmatprep.subr.bf16.mxu1 %v4875_v17 }
 0x2bc   :  { %v1574_v29 = vadd.f32 %v6479_v20, %v4462_v1  ;;  %v1568_v28 = vpop.f32.mrb[227].mxu0  ;;  %4878 = vmatpush3.bf16.msra.mxu1 %v6695_v9 }
 0x2bd   :  { %v4881_v31 = vpack.c.bf16 %v2262_v23, %v2261_v3  ;;  %v1569_v57 = vadd.f32 %v6479_v20, %v1568_v28  ;;  %4880 = vmatprep.subr.bf16.mxu1 %v6185_v27 }
 0x2be   :  { %v2264_v6 = vmax.f32 %v1574_v29, 0.0 }
 0x2bf   :  { %v2263_v56 = vmax.f32 %v1569_v57, 0.0  ;;  %v4465_v34 = vpop.f32.mrb[228].mxu0  ;;  %2912 = vmatmul.mubr.f32.vlgmr.msra.gmra.mrb[106].mxu1 %v2369_v35 }
 0x2c0   :  { %v1584_v16 = vadd.f32 %v6479_v20, %v4465_v34  ;;  %v1578_v9 = vpop.f32.mrb[229].mxu0  ;;  %4882 = vmatpush3.bf16.msra.mxu1 %v4881_v31  ;;  %2916 = vmatprep.mubr.f32.mxu1 %v2390_v50 }
 0x2c1   :  { %v4885_v54 = vpack.c.bf16 %v2264_v6, %v2263_v56  ;;  %v1579_v27 = vadd.f32 %v6479_v20, %v1578_v9  ;;  %4884 = vmatprep.subr.bf16.mxu1 %v6195_v7 }
 0x2c2   :  { %v2266_v15 = vmax.f32 %v1584_v16, 0.0 }
 0x2c3   :  { %v2265_v18 = vmax.f32 %v1579_v27, 0.0  ;;  %v4468_v30 = vpop.f32.mrb[230].mxu0  ;;  %2917 = vmatmul.mubr.f32.gmra.mrb[108].mxu1 %v2389_v8 }
 0x2c4   :  { %v1594_v37 = vadd.f32 %v5013_v58, %v4468_v30  ;;  %v1588_v62 = vpop.f32.mrb[231].mxu0  ;;  %4886 = vmatpush3.bf16.msra.mxu1 %v4885_v54  ;;  %2986 = vmatprep.mubr.f32.mxu1 %v2372_v51 }
 0x2c5   :  { %v4889_v0 = vpack.c.bf16 %v2266_v15, %v2265_v18  ;;  %v1589_v20 = vadd.f32 %v5013_v58, %v1588_v62  ;;  %4888 = vmatprep.subr.bf16.mxu1 %v6226_v61 }
 0x2c6   :  { %v2268_v7 = vmax.f32 %v1594_v37, 0.0 }
 0x2c7   :  { %v2267_v43 = vmax.f32 %v1589_v20, 0.0  ;;  %v4471_v17 = vpop.f32.mrb[232].mxu0 }
 0x2c8   :  { %v1604_v36 = vadd.f32 %v5013_v58, %v4471_v17  ;;  %v1598_v23 = vpop.f32.mrb[233].mxu0  ;;  %4890 = vmatpush3.bf16.msra.mxu1 %v4889_v0  ;;  %v3147_v17 = vld [vmem:[%s6864_s4] sm:$0xff] }
 0x2c9   :  { %v4893_v3 = vpack.c.bf16 %v2268_v7, %v2267_v43  ;;  %v1599_v1 = vadd.f32 %v5013_v58, %v1598_v23  ;;  %4892 = vmatprep.subr.bf16.mxu1 %v6232_v46 }
 0x2ca   :  { %v2270_v29 = vmax.f32 %v1604_v36, 0.0  ;;  %v3148_v36 = vld [vmem:[%s6864_s4 + $0x8] sm:$0xff] }
 0x2cb   :  { %v2269_v28 = vmax.f32 %v1599_v1, 0.0  ;;  %v4474_v35 = vpop.f32.mrb[234].mxu0  ;;  %v4975_v23 = vpack.c.bf16 %v3148_v36, %v3147_v17  ;;  %v3150_v1 = vld [vmem:[%s6864_s4 + $0x18] sm:$0xff] }
 0x2cc   :  { %v1614_v31 = vadd.f32 %v5013_v58, %v4474_v35  ;;  %v1608_v57 = vpop.f32.mrb[235].mxu0  ;;  %4894 = vmatpush3.bf16.msra.mxu1 %v4893_v3  ;;  %v3149_v3 = vld [vmem:[%s6864_s4 + $0x10] sm:$0xff]  ;;  %v3243_v35 = vld [vmem:[%s6865_s6 + $0x8] sm:$0xff] }
 0x2cd   :  { %v4897_v50 = vpack.c.bf16 %v2270_v29, %v2269_v28  ;;  %v1609_v6 = vadd.f32 %v5013_v58, %v1608_v57  ;;  %4896 = vmatprep.subr.bf16.mxu1 %v6254_v2  ;;  %v4979_v29 = vpack.c.bf16 %v3150_v1, %v3149_v3  ;;  %v3242_v28 = vld [vmem:[%s6865_s6] sm:$0xff] }
 0x2ce   :  { %v2272_v61 = vmax.f32 %v1614_v31, 0.0  ;;  %v4983_v31 = vpack.c.bf16 %v3243_v35, %v3242_v28 }
 0x2cf   :  { %v2271_v56 = vmax.f32 %v1609_v6, 0.0  ;;  %v4477_v34 = vpop.f32.mrb[236].mxu0 }
 0x2d0   :  { %v1624_v16 = vadd.f32 %v5013_v58, %v4477_v34  ;;  %v1618_v9 = vpop.f32.mrb[237].mxu0  ;;  %4898 = vmatpush3.bf16.msra.mxu1 %v4897_v50 }
 0x2d1   :  { %v4901_v8 = vpack.c.bf16 %v2272_v61, %v2271_v56  ;;  %v1619_v54 = vadd.f32 %v5013_v58, %v1618_v9  ;;  %4900 = vmatprep.subr.bf16.mxu1 %v6260_v12  ;;  %v2371_v12 = vld [vmem:[%s6862_s1 + $0x70] sm:$0xff] }
 0x2d2   :  { %v2274_v46 = vmax.f32 %v1624_v16, 0.0  ;;  %v3843_v27 = vpop.f32.mrb[94].mxu1 }
 0x2d3   :  { %v2273_v51 = vmax.f32 %v1619_v54, 0.0  ;;  %v3844_v15 = vpop.f32.mrb[95].mxu1 }
 0x2d4   :  { %4902 = vmatpush3.bf16.msra.mxu1 %v4901_v8  ;;  %v3845_v18 = vadd.f32 %v3844_v15, %v3843_v27 }
 0x2d5   :  { %v4905_v30 = vpack.c.bf16 %v2274_v46, %v2273_v51  ;;  %4904 = vmatprep.subr.bf16.mxu1 %v6274_v32  ;;  %v2392_v32 = vld [vmem:[%s6862_s1 + $0x118] sm:$0x3] }
 0x2d6   :  { %v2689_v2 = vadd.f32 %v3845_v18, %v6692_v44  ;;  %v3846_v37 = vpop.f32.mrb[96].mxu1 }
 0x2d7   :  { %v3847_v62 = vpop.f32.mrb[97].mxu1 }
 0x2d8   :  { %4906 = vmatpush3.bf16.msra.mxu1 %v4905_v30  ;;  %v3848_v0 = vadd.f32 %v3847_v62, %v3846_v37 }
 0x2d9   :  { %4908 = vmatprep.subr.bf16.mxu1 %v6288_v55  ;;  %v2391_v55 = vld [vmem:[%s6862_s1 + $0x110] sm:$0x3] }
 0x2da   :  { %v2694_v58 = vadd.f32 %v3848_v0, %v6699_v48 }
 0x2dc   :  { %4910 = vmatpush3.bf16.msra.mxu1 %v6166_v39  ;;  %v2374_v39 = vld [vmem:[%s6862_s1 + $0x88] sm:$0xff] }
 0x2dd   :  { %4912 = vmatprep.subr.bf16.mxu1 %v6407_v25 }
 0x2df   :  { %2987 = vmatmul.mubr.f32.vlgmr.msra.gmra.mrb[110].mxu1 %v2371_v12 }
 0x2e0   :  { %4914 = vmatpush3.bf16.msra.mxu1 %v6302_v42  ;;  %2991 = vmatprep.mubr.f32.mxu1 %v2392_v32  ;;  %v2373_v42 = vld [vmem:[%s6862_s1 + $0x80] sm:$0xff] }
 0x2e1   :  { %4916 = vmatprep.subr.bf16.mxu1 %v6428_v53 }
 0x2e3   :  { %2992 = vmatmul.mubr.f32.gmra.mrb[112].mxu1 %v2391_v55 }
 0x2e4   :  { %4918 = vmatpush3.bf16.msra.mxu1 %v6316_v59  ;;  %3061 = vmatprep.mubr.f32.mxu1 %v2374_v39  ;;  %v2394_v59 = vld [vmem:[%s6862_s1 + $0x128] sm:$0x3] }
 0x2e5   :  { %4920 = vmatprep.subr.bf16.mxu1 %v6434_v5  ;;  %v6879_v5 = vld [vmem:[#allocation3_spill] sm:$0xff] }
 0x2e8   :  { %4922 = vmatpush3.bf16.msra.mxu1 %v6329_v52  ;;  %v2393_v52 = vld [vmem:[%s6862_s1 + $0x120] sm:$0x3] }
 0x2e9   :  { %4924 = vmatprep.subr.bf16.mxu1 %v6445_v60 }
 0x2ec   :  { %4926 = vmatpush3.bf16.msra.mxu1 %v6348_v19  ;;  %v2376_v19 = vld [vmem:[%s6862_s1 + $0x98] sm:$0xff] }
 0x2ed   :  { %4928 = vmatprep.subr.bf16.mxu1 %v6453_v13 }
 0x2f0   :  { %4930 = vmatpush3.bf16.msra.mxu1 %v6355_v63  ;;  %v6876_v63 = vld [vmem:[#allocation6_spill] sm:$0xff] }
 0x2f1   :  { %4932 = vmatprep.subr.bf16.mxu1 %v6461_v40 }
 0x2f4   :  { %4934 = vmatpush3.bf16.msra.mxu1 %v6374_v14  ;;  %v6877_v14 = vld [vmem:[#allocation2_spill] sm:$0xff] }
 0x2f5   :  { %4936 = vmatprep.subr.bf16.mxu1 %v6469_v10 }
 0x2f8   :  { %4938 = vmatpush3.bf16.msra.mxu1 %v6381_v26  ;;  %v6878_v26 = vld [vmem:[#allocation7_spill] sm:$0xff] }
 0x2f9   :  { %4940 = vmatprep.subr.bf16.mxu1 %v6482_v21  ;;  %v6880_v21 = vld [vmem:[#allocation4_spill] sm:$0xff] }
 0x2fc   :  { %4942 = vmatpush3.bf16.msra.mxu1 %v6400_v22 }
 0x2fd   :  { %4944 = vmatprep.subr.bf16.mxu1 %v6547_v33  ;;  %v2396_v33 = vld [vmem:[%s6862_s1 + $0x138] sm:$0x3] }
 0x2ff   :  { %3062 = vmatmul.mubr.f32.vlgmr.msra.gmra.mrb[114].mxu1 %v2373_v42 }
 0x300   :  { %4946 = vmatpush3.bf16.msra.mxu1 %v6490_v49  ;;  %3066 = vmatprep.mubr.f32.mxu1 %v2394_v59  ;;  %v6881_v49 = vld [vmem:[#allocation8_spill] sm:$0xff] }
 0x301   :  { %4948 = vmatprep.subr.bf16.mxu1 %v6557_v47  ;;  %v2395_v47 = vld [vmem:[%s6862_s1 + $0x130] sm:$0x3] }
 0x303   :  { %3067 = vmatmul.mubr.f32.gmra.mrb[116].mxu1 %v2393_v52 }
 0x304   :  { %4950 = vmatpush3.bf16.msra.mxu1 %v6498_v11  ;;  %3136 = vmatprep.mubr.f32.mxu1 %v2376_v19 }
 0x305   :  { %4952 = vmatprep.subr.bf16.mxu1 %v6571_v41 }
 0x308   :  { %4954 = vmatpush3.bf16.msra.mxu1 %v6505_v38  ;;  %v6882_v38 = vld [vmem:[#allocation5_spill] sm:$0xff] }
 0x309   :  { %4956 = vmatprep.subr.bf16.mxu1 %v6582_v45 }
 0x30c   :  { %4958 = vmatpush3.bf16.msra.mxu1 %v6512_v4  ;;  %v2375_v4 = vld [vmem:[%s6862_s1 + $0x90] sm:$0xff] }
 0x30d   :  { %4960 = vmatprep.subr.bf16.mxu1 %v6876_v63 }
 0x310   :  { %4962 = vmatpush3.bf16.msra.mxu1 %v6877_v14 }
 0x311   :  { %4964 = vmatprep.subr.bf16.mxu1 %v6878_v26 }
 0x312   :  { %v3881_v22 = vpop.f32.mrb[98].mxu1 }
 0x313   :  { %v3882_v25 = vpop.f32.mrb[99].mxu1 }
 0x314   :  { %v3883_v53 = vadd.f32 %v3882_v25, %v3881_v22  ;;  %4966 = vmatpush3.bf16.msra.mxu1 %v6879_v5  ;;  %v3244_v22 = vld [vmem:[%s6865_s6 + $0x10] sm:$0xff]  ;;  %v3245_v25 = vld [vmem:[%s6865_s6 + $0x18] sm:$0xff]  ;;  %v3355_v5 = vld [vmem:[%s6866_s5] ss:$0 sm:$0xff] }
 0x315   :  { %4968 = vmatprep.subr.bf16.mxu1 %v6607_v24 }
 0x316   :  { %v2764_v60 = vadd.f32 %v3883_v53, %v2689_v2  ;;  %v3884_v13 = vpop.f32.mrb[100].mxu1  ;;  %v4987_v53 = vpack.c.bf16 %v3245_v25, %v3244_v22 }
 0x317   :  { %v3885_v40 = vpop.f32.mrb[101].mxu1 }
 0x318   :  { %v3886_v10 = vadd.f32 %v3885_v40, %v3884_v13  ;;  %4970 = vmatpush3.bf16.msra.mxu1 %v6880_v21 }
 0x319   :  { %4972 = vmatprep.subr.bf16.mxu1 %v6881_v49 }
 0x31a   :  { %v2769_v11 = vadd.f32 %v3886_v10, %v2694_v58 }
 0x31c   :  { %4974 = vmatpush3.bf16.msra.mxu1 %v6882_v38 }
 0x31d   :  { %4976 = vmatprep.subr.bf16.mxu1 %v4975_v23 }
 0x31f   :  { %3137 = vmatmul.mubr.f32.vlgmr.msra.gmra.mrb[118].mxu1 %v2375_v4 }
 0x320   :  { %3141 = vmatprep.mubr.f32.mxu1 %v2396_v33  ;;  %4978 = vmatpush3.bf16.msra.mxu1 %v4975_v23 }
 0x321   :  { %4980 = vmatprep.subr.bf16.mxu1 %v4979_v29 }
 0x323   :  { %3142 = vmatmul.mubr.f32.gmra.mrb[120].mxu1 %v2395_v47 }
 0x324   :  { %4982 = vmatpush3.bf16.msra.mxu1 %v4979_v29 }
 0x325   :  { %4984 = vmatprep.subr.bf16.mxu1 %v4983_v31 }
 0x352   :  { %v3919_v41 = vpop.f32.mrb[102].mxu1 }
 0x353   :  { %v3920_v45 = vpop.f32.mrb[103].mxu1 }
 0x354   :  { %v3921_v24 = vadd.f32 %v3920_v45, %v3919_v41 }
 0x356   :  { %v2839_v44 = vadd.f32 %v3921_v24, %v2764_v60  ;;  %v3922_v48 = vpop.f32.mrb[104].mxu1 }
 0x357   :  { %v3923_v20 = vpop.f32.mrb[105].mxu1 }
 0x358   :  { %v3924_v7 = vadd.f32 %v3923_v20, %v3922_v48 }
 0x35a   :  { %v2844_v43 = vadd.f32 %v3924_v7, %v2769_v11  ;;  %v3358_v11 = vld [vmem:[%s6867_s7] ss:$0 sm:$0xff] }
 0x392   :  { %v3957_v57 = vpop.f32.mrb[106].mxu1 }
 0x393   :  { %v3958_v50 = vpop.f32.mrb[107].mxu1 }
 0x394   :  { %v3959_v6 = vadd.f32 %v3958_v50, %v3957_v57 }
 0x396   :  { %v2914_v61 = vadd.f32 %v3959_v6, %v2839_v44  ;;  %v3960_v56 = vpop.f32.mrb[108].mxu1 }
 0x397   :  { %v3961_v34 = vpop.f32.mrb[109].mxu1 }
 0x398   :  { %v3962_v16 = vadd.f32 %v3961_v34, %v3960_v56 }
 0x39a   :  { %v2919_v9 = vadd.f32 %v3962_v16, %v2844_v43 }
 0x3b2   :  { %v3995_v8 = vpop.f32.mrb[110].mxu1 }
 0x3b3   :  { %v3996_v54 = vpop.f32.mrb[111].mxu1 }
 0x3b4   :  { %v3997_v46 = vadd.f32 %v3996_v54, %v3995_v8 }
 0x3b6   :  { %v2989_v27 = vadd.f32 %v3997_v46, %v2914_v61  ;;  %v3998_v51 = vpop.f32.mrb[112].mxu1 }
 0x3b7   :  { %v3999_v15 = vpop.f32.mrb[113].mxu1 }
 0x3b8   :  { %v4000_v18 = vadd.f32 %v3999_v15, %v3998_v51 }
 0x3ba   :  { %v2994_v30 = vadd.f32 %v4000_v18, %v2919_v9 }
 0x3d2   :  { %v4033_v2 = vpop.f32.mrb[114].mxu1 }
 0x3d3   :  { %v4034_v37 = vpop.f32.mrb[115].mxu1 }
 0x3d4   :  { %v4035_v62 = vadd.f32 %v4034_v37, %v4033_v2 }
 0x3d6   :  { %v3064_v0 = vadd.f32 %v4035_v62, %v2989_v27  ;;  %v4036_v58 = vpop.f32.mrb[116].mxu1 }
 0x3d7   :  { %v4037_v12 = vpop.f32.mrb[117].mxu1 }
 0x3d8   :  { %v4038_v32 = vadd.f32 %v4037_v12, %v4036_v58 }
 0x3da   :  { %v3069_v55 = vadd.f32 %v4038_v32, %v2994_v30 }
 0x3f2   :  { %v4071_v39 = vpop.f32.mrb[118].mxu1 }
 0x3f3   :  { %v4072_v42 = vpop.f32.mrb[119].mxu1 }
 0x3f4   :  { %v4073_v59 = vadd.f32 %v4072_v42, %v4071_v39 }
 0x3f6   :  { %v3139_v52 = vadd.f32 %v4073_v59, %v3064_v0  ;;  %v4074_v19 = vpop.f32.mrb[120].mxu1 }
 0x3f7   :  { %v4075_v63 = vpop.f32.mrb[121].mxu1 }
 0x3f8   :  { %v4076_v14 = vadd.f32 %v4075_v63, %v4074_v19  ;;  %4609 = vmatprep.mubr.msk.f32.mxu1 %vm3158_vm0, %v3139_v52 }
 0x3fa   :  { %v3144_v26 = vadd.f32 %v4076_v14, %v3069_v55 }
 0x3fc   :  { %4610 = vmatmul.mubr.msk.f32.vlgmr.msra.gmra.mrb[122].mxu1 %vm3158_vm0, %v3144_v26 }
 0x3fd   :  { %4986 = vmatpush3.bf16.msra.mxu1 %v4983_v31 }
 0x3fe   :  { %4988 = vmatprep.subr.bf16.mxu1 %v4987_v53 }
 0x401   :  { %4990 = vmatpush3.bf16.msra.mxu1 %v4987_v53 }
 0x4cf   :  { %v4611_v60 = vpop.f32.mrb[122].mxu1 }
 0x4d0   :  { %v3237_v13 = vadd.f32 %v4611_v60, %v3355_v5  ;;  %v3231_v40 = vpop.f32.mrb[123].mxu1 }
 0x4d1   :  { %v3232_v10 = vadd.f32 %v3355_v5, %v3231_v40 }
 0x4d2   :  { %v3241_v49 = vmax.f32 %v3237_v13, 0.0 }
 0x4d3   :  { %v3240_v21 = vmax.f32 %v3232_v10, 0.0 }
 0x4d5   :  { %4620 = vmatprep.mubr.msk.f32.mxu1 %vm3158_vm0, %v3240_v21 }
 0x4d6   :  { %4621 = vmatmul.mubr.msk.f32.vlgmr.msra.gmra.mrb[124].mxu1 %vm3158_vm0, %v3241_v49 }
 0x5a9   :  { %v4622_v38 = vpop.f32.mrb[124].mxu1 }
 0x5aa   :  { %v3331_v4 = vadd.f32 %v4622_v38, %v3358_v11  ;;  %v3325_v33 = vpop.f32.mrb[125].mxu1 }
 0x5ab   :  { %v3326_v47 = vadd.f32 %v3358_v11, %v3325_v33 }
 0x5ac   :  { %v3335_v45 = vmul.f32 %v3331_v4, %v3331_v4 }
 0x5ad   :  { %v3334_v41 = vmul.f32 %v3326_v47, %v3326_v47 }
 0x5ae   :  { %v3339_v24 = vsel %vm3338_vm1, %v3335_v45, 0.0 }
 0x5af   :  { %3336 = vadd.xlane.f32.xlu0 %v3334_v41 }
 0x5b3   :  { %3340 = vadd.xlane.f32.xlu0 %v3339_v24 }
 0x63c   :  { %v3337_v44 = vpop.xlane.xlu0 %3336 }
 0x63d   :  { %v3342_v48 = vmax.f32 %v3337_v44, 1e-24 }
 0x63f   :  { %5007 = vrsqrt.f32 %v3342_v48 }
 0x640   :  { %v3341_v20 = vpop.xlane.xlu0 %3340 }
 0x641   :  { %v3343_v7 = vmax.f32 %v3341_v20, 1e-24 }
 0x643   :  { %5009 = vrsqrt.f32 %v3343_v7 }
 0x649   :  { %v5008_v43 = vpop.eup %5007 }
 0x64a   :  { %v3346_v17 = vmul.f32 %v5008_v43, %v3326_v47 }
 0x64c   :  { %3348 = vst [vmem:[%s6868_s8] sm:$0xff] %v3346_v17 }
 0x64d   :  { %v5010_v36 = vpop.eup %5009 }
 0x64e   :  { %v3347_v23 = vmul.f32 %v5010_v36, %v3331_v4 }
 0x650   :  { %3349 = vst [vmem:[%s6868_s8 + $0x8] sm:$0x3] %v3347_v23 }

// kernel: moco_forward.3
= control target key start
LH: loop header
LB: loop body
LE: loop exit
PB: predicated region body
PF: predicated region fallthrough
CT: control target
= control target key end

     0   :  { %s1862_s0 = inlined_call_operand.vmem [shape: f32[512,128], index: 0, kind: input, shape index: {}]   ;;  %s1863_s1 = inlined_call_operand.vmem [shape: f32[2,512], index: 1, kind: input, shape index: {}]   ;;  %s1864_s2 = inlined_call_operand.vmem [shape: f32[128,32], index: 2, kind: input, shape index: {}]   ;;  %s1865_s3 = inlined_call_operand.vmem [shape: f32[1,32], index: 3, kind: input, shape index: {}]   ;;  %s1866_s4 = inlined_call_operand.vmem [shape: f32[32,32], index: 4, kind: input, shape index: {}]   ;;  %s1867_s5 = inlined_call_operand.vmem [shape: f32[1,32], index: 5, kind: input, shape index: {}]   ;;  %s1868_s6 = inlined_call_operand.vmem [shape: f32[32,128], index: 6, kind: input, shape index: {}]   ;;  %s1869_s7 = inlined_call_operand.vmem [shape: f32[1,128], index: 7, kind: input, shape index: {}]   ;;  %s1870_s8 = inlined_call_operand.hbm [shape: f32[2,128], index: 8, kind: output, shape index: {}]  }
   0x1   :  { %v94_v0 = vld [vmem:[%s1864_s2] sm:$0xff]  ;;  %v95_v1 = vld [vmem:[%s1864_s2 + $0x8] sm:$0xff]  ;;  %v96_v2 = vld [vmem:[%s1864_s2 + $0x10] sm:$0xff] }
   0x2   :  { %v1237_v3 = vpack.c.bf16 %v95_v1, %v94_v0  ;;  %v97_v4 = vld [vmem:[%s1864_s2 + $0x18] sm:$0xff]  ;;  %v98_v6 = vld [vmem:[%s1864_s2 + $0x20] sm:$0xff]  ;;  %v99_v7 = vld [vmem:[%s1864_s2 + $0x28] sm:$0xff] }
   0x3   :  { %v1241_v5 = vpack.c.bf16 %v97_v4, %v96_v2  ;;  %v1245_v8 = vpack.c.bf16 %v99_v7, %v98_v6  ;;  %v30_v9 = vld [vmem:[%s1862_s0] sm:$0xff]  ;;  %v100_v10 = vld [vmem:[%s1864_s2 + $0x30] sm:$0xff]  ;;  %v101_v11 = vld [vmem:[%s1864_s2 + $0x38] sm:$0xff] }
   0x4   :  { %1238 = vmatprep.subr.bf16.mxu0 %v1237_v3  ;;  %1345 = vmatprep.subr.bf16.mxu1 %v1237_v3  ;;  %v1249_v12 = vpack.c.bf16 %v101_v11, %v100_v10  ;;  %v102_v13 = vld [vmem:[%s1864_s2 + $0x40] sm:$0xff]  ;;  %v103_v14 = vld [vmem:[%s1864_s2 + $0x48] sm:$0xff]  ;;  %v104_v16 = vld [vmem:[%s1864_s2 + $0x50] sm:$0xff] }
   0x5   :  { %1240 = vmatpush3.bf16.msra.mxu0 %v1237_v3  ;;  %1353 = vmatpush3.bf16.msra.mxu1 %v1237_v3  ;;  %v1253_v15 = vpack.c.bf16 %v103_v14, %v102_v13  ;;  %v105_v17 = vld [vmem:[%s1864_s2 + $0x58] sm:$0xff]  ;;  %v76_v18 = vld [vmem:[%s1862_s0 + $0x170] sm:$0xff]  ;;  %v106_v20 = vld [vmem:[%s1864_s2 + $0x60] sm:$0xff] }
   0x6   :  { %1242 = vmatprep.subr.bf16.mxu0 %v1241_v5  ;;  %1346 = vmatprep.subr.bf16.mxu1 %v1241_v5  ;;  %v1257_v19 = vpack.c.bf16 %v105_v17, %v104_v16  ;;  %v107_v21 = vld [vmem:[%s1864_s2 + $0x68] sm:$0xff]  ;;  %v108_v23 = vld [vmem:[%s1864_s2 + $0x70] sm:$0xff]  ;;  %v109_v24 = vld [vmem:[%s1864_s2 + $0x78] sm:$0xff] }
   0x7   :  { %1119 = vmatprep.mubr.f32.mxu0 %v30_v9  ;;  %1188 = vmatprep.mubr.f32.mxu1 %v76_v18  ;;  %v1261_v22 = vpack.c.bf16 %v107_v21, %v106_v20  ;;  %v1265_v25 = vpack.c.bf16 %v109_v24, %v108_v23 }
   0x9   :  { %1244 = vmatpush3.bf16.msra.mxu0 %v1241_v5  ;;  %1354 = vmatpush3.bf16.msra.mxu1 %v1241_v5 }
   0xa   :  { %1246 = vmatprep.subr.bf16.mxu0 %v1245_v8  ;;  %1347 = vmatprep.subr.bf16.mxu1 %v1245_v8 }
   0xd   :  { %1248 = vmatpush3.bf16.msra.mxu0 %v1245_v8  ;;  %1355 = vmatpush3.bf16.msra.mxu1 %v1245_v8 }
   0xe   :  { %1250 = vmatprep.subr.bf16.mxu0 %v1249_v12  ;;  %1348 = vmatprep.subr.bf16.mxu1 %v1249_v12 }
  0x11   :  { %1252 = vmatpush3.bf16.msra.mxu0 %v1249_v12  ;;  %1356 = vmatpush3.bf16.msra.mxu1 %v1249_v12 }
  0x12   :  { %1254 = vmatprep.subr.bf16.mxu0 %v1253_v15  ;;  %1349 = vmatprep.subr.bf16.mxu1 %v1253_v15 }
  0x15   :  { %1256 = vmatpush3.bf16.msra.mxu0 %v1253_v15  ;;  %1357 = vmatpush3.bf16.msra.mxu1 %v1253_v15 }
  0x16   :  { %1258 = vmatprep.subr.bf16.mxu0 %v1257_v19  ;;  %1350 = vmatprep.subr.bf16.mxu1 %v1257_v19 }
  0x19   :  { %1260 = vmatpush3.bf16.msra.mxu0 %v1257_v19  ;;  %1358 = vmatpush3.bf16.msra.mxu1 %v1257_v19 }
  0x1a   :  { %1262 = vmatprep.subr.bf16.mxu0 %v1261_v22  ;;  %1351 = vmatprep.subr.bf16.mxu1 %v1261_v22 }
  0x1b   :  { %13 = vsyncpa [#allocation3], 0  ;;  %v31_v26 = vld [vmem:[%s1862_s0 + $0x8] sm:$0xff]  ;;  %v77_v27 = vld [vmem:[%s1862_s0 + $0x178] sm:$0xff]  ;;  %v1393_v24 = vmov 1983009808  }
  0x1c   :  { %v32_v28 = vld [vmem:[%s1862_s0 + $0x10] sm:$0xff]  ;;  %v78_v29 = vld [vmem:[%s1862_s0 + $0x180] sm:$0xff]  ;;  %v33_v30 = vld [vmem:[%s1862_s0 + $0x18] sm:$0xff]  ;;  %vm1395_vm0 = vmmov 0   ;;  %vm740_vm1 = vcmask 261120   ;;  %vm900_vm2 = vcmask 1041408  }
  0x1d   :  { %1264 = vmatpush3.bf16.msra.mxu0 %v1261_v22  ;;  %1359 = vmatpush3.bf16.msra.mxu1 %v1261_v22  ;;  %v79_v31 = vld [vmem:[%s1862_s0 + $0x188] sm:$0xff]  ;;  %v34_v32 = vld [vmem:[%s1862_s0 + $0x20] sm:$0xff]  ;;  %v80_v33 = vld [vmem:[%s1862_s0 + $0x190] sm:$0xff] }
  0x1e   :  { %1266 = vmatprep.subr.bf16.mxu0 %v1265_v25  ;;  %1352 = vmatprep.subr.bf16.mxu1 %v1265_v25  ;;  %v35_v34 = vld [vmem:[%s1862_s0 + $0x28] sm:$0xff]  ;;  %v81_v35 = vld [vmem:[%s1862_s0 + $0x198] sm:$0xff]  ;;  %v36_v36 = vld [vmem:[%s1862_s0 + $0x30] sm:$0xff] }
  0x1f   :  { %v82_v37 = vld [vmem:[%s1862_s0 + $0x1a0] sm:$0xff]  ;;  %v37_v38 = vld [vmem:[%s1862_s0 + $0x38] sm:$0xff]  ;;  %v83_v39 = vld [vmem:[%s1862_s0 + $0x1a8] sm:$0xff] }
  0x20   :  { %v38_v40 = vld [vmem:[%s1862_s0 + $0x40] sm:$0xff]  ;;  %v84_v41 = vld [vmem:[%s1862_s0 + $0x1b0] sm:$0xff]  ;;  %v39_v42 = vld [vmem:[%s1862_s0 + $0x48] sm:$0xff] }
  0x21   :  { %1268 = vmatpush3.bf16.msra.mxu0 %v1265_v25  ;;  %1360 = vmatpush3.bf16.msra.mxu1 %v1265_v25  ;;  %v85_v43 = vld [vmem:[%s1862_s0 + $0x1b8] sm:$0xff]  ;;  %v40_v44 = vld [vmem:[%s1862_s0 + $0x50] sm:$0xff]  ;;  %v86_v45 = vld [vmem:[%s1862_s0 + $0x1c0] sm:$0xff]  ;;  %v570_v25 = vunpack.c.l.s4 %v1393_v24 }
  0x22   :  { %v41_v46 = vld [vmem:[%s1862_s0 + $0x58] sm:$0xff]  ;;  %v87_v47 = vld [vmem:[%s1862_s0 + $0x1c8] sm:$0xff]  ;;  %v42_v48 = vld [vmem:[%s1862_s0 + $0x60] sm:$0xff] }
  0x23   :  { %v88_v49 = vld [vmem:[%s1862_s0 + $0x1d0] sm:$0xff]  ;;  %v43_v50 = vld [vmem:[%s1862_s0 + $0x68] sm:$0xff]  ;;  %v89_v51 = vld [vmem:[%s1862_s0 + $0x1d8] sm:$0xff] }
  0x24   :  { %1120 = vmatmul.mubr.f32.vlgmr.msra.gmra.mrb[0].mxu0 %v31_v26  ;;  %1189 = vmatmul.mubr.f32.vlgmr.msra.gmra.mrb[0].mxu1 %v77_v27  ;;  %v44_v52 = vld [vmem:[%s1862_s0 + $0x70] sm:$0xff]  ;;  %v90_v53 = vld [vmem:[%s1862_s0 + $0x1e0] sm:$0xff]  ;;  %v45_v54 = vld [vmem:[%s1862_s0 + $0x78] sm:$0xff]  ;;  %v572_v26 = vlaneseq  ;;  %v571_v27 = vunpack.c.0.s8 %v570_v25 }
  0x25   :  { %1122 = vmatprep.mubr.f32.mxu0 %v32_v28  ;;  %1191 = vmatprep.mubr.f32.mxu1 %v78_v29  ;;  %v91_v55 = vld [vmem:[%s1862_s0 + $0x1e8] sm:$0xff]  ;;  %v46_v56 = vld [vmem:[%s1862_s0 + $0x80] sm:$0xff]  ;;  %v92_v57 = vld [vmem:[%s1862_s0 + $0x1f0] sm:$0xff] }
  0x26   :  { %v47_v58 = vld [vmem:[%s1862_s0 + $0x88] sm:$0xff]  ;;  %v93_v59 = vld [vmem:[%s1862_s0 + $0x1f8] sm:$0xff]  ;;  %v48_v60 = vld [vmem:[%s1862_s0 + $0x90] sm:$0xff]  ;;  %v573_v28 = vshrl.u32 %v572_v26, 7 }
  0x27   :  { %v49_v61 = vld [vmem:[%s1862_s0 + $0x98] sm:$0xff]  ;;  %v50_v62 = vld [vmem:[%s1862_s0 + $0xa0] sm:$0xff]  ;;  %v51_v63 = vld [vmem:[%s1862_s0 + $0xa8] sm:$0xff] }
  0x28   :  { %1123 = vmatmul.mubr.f32.gmra.mrb[2].mxu0 %v33_v30  ;;  %1192 = vmatmul.mubr.f32.gmra.mrb[2].mxu1 %v79_v31  ;;  %v52_v0 = vld [vmem:[%s1862_s0 + $0xb0] sm:$0xff]  ;;  %v53_v1 = vld [vmem:[%s1862_s0 + $0xb8] sm:$0xff]  ;;  %v54_v2 = vld [vmem:[%s1862_s0 + $0xc0] sm:$0xff]  ;;  %v574_v29 = vsub.s32 %v571_v27, %v573_v28 }
  0x29   :  { %1125 = vmatprep.mubr.f32.mxu0 %v34_v32  ;;  %1194 = vmatprep.mubr.f32.mxu1 %v80_v33  ;;  %v55_v3 = vld [vmem:[%s1862_s0 + $0xc8] sm:$0xff]  ;;  %v56_v4 = vld [vmem:[%s1862_s0 + $0xd0] sm:$0xff]  ;;  %v57_v5 = vld [vmem:[%s1862_s0 + $0xd8] sm:$0xff] }
  0x2a   :  { %v58_v6 = vld [vmem:[%s1862_s0 + $0xe0] sm:$0xff]  ;;  %v59_v7 = vld [vmem:[%s1862_s0 + $0xe8] sm:$0xff]  ;;  %v60_v8 = vld [vmem:[%s1862_s0 + $0xf0] sm:$0xff] }
  0x2b   :  { %v61_v9 = vld [vmem:[%s1862_s0 + $0xf8] sm:$0xff]  ;;  %v62_v10 = vld [vmem:[%s1862_s0 + $0x100] sm:$0xff]  ;;  %v63_v11 = vld [vmem:[%s1862_s0 + $0x108] sm:$0xff] }
  0x2c   :  { %1126 = vmatmul.mubr.f32.gmra.mrb[4].mxu0 %v35_v34  ;;  %1195 = vmatmul.mubr.f32.gmra.mrb[4].mxu1 %v81_v35  ;;  %v64_v12 = vld [vmem:[%s1862_s0 + $0x110] sm:$0xff]  ;;  %v65_v13 = vld [vmem:[%s1862_s0 + $0x118] sm:$0xff]  ;;  %v66_v14 = vld [vmem:[%s1862_s0 + $0x120] sm:$0xff] }
  0x2d   :  { %1128 = vmatprep.mubr.f32.mxu0 %v36_v36  ;;  %1197 = vmatprep.mubr.f32.mxu1 %v82_v37  ;;  %v67_v15 = vld [vmem:[%s1862_s0 + $0x128] sm:$0xff]  ;;  %v68_v16 = vld [vmem:[%s1862_s0 + $0x130] sm:$0xff]  ;;  %v69_v17 = vld [vmem:[%s1862_s0 + $0x138] sm:$0xff] }
  0x2e   :  { %v70_v18 = vld [vmem:[%s1862_s0 + $0x140] sm:$0xff]  ;;  %v71_v19 = vld [vmem:[%s1862_s0 + $0x148] sm:$0xff]  ;;  %v72_v20 = vld [vmem:[%s1862_s0 + $0x150] sm:$0xff] }
  0x2f   :  { %v73_v21 = vld [vmem:[%s1862_s0 + $0x158] sm:$0xff]  ;;  %v74_v22 = vld [vmem:[%s1862_s0 + $0x160] sm:$0xff]  ;;  %v75_v23 = vld [vmem:[%s1862_s0 + $0x168] sm:$0xff] }
  0x30   :  { %1129 = vmatmul.mubr.f32.gmra.mrb[6].mxu0 %v37_v38  ;;  %1198 = vmatmul.mubr.f32.gmra.mrb[6].mxu1 %v83_v39  ;;  %v566_v30 = vld [vmem:[%s1863_s1] sm:$0xff] }
  0x31   :  { %1131 = vmatprep.mubr.f32.mxu0 %v38_v40  ;;  %1200 = vmatprep.mubr.f32.mxu1 %v84_v41  ;;  %v1686_v31 = vrot.slane %v566_v30, %v574_v29  ;;  %v568_v33 = vcombine.high %v566_v30, %v566_v30  ;;  %v1695_v35 = vld [vmem:[%s1865_s3] ss:$0 sm:$0xff] }
  0x33   :  { %v583_v32 = vcombine.high %v1686_v31, %v1686_v31  ;;  %v1690_v34 = vrot.slane %v568_v33, %v574_v29 }
  0x34   :  { %1132 = vmatmul.mubr.f32.gmra.mrb[8].mxu0 %v39_v42  ;;  %1201 = vmatmul.mubr.f32.gmra.mrb[8].mxu1 %v85_v43 }
  0x35   :  { %1134 = vmatprep.mubr.f32.mxu0 %v40_v44  ;;  %1203 = vmatprep.mubr.f32.mxu1 %v86_v45 }
  0x38   :  { %1135 = vmatmul.mubr.f32.gmra.mrb[10].mxu0 %v41_v46  ;;  %1204 = vmatmul.mubr.f32.gmra.mrb[10].mxu1 %v87_v47 }
  0x39   :  { %1137 = vmatprep.mubr.f32.mxu0 %v42_v48  ;;  %1206 = vmatprep.mubr.f32.mxu1 %v88_v49 }
  0x3c   :  { %1138 = vmatmul.mubr.f32.gmra.mrb[12].mxu0 %v43_v50  ;;  %1207 = vmatmul.mubr.f32.gmra.mrb[12].mxu1 %v89_v51 }
  0x3d   :  { %1140 = vmatprep.mubr.f32.mxu0 %v44_v52  ;;  %1209 = vmatprep.mubr.f32.mxu1 %v90_v53 }
  0x40   :  { %1141 = vmatmul.mubr.f32.gmra.mrb[14].mxu0 %v45_v54  ;;  %1210 = vmatmul.mubr.f32.gmra.mrb[14].mxu1 %v91_v55 }
  0x41   :  { %1143 = vmatprep.mubr.f32.mxu0 %v46_v56  ;;  %1212 = vmatprep.mubr.f32.mxu1 %v92_v57 }
  0x44   :  { %1144 = vmatmul.mubr.f32.gmra.mrb[16].mxu0 %v47_v58  ;;  %1213 = vmatmul.mubr.f32.gmra.mrb[16].mxu1 %v93_v59 }
  0x45   :  { %1146 = vmatprep.mubr.f32.mxu0 %v48_v60  ;;  %653 = vmatprep.mubr.f32.mxu1 %v583_v32 }
  0x48   :  { %1147 = vmatmul.mubr.f32.gmra.mrb[18].mxu0 %v49_v61 }
  0x49   :  { %1149 = vmatprep.mubr.f32.mxu0 %v50_v62 }
  0x4c   :  { %1150 = vmatmul.mubr.f32.gmra.mrb[20].mxu0 %v51_v63 }
  0x4d   :  { %1152 = vmatprep.mubr.f32.mxu0 %v52_v0 }
  0x50   :  { %1153 = vmatmul.mubr.f32.gmra.mrb[22].mxu0 %v53_v1 }
  0x51   :  { %1155 = vmatprep.mubr.f32.mxu0 %v54_v2 }
  0x54   :  { %1156 = vmatmul.mubr.f32.gmra.mrb[24].mxu0 %v55_v3 }
  0x55   :  { %1158 = vmatprep.mubr.f32.mxu0 %v56_v4 }
  0x58   :  { %1159 = vmatmul.mubr.f32.gmra.mrb[26].mxu0 %v57_v5 }
  0x59   :  { %1161 = vmatprep.mubr.f32.mxu0 %v58_v6 }
  0x5c   :  { %1162 = vmatmul.mubr.f32.gmra.mrb[28].mxu0 %v59_v7 }
  0x5d   :  { %1164 = vmatprep.mubr.f32.mxu0 %v60_v8 }
  0x60   :  { %1165 = vmatmul.mubr.f32.gmra.mrb[30].mxu0 %v61_v9 }
  0x61   :  { %1167 = vmatprep.mubr.f32.mxu0 %v62_v10 }
  0x64   :  { %1168 = vmatmul.mubr.f32.gmra.mrb[32].mxu0 %v63_v11 }
  0x65   :  { %1170 = vmatprep.mubr.f32.mxu0 %v64_v12 }
  0x68   :  { %1171 = vmatmul.mubr.f32.gmra.mrb[34].mxu0 %v65_v13 }
  0x69   :  { %1173 = vmatprep.mubr.f32.mxu0 %v66_v14 }
  0x6c   :  { %1174 = vmatmul.mubr.f32.gmra.mrb[36].mxu0 %v67_v15 }
  0x6d   :  { %1176 = vmatprep.mubr.f32.mxu0 %v68_v16 }
  0x70   :  { %1177 = vmatmul.mubr.f32.gmra.mrb[38].mxu0 %v69_v17 }
  0x71   :  { %1179 = vmatprep.mubr.f32.mxu0 %v70_v18 }
  0x74   :  { %1180 = vmatmul.mubr.f32.gmra.mrb[40].mxu0 %v71_v19 }
  0x75   :  { %1182 = vmatprep.mubr.f32.mxu0 %v72_v20 }
  0x78   :  { %1183 = vmatmul.mubr.f32.gmra.mrb[42].mxu0 %v73_v21 }
  0x79   :  { %1185 = vmatprep.mubr.f32.mxu0 %v74_v22 }
  0x7c   :  { %1186 = vmatmul.mubr.f32.gmra.mrb[44].mxu0 %v75_v23 }
  0xf7   :  { %v1121_v36 = vpop.f32.mrb[0].mxu0  ;;  %v1190_v37 = vpop.f32.mrb[0].mxu1 }
  0xf8   :  { %v189_v38 = vadd.f32 %v1121_v36, %v1695_v35  ;;  %v183_v39 = vpop.f32.mrb[1].mxu0  ;;  %v419_v40 = vadd.f32 %v1190_v37, %v1695_v35  ;;  %v413_v41 = vpop.f32.mrb[1].mxu1 }
  0xf9   :  { %v184_v42 = vadd.f32 %v1695_v35, %v183_v39  ;;  %v414_v43 = vadd.f32 %v1695_v35, %v413_v41 }
  0xfa   :  { %v503_v44 = vmax.f32 %v189_v38, 0.0  ;;  %v549_v45 = vmax.f32 %v419_v40, 0.0 }
  0xfb   :  { %v502_v46 = vmax.f32 %v184_v42, 0.0  ;;  %v1124_v47 = vpop.f32.mrb[2].mxu0  ;;  %v548_v48 = vmax.f32 %v414_v43, 0.0  ;;  %v1193_v49 = vpop.f32.mrb[2].mxu1 }
  0xfc   :  { %v199_v50 = vadd.f32 %v1124_v47, %v1695_v35  ;;  %v193_v51 = vpop.f32.mrb[3].mxu0  ;;  %v429_v52 = vadd.f32 %v1193_v49, %v1695_v35  ;;  %v423_v53 = vpop.f32.mrb[3].mxu1 }
  0xfd   :  { %v1703_v54 = vpack.c.bf16 %v503_v44, %v502_v46  ;;  %v194_v55 = vadd.f32 %v1695_v35, %v193_v51  ;;  %v1706_v56 = vpack.c.bf16 %v549_v45, %v548_v48  ;;  %v424_v57 = vadd.f32 %v1695_v35, %v423_v53 }
  0xfe   :  { %v505_v58 = vmax.f32 %v199_v50, 0.0  ;;  %v551_v59 = vmax.f32 %v429_v52, 0.0 }
  0xff   :  { %v504_v60 = vmax.f32 %v194_v55, 0.0  ;;  %v1127_v61 = vpop.f32.mrb[4].mxu0  ;;  %v550_v62 = vmax.f32 %v424_v57, 0.0  ;;  %v1196_v63 = vpop.f32.mrb[4].mxu1 }
 0x100   :  { %v209_v0 = vadd.f32 %v1127_v61, %v1695_v35  ;;  %v203_v1 = vpop.f32.mrb[5].mxu0  ;;  %v439_v2 = vadd.f32 %v1196_v63, %v1695_v35  ;;  %v433_v3 = vpop.f32.mrb[5].mxu1 }
 0x101   :  { %v1711_v4 = vpack.c.bf16 %v505_v58, %v504_v60  ;;  %v204_v5 = vadd.f32 %v1695_v35, %v203_v1  ;;  %v1714_v6 = vpack.c.bf16 %v551_v59, %v550_v62  ;;  %v434_v7 = vadd.f32 %v1695_v35, %v433_v3 }
 0x102   :  { %v507_v8 = vmax.f32 %v209_v0, 0.0  ;;  %v553_v9 = vmax.f32 %v439_v2, 0.0 }
 0x103   :  { %v506_v10 = vmax.f32 %v204_v5, 0.0  ;;  %v1130_v11 = vpop.f32.mrb[6].mxu0  ;;  %v552_v12 = vmax.f32 %v434_v7, 0.0  ;;  %v1199_v13 = vpop.f32.mrb[6].mxu1 }
 0x104   :  { %v219_v14 = vadd.f32 %v1130_v11, %v1695_v35  ;;  %v213_v15 = vpop.f32.mrb[7].mxu0  ;;  %v449_v16 = vadd.f32 %v1199_v13, %v1695_v35  ;;  %v443_v17 = vpop.f32.mrb[7].mxu1 }
 0x105   :  { %v1719_v18 = vpack.c.bf16 %v507_v8, %v506_v10  ;;  %v214_v19 = vadd.f32 %v1695_v35, %v213_v15  ;;  %v1722_v20 = vpack.c.bf16 %v553_v9, %v552_v12  ;;  %v444_v21 = vadd.f32 %v1695_v35, %v443_v17 }
 0x106   :  { %v509_v22 = vmax.f32 %v219_v14, 0.0  ;;  %v555_v23 = vmax.f32 %v449_v16, 0.0 }
 0x107   :  { %v508_v24 = vmax.f32 %v214_v19, 0.0  ;;  %v1133_v25 = vpop.f32.mrb[8].mxu0  ;;  %v554_v26 = vmax.f32 %v444_v21, 0.0  ;;  %v1202_v27 = vpop.f32.mrb[8].mxu1 }
 0x108   :  { %v229_v28 = vadd.f32 %v1133_v25, %v1695_v35  ;;  %v223_v29 = vpop.f32.mrb[9].mxu0  ;;  %v459_v30 = vadd.f32 %v1202_v27, %v1695_v35  ;;  %v453_v32 = vpop.f32.mrb[9].mxu1 }
 0x109   :  { %v1727_v33 = vpack.c.bf16 %v509_v22, %v508_v24  ;;  %v224_v36 = vadd.f32 %v1695_v35, %v223_v29  ;;  %v1730_v37 = vpack.c.bf16 %v555_v23, %v554_v26  ;;  %v454_v38 = vadd.f32 %v1695_v35, %v453_v32 }
 0x10a   :  { %v511_v39 = vmax.f32 %v229_v28, 0.0  ;;  %v557_v40 = vmax.f32 %v459_v30, 0.0 }
 0x10b   :  { %v510_v41 = vmax.f32 %v224_v36, 0.0  ;;  %v1136_v42 = vpop.f32.mrb[10].mxu0  ;;  %v556_v43 = vmax.f32 %v454_v38, 0.0  ;;  %v1205_v44 = vpop.f32.mrb[10].mxu1 }
 0x10c   :  { %v239_v45 = vadd.f32 %v1136_v42, %v1695_v35  ;;  %v233_v46 = vpop.f32.mrb[11].mxu0  ;;  %v469_v47 = vadd.f32 %v1205_v44, %v1695_v35  ;;  %v463_v48 = vpop.f32.mrb[11].mxu1 }
 0x10d   :  { %v1735_v49 = vpack.c.bf16 %v511_v39, %v510_v41  ;;  %v234_v50 = vadd.f32 %v1695_v35, %v233_v46  ;;  %v1738_v51 = vpack.c.bf16 %v557_v40, %v556_v43  ;;  %v464_v52 = vadd.f32 %v1695_v35, %v463_v48 }
 0x10e   :  { %v513_v53 = vmax.f32 %v239_v45, 0.0  ;;  %v559_v55 = vmax.f32 %v469_v47, 0.0 }
 0x10f   :  { %v512_v57 = vmax.f32 %v234_v50, 0.0  ;;  %v1139_v58 = vpop.f32.mrb[12].mxu0  ;;  %v558_v59 = vmax.f32 %v464_v52, 0.0  ;;  %v1208_v60 = vpop.f32.mrb[12].mxu1 }
 0x110   :  { %v249_v61 = vadd.f32 %v1139_v58, %v1695_v35  ;;  %v243_v62 = vpop.f32.mrb[13].mxu0  ;;  %v479_v63 = vadd.f32 %v1208_v60, %v1695_v35  ;;  %v473_v0 = vpop.f32.mrb[13].mxu1 }
 0x111   :  { %v1743_v1 = vpack.c.bf16 %v513_v53, %v512_v57  ;;  %v244_v2 = vadd.f32 %v1695_v35, %v243_v62  ;;  %v1746_v3 = vpack.c.bf16 %v559_v55, %v558_v59  ;;  %v474_v5 = vadd.f32 %v1695_v35, %v473_v0 }
 0x112   :  { %v515_v7 = vmax.f32 %v249_v61, 0.0  ;;  %v561_v8 = vmax.f32 %v479_v63, 0.0 }
 0x113   :  { %v514_v9 = vmax.f32 %v244_v2, 0.0  ;;  %v1142_v10 = vpop.f32.mrb[14].mxu0  ;;  %v560_v11 = vmax.f32 %v474_v5, 0.0  ;;  %v1211_v12 = vpop.f32.mrb[14].mxu1 }
 0x114   :  { %v259_v13 = vadd.f32 %v1142_v10, %v1695_v35  ;;  %v253_v14 = vpop.f32.mrb[15].mxu0  ;;  %v489_v15 = vadd.f32 %v1211_v12, %v1695_v35  ;;  %v483_v16 = vpop.f32.mrb[15].mxu1 }
 0x115   :  { %v1751_v17 = vpack.c.bf16 %v515_v7, %v514_v9  ;;  %v254_v19 = vadd.f32 %v1695_v35, %v253_v14  ;;  %v1754_v21 = vpack.c.bf16 %v561_v8, %v560_v11  ;;  %v484_v22 = vadd.f32 %v1695_v35, %v483_v16 }
 0x116   :  { %v517_v23 = vmax.f32 %v259_v13, 0.0  ;;  %v563_v24 = vmax.f32 %v489_v15, 0.0 }
 0x117   :  { %v516_v25 = vmax.f32 %v254_v19, 0.0  ;;  %v1145_v26 = vpop.f32.mrb[16].mxu0  ;;  %v562_v27 = vmax.f32 %v484_v22, 0.0  ;;  %v1214_v28 = vpop.f32.mrb[16].mxu1 }
 0x118   :  { %v269_v29 = vadd.f32 %v1145_v26, %v1695_v35  ;;  %v263_v30 = vpop.f32.mrb[17].mxu0  ;;  %v499_v32 = vadd.f32 %v1214_v28, %v1695_v35  ;;  %v493_v36 = vpop.f32.mrb[17].mxu1 }
 0x119   :  { %v1759_v38 = vpack.c.bf16 %v517_v23, %v516_v25  ;;  %v264_v39 = vadd.f32 %v1695_v35, %v263_v30  ;;  %v1762_v40 = vpack.c.bf16 %v563_v24, %v562_v27  ;;  %v494_v41 = vadd.f32 %v1695_v35, %v493_v36 }
 0x11a   :  { %v519_v42 = vmax.f32 %v269_v29, 0.0  ;;  %v565_v43 = vmax.f32 %v499_v32, 0.0 }
 0x11b   :  { %v518_v44 = vmax.f32 %v264_v39, 0.0  ;;  %v1148_v45 = vpop.f32.mrb[18].mxu0  ;;  %v564_v46 = vmax.f32 %v494_v41, 0.0 }
 0x11c   :  { %v279_v47 = vadd.f32 %v1148_v45, %v1695_v35  ;;  %v273_v48 = vpop.f32.mrb[19].mxu0 }
 0x11d   :  { %v1269_v50 = vpack.c.bf16 %v519_v42, %v518_v44  ;;  %v274_v52 = vadd.f32 %v1695_v35, %v273_v48  ;;  %v1767_v53 = vpack.c.bf16 %v565_v43, %v564_v46 }
 0x11e   :  { %v521_v55 = vmax.f32 %v279_v47, 0.0 }
 0x11f   :  { %v520_v57 = vmax.f32 %v274_v52, 0.0  ;;  %v1151_v58 = vpop.f32.mrb[20].mxu0  ;;  %1270 = vmatprep.subr.bf16.mxu1 %v1269_v50 }
 0x120   :  { %v289_v59 = vadd.f32 %v1151_v58, %v1695_v35  ;;  %v283_v60 = vpop.f32.mrb[21].mxu0  ;;  %1272 = vmatpush3.bf16.msra.mxu1 %v1703_v54 }
 0x121   :  { %v1273_v61 = vpack.c.bf16 %v521_v55, %v520_v57  ;;  %v284_v62 = vadd.f32 %v1695_v35, %v283_v60  ;;  %v584_v60 = vcombine.high %v1690_v34, %v1690_v34 }
 0x122   :  { %v523_v63 = vmax.f32 %v289_v59, 0.0 }
 0x123   :  { %v522_v0 = vmax.f32 %v284_v62, 0.0  ;;  %v1154_v2 = vpop.f32.mrb[22].mxu0  ;;  %1274 = vmatprep.subr.bf16.mxu1 %v1273_v61 }
 0x124   :  { %v299_v5 = vadd.f32 %v1154_v2, %v1695_v35  ;;  %v293_v7 = vpop.f32.mrb[23].mxu0  ;;  %1276 = vmatpush3.bf16.msra.mxu1 %v1711_v4 }
 0x125   :  { %v1277_v8 = vpack.c.bf16 %v523_v63, %v522_v0  ;;  %v294_v9 = vadd.f32 %v1695_v35, %v293_v7 }
 0x126   :  { %v525_v10 = vmax.f32 %v299_v5, 0.0 }
 0x127   :  { %v524_v11 = vmax.f32 %v294_v9, 0.0  ;;  %v1157_v12 = vpop.f32.mrb[24].mxu0  ;;  %1278 = vmatprep.subr.bf16.mxu1 %v1277_v8 }
 0x128   :  { %v309_v54 = vadd.f32 %v1157_v12, %v1695_v35  ;;  %v303_v13 = vpop.f32.mrb[25].mxu0  ;;  %1280 = vmatpush3.bf16.msra.mxu1 %v1719_v18 }
 0x129   :  { %v1281_v14 = vpack.c.bf16 %v525_v10, %v524_v11  ;;  %v304_v15 = vadd.f32 %v1695_v35, %v303_v13 }
 0x12a   :  { %v527_v16 = vmax.f32 %v309_v54, 0.0 }
 0x12b   :  { %v526_v19 = vmax.f32 %v304_v15, 0.0  ;;  %v1160_v22 = vpop.f32.mrb[26].mxu0  ;;  %1282 = vmatprep.subr.bf16.mxu1 %v1281_v14 }
 0x12c   :  { %v319_v4 = vadd.f32 %v1160_v22, %v1695_v35  ;;  %v313_v23 = vpop.f32.mrb[27].mxu0  ;;  %1284 = vmatpush3.bf16.msra.mxu1 %v1727_v33 }
 0x12d   :  { %v1285_v24 = vpack.c.bf16 %v527_v16, %v526_v19  ;;  %v314_v25 = vadd.f32 %v1695_v35, %v313_v23 }
 0x12e   :  { %v529_v26 = vmax.f32 %v319_v4, 0.0 }
 0x12f   :  { %v528_v27 = vmax.f32 %v314_v25, 0.0  ;;  %v1163_v28 = vpop.f32.mrb[28].mxu0  ;;  %1286 = vmatprep.subr.bf16.mxu1 %v1285_v24 }
 0x130   :  { %v329_v18 = vadd.f32 %v1163_v28, %v1695_v35  ;;  %v323_v29 = vpop.f32.mrb[29].mxu0  ;;  %1288 = vmatpush3.bf16.msra.mxu1 %v1735_v49 }
 0x131   :  { %v1289_v30 = vpack.c.bf16 %v529_v26, %v528_v27  ;;  %v324_v32 = vadd.f32 %v1695_v35, %v323_v29 }
 0x132   :  { %v531_v36 = vmax.f32 %v329_v18, 0.0 }
 0x133   :  { %v530_v39 = vmax.f32 %v324_v32, 0.0  ;;  %v1166_v41 = vpop.f32.mrb[30].mxu0  ;;  %1290 = vmatprep.subr.bf16.mxu1 %v1289_v30 }
 0x134   :  { %v339_v33 = vadd.f32 %v1166_v41, %v1695_v35  ;;  %v333_v42 = vpop.f32.mrb[31].mxu0  ;;  %1292 = vmatpush3.bf16.msra.mxu1 %v1743_v1 }
 0x135   :  { %v1293_v43 = vpack.c.bf16 %v531_v36, %v530_v39  ;;  %v334_v44 = vadd.f32 %v1695_v35, %v333_v42 }
 0x136   :  { %v533_v45 = vmax.f32 %v339_v33, 0.0 }
 0x137   :  { %v532_v46 = vmax.f32 %v334_v44, 0.0  ;;  %1294 = vmatprep.subr.bf16.mxu1 %v1293_v43  ;;  %v1169_v47 = vpop.f32.mrb[32].mxu0 }
 0x138   :  { %v349_v49 = vadd.f32 %v1169_v47, %v1695_v35  ;;  %1296 = vmatpush3.bf16.msra.mxu1 %v1751_v17  ;;  %v343_v48 = vpop.f32.mrb[33].mxu0  ;;  %v816_v47 = vld [vmem:[%s1868_s6 + $0x8] sm:$0xff] }
 0x139   :  { %v1297_v50 = vpack.c.bf16 %v533_v45, %v532_v46  ;;  %v344_v52 = vadd.f32 %v1695_v35, %v343_v48  ;;  %v815_v46 = vld [vmem:[%s1868_s6] sm:$0xff] }
 0x13a   :  { %v535_v55 = vmax.f32 %v349_v49, 0.0 }
 0x13b   :  { %v534_v57 = vmax.f32 %v344_v52, 0.0  ;;  %1298 = vmatprep.subr.bf16.mxu1 %v1297_v50  ;;  %v1172_v58 = vpop.f32.mrb[34].mxu0  ;;  %v1340_v50 = vpack.c.bf16 %v816_v47, %v815_v46 }
 0x13c   :  { %v359_v1 = vadd.f32 %v1172_v58, %v1695_v35  ;;  %1300 = vmatpush3.bf16.msra.mxu1 %v1759_v38  ;;  %v353_v59 = vpop.f32.mrb[35].mxu0 }
 0x13d   :  { %v1303_v61 = vpack.c.bf16 %v535_v55, %v534_v57  ;;  %v354_v62 = vadd.f32 %v1695_v35, %v353_v59  ;;  %1302 = vmatprep.subr.bf16.mxu1 %v1714_v6  ;;  %v817_v55 = vld [vmem:[%s1868_s6 + $0x10] sm:$0xff]  ;;  %v818_v57 = vld [vmem:[%s1868_s6 + $0x18] sm:$0xff] }
 0x13e   :  { %v537_v17 = vmax.f32 %v359_v1, 0.0  ;;  %v1343_v58 = vpack.c.bf16 %v818_v57, %v817_v55  ;;  %v923_v1 = vld [vmem:[%s1867_s5] ss:$0 sm:$0xff]  ;;  %s1397_s5 = smov [#allocation2]  }
 0x13f   :  { %v536_v63 = vmax.f32 %v354_v62, 0.0  ;;  %v1175_v0 = vpop.f32.mrb[36].mxu0  ;;  %654 = vmatmul.mubr.f32.vlgmr.msra.gmra.mrb[18].mxu1 %v1686_v31  ;;  %s914_s6 = sshll.u32 %s1397_s5, 4  ;;  %s915_s6 = int_to_ptr.vmem [resolvable:$true] %s914_s6 }
 0x140   :  { %v369_v2 = vadd.f32 %v1175_v0, %v1695_v35  ;;  %1304 = vmatpush3.bf16.msra.mxu1 %v1303_v61  ;;  %v363_v5 = vpop.f32.mrb[37].mxu0  ;;  %723 = vmatprep.mubr.f32.mxu1 %v584_v60  ;;  %s1369_s24 = scalar_lea.vmem %s915_s6, 32  ;;  %p1374_p1 = scmp.lt.s32.totalorder %s915_s6, %s915_s6 }
 0x141   :  { %v1307_v38 = vpack.c.bf16 %v537_v17, %v536_v63  ;;  %v364_v7 = vadd.f32 %v1695_v35, %v363_v5  ;;  %1306 = vmatprep.subr.bf16.mxu1 %v1722_v20  ;;  %v925_v17 = vld [vmem:[%s1869_s7] ss:$0 sm:$0xff]  ;;  %p1370_p0 = scmp.ne.s32.totalorder %s915_s6, %s1369_s24  ;;  %p1375_p2 = scmp.lt.s32.totalorder %s1369_s24, %s1369_s24 }
 0x142   :  { %v539_v8 = vmax.f32 %v369_v2, 0.0 }
 0x143   :  { %v538_v9 = vmax.f32 %v364_v7, 0.0  ;;  %v1178_v10 = vpop.f32.mrb[38].mxu0  ;;  %p1376_p3 = por %p1375_p2, %p1374_p1 }
 0x144   :  { %v379_v6 = vadd.f32 %v1178_v10, %v1695_v35  ;;  %1308 = vmatpush3.bf16.msra.mxu1 %v1307_v38  ;;  %v373_v11 = vpop.f32.mrb[39].mxu0 }
 0x145   :  { %v1311_v12 = vpack.c.bf16 %v539_v8, %v538_v9  ;;  %v374_v31 = vadd.f32 %v1695_v35, %v373_v11  ;;  %1310 = vmatprep.subr.bf16.mxu1 %v1730_v37  ;;  %p1377_p4 = pnand %p1376_p3, %p1370_p0 }
 0x146   :  { %v541_v54 = vmax.f32 %v379_v6, 0.0 }
 0x147   :  { %v540_v13 = vmax.f32 %v374_v31, 0.0  ;;  %v1181_v14 = vpop.f32.mrb[40].mxu0 }
 0x148   :  { %v389_v15 = vadd.f32 %v1181_v14, %v1695_v35  ;;  %1312 = vmatpush3.bf16.msra.mxu1 %v1311_v12  ;;  %v383_v16 = vpop.f32.mrb[41].mxu0 }
 0x149   :  { %v1315_v20 = vpack.c.bf16 %v541_v54, %v540_v13  ;;  %v384_v19 = vadd.f32 %v1695_v35, %v383_v16  ;;  %1314 = vmatprep.subr.bf16.mxu1 %v1738_v51 }
 0x14a   :  { %v543_v22 = vmax.f32 %v389_v15, 0.0 }
 0x14b   :  { %v542_v4 = vmax.f32 %v384_v19, 0.0  ;;  %v1184_v23 = vpop.f32.mrb[42].mxu0 }
 0x14c   :  { %v399_v24 = vadd.f32 %v1184_v23, %v1695_v35  ;;  %1316 = vmatpush3.bf16.msra.mxu1 %v1315_v20  ;;  %v393_v25 = vpop.f32.mrb[43].mxu0 }
 0x14d   :  { %v1319_v37 = vpack.c.bf16 %v543_v22, %v542_v4  ;;  %v394_v26 = vadd.f32 %v1695_v35, %v393_v25  ;;  %1318 = vmatprep.subr.bf16.mxu1 %v1746_v3  ;;  %v729_v3 = vld [vmem:[%s1866_s4] sm:$0xff] }
 0x14e   :  { %v545_v27 = vmax.f32 %v399_v24, 0.0 }
 0x14f   :  { %v544_v28 = vmax.f32 %v394_v26, 0.0  ;;  %v1187_v18 = vpop.f32.mrb[44].mxu0 }
 0x150   :  { %v409_v29 = vadd.f32 %v1187_v18, %v1695_v35  ;;  %1320 = vmatpush3.bf16.msra.mxu1 %v1319_v37  ;;  %v403_v30 = vpop.f32.mrb[45].mxu0 }
 0x151   :  { %v1323_v51 = vpack.c.bf16 %v545_v27, %v544_v28  ;;  %v404_v32 = vadd.f32 %v1695_v35, %v403_v30  ;;  %1322 = vmatprep.subr.bf16.mxu1 %v1754_v21  ;;  %v730_v35 = vld [vmem:[%s1866_s4 + $0x8] sm:$0xff]  ;;  %v1394_v21 = vmov 0.0|0.0  }
 0x152   :  { %v547_v36 = vmax.f32 %v409_v29, 0.0  ;;  %v1334_v33 = vpack.c.bf16 %v730_v35, %v729_v3 }
 0x153   :  { %v546_v39 = vmax.f32 %v404_v32, 0.0 }
 0x154   :  { %1324 = vmatpush3.bf16.msra.mxu1 %v1323_v51 }
 0x155   :  { %v1327_v41 = vpack.c.bf16 %v547_v36, %v546_v39  ;;  %1326 = vmatprep.subr.bf16.mxu1 %v1762_v40  ;;  %v731_v40 = vld [vmem:[%s1866_s4 + $0x10] sm:$0xff] }
 0x158   :  { %1328 = vmatpush3.bf16.msra.mxu1 %v1327_v41 }
 0x159   :  { %1330 = vmatprep.subr.bf16.mxu1 %v1767_v53  ;;  %v1396_v53 = vmov 0.0  }
 0x15c   :  { %1332 = vmatpush3.bf16.msra.mxu1 %v1706_v56 }
 0x15d   :  { %1333 = vmatprep.subr.bf16.mxu1 %v1394_v21 }
 0x15f   :  { %724 = vmatmul.mubr.f32.vlgmr.msra.gmra.mrb[20].mxu1 %v1690_v34  ;;  %v732_v34 = vld [vmem:[%s1866_s4 + $0x18] sm:$0xff] }
 0x160   :  { %1335 = vmatpush3.bf16.msra.mxu1 %v1334_v33  ;;  %v1337_v56 = vpack.c.bf16 %v732_v34, %v731_v40  ;;  %1223 = vmatprep.mubr.msk.f32.mxu1 %vm1395_vm0, %v1396_v53 }
 0x161   :  { %1336 = vmatprep.subr.bf16.mxu1 %v1394_v21 }
 0x164   :  { %1338 = vmatpush3.bf16.msra.mxu1 %v1337_v56 }
 0x165   :  { %1339 = vmatprep.subr.bf16.mxu1 %v1394_v21 }
 0x212   :  { %v1039_v42 = vpop.f32.mrb[18].mxu1 }
 0x213   :  { %v1040_v43 = vpop.f32.mrb[19].mxu1 }
 0x214   :  { %v1041_v44 = vadd.f32 %v1040_v43, %v1039_v42 }
 0x232   :  { %v1074_v45 = vpop.f32.mrb[20].mxu1 }
 0x233   :  { %v1075_v49 = vpop.f32.mrb[21].mxu1 }
 0x234   :  { %v1076_v48 = vadd.f32 %v1075_v49, %v1074_v45 }
 0x236   :  { %v726_v52 = vadd.f32 %v1076_v48, %v1041_v44 }
 0x238   :  { %1224 = vmatmul.mubr.msk.f32.vlgmr.msra.gmra.mrb[22].mxu1 %vm740_vm1, %v726_v52 }
 0x239   :  { %1341 = vmatpush3.bf16.msra.mxu1 %v1340_v50  ;;  %1234 = vmatprep.mubr.msk.f32.mxu1 %vm1395_vm0, %v1396_v53 }
 0x23a   :  { %1342 = vmatprep.subr.bf16.mxu1 %v1394_v21 }
 0x23d   :  { %1344 = vmatpush3.bf16.msra.mxu1 %v1343_v58 }
 0x30b   :  { %v810_v59 = vpop.f32.mrb[22].mxu1 }
 0x30c   :  { %v811_v60 = vadd.f32 %v923_v1, %v810_v59  ;;  %v1225_v61 = vpop.f32.mrb[23].mxu1 }
 0x30e   :  { %v814_v62 = vmax.f32 %v811_v60, 0.0 }
 0x310   :  { %1235 = vmatmul.mubr.msk.f32.vlgmr.msra.gmra.mrb[24].mxu1 %vm740_vm1, %v814_v62 }
 0x3e3   :  { %v895_v63 = vpop.f32.mrb[24].mxu1 }
 0x3e4   :  { %v896_v0 = vadd.f32 %v925_v17, %v895_v63  ;;  %v1236_v2 = vpop.f32.mrb[25].mxu1 }
 0x3e6   :  { %v899_v5 = vmul.f32 %v896_v0, %v896_v0 }
 0x3e8   :  { %v901_v38 = vsel %vm900_vm2, %v899_v5, 0.0 }
 0x3e9   :  { %902 = vadd.xlane.f32.xlu0 %v901_v38 }
 0x476   :  { %v903_v7 = vpop.xlane.xlu0 %902 }
 0x477   :  { %v904_v8 = vmax.f32 %v903_v7, 1e-24 }
 0x479   :  { %1367 = vrsqrt.f32 %v904_v8 }
 0x483   :  { %v1368_v9 = vpop.eup %1367 }
 0x484   :  { %v906_v10 = vmul.f32 %v1368_v9, %v896_v0 }
 0x486   :  { %907 = vst [vmem:[#allocation2] sm:$0x3] %v906_v10 }
 0x487   :  { %1380 = shalt.err (!%p1377_p4)
}
 0x488   :  { %s1381_s26 = scalar_lea.hbm %s1870_s8, 32 }
 0x489   :  { %p1382_p5 = scmp.ne.s32.totalorder %s1870_s8, %s1381_s26  ;;  %p1385_p6 = scmp.lt.u32.totalorder %s1381_s26, %s1870_s8 }
 0x48b   :  { %p1387_p7 = pnand %p1385_p6, %p1382_p5 }
 0x48d   :  { %1390 = shalt.err (!%p1387_p7)
}
 0x48e   :  { %917 = dma.vmem_to_hbm [thread:$0]  %s915_s6, 32, %s1870_s8, [#allocation3]  }
 0x48f   :  { %1391 = dma.done.wait [#allocation3], 32  }
 0x490   :  { %1392 = vsyncadd [#allocation3], 4294967264 }
 0x491   :  { %921 = vsyncpa [#allocation3], 1 }

</bundles_post_ra>
